<compile_context>
chip_gen: v5e
topology: v5e:2x2
jax: 0.10.0
libtpu: 0.0.40
codegen_flags: <defaults>
</compile_context>

<pallas_src>
import jax
import jax.numpy as jnp
from jax.experimental import pallas as pl
from jax.experimental.pallas import tpu as pltpu

# Hyperparameters from simple_lstm.__init__ defaults
IN_F = 10        # lstm_input_feature_size
HID = 20         # lstm_hidden_size
HID_P = 32       # padded hidden size -> 4*HID_P = 128 lanes (one vreg per gate row)
GATES = 4 * HID_P
N_LIN = 4        # n_features_to_linear
N_LAYERS = 3     # num_lstm_layers for lstm1
B = 2            # batch (n_samples)
T = 8            # sequence_length


def simple_lstm_kernel(x_ref,
                       wih0, whh0, wih1, whh1, wih2, whh2,
                       wih_l2, whh_l2, wlin, blin,
                       out_ref,
                       seq_buf):
    # ----------------- lstm1: 3 stacked unidirectional LSTM layers ----------
    for layer, (wih_r, whh_r) in enumerate(((wih0, whh0), (wih1, whh1), (wih2, whh2))):
        layer_in = x_ref[...] if layer == 0 else seq_buf[...]     # (T*B, F/HID_P)

        # Hoisted input projection: ONE batched matmul off the serial path.
        ih = jnp.dot(layer_in, wih_r[...],
                     preferred_element_type=jnp.float32)          # (T*B, 128)
        whh = whh_r[...]                                          # (HID_P, 128)

        h = jnp.zeros((B, HID_P), jnp.float32)
        c = jnp.zeros((B, HID_P), jnp.float32)
        for t in range(T):                                        # fully unrolled
            # recurrent path: single tiny (B, HID_P) @ (HID_P, 128) matmul
            g = ih[t * B:(t + 1) * B, :] + jnp.dot(
                h, whh, preferred_element_type=jnp.float32)       # (B, 128)
            # one sigmoid + one tanh over the full gate vreg, then slice i/f/g/o
            sg = jax.nn.sigmoid(g)
            tg = jnp.tanh(g)
            i_g = sg[:, 0 * HID_P:1 * HID_P]
            f_g = sg[:, 1 * HID_P:2 * HID_P]
            g_g = tg[:, 2 * HID_P:3 * HID_P]
            o_g = sg[:, 3 * HID_P:4 * HID_P]
            c = f_g * c + i_g * g_g
            h = o_g * jnp.tanh(c)
            seq_buf[t * B:(t + 1) * B, :] = h                     # static slice store
        # padded lanes [HID:HID_P) stay exactly 0 through c/h (zero weights)

    # torch: view(B,T,HID,-1) + sum(-1) is an identity for a unidirectional LSTM

    # ----------------- lstm2: single layer, hidden size 1 -------------------
    # x-path hoisted to one (T*B, HID_P) @ (HID_P, 4) matmul; recurrence is a
    # pure VPU broadcast multiply (no MXU round-trip on the serial chain).
    ih2 = jnp.dot(seq_buf[...], wih_l2[...],
                  preferred_element_type=jnp.float32)             # (T*B, 4)
    whh_row = whh_l2[...]                                         # (1, 4)

    h2 = jnp.zeros((B, 1), jnp.float32)
    c2 = jnp.zeros((B, 1), jnp.float32)
    z = jnp.zeros((B, 1), jnp.float32)                            # folded Linear acc
    for t in range(T):                                            # fully unrolled
        g2 = ih2[t * B:(t + 1) * B, :] + h2 * whh_row             # (B, 4), VPU only
        sg2 = jax.nn.sigmoid(g2)
        tg2 = jnp.tanh(g2)
        c2 = sg2[:, 1:2] * c2 + sg2[:, 0:1] * tg2[:, 2:3]         # f*c + i*g
        h2 = sg2[:, 3:4] * jnp.tanh(c2)                           # o*tanh(c)
        if t >= T - N_LIN:                                        # compile-time branch
            z = z + h2 * wlin[t - (T - N_LIN)]                    # fold Linear(4,1)

    out_ref[...] = jax.nn.sigmoid(z + blin[0])                    # (B, 1)


def _pad_gates(w, in_pad):
    """torch-layout (4*HID, in_dim) -> transposed, gate-padded (in_pad, 4*HID_P).

    Each gate's HID columns are placed at a 32-lane-aligned slot; all padding
    (extra rows and extra per-gate columns) is zero so padded hidden units stay
    exactly zero through the recurrence.
    """
    w_t = jnp.asarray(w, jnp.float32).T                           # (in_dim, 4*HID)
    in_dim = w_t.shape[0]
    out = jnp.zeros((in_pad, GATES), jnp.float32)
    for g in range(4):
        out = out.at[:in_dim, g * HID_P:g * HID_P + HID].set(
            w_t[:, g * HID:(g + 1) * HID])
    return out


def simple_lstm_forward(x, params):
    """x: (B, T, IN_F) float32 -> (B,) float32"""
    (wih0, whh0, wih1, whh1, wih2, whh2, wih_l2, whh_l2, wlin, blin) = params

    # time-major, flattened (row t*B + b == x[b, t, :])
    x_flat = jnp.transpose(x, (1, 0, 2)).reshape(T * B, IN_F).astype(jnp.float32)

    wih0_p = _pad_gates(wih0, IN_F)        # (IN_F, 128)
    whh0_p = _pad_gates(whh0, HID_P)       # (32, 128)
    wih1_p = _pad_gates(wih1, HID_P)
    whh1_p = _pad_gates(whh1, HID_P)
    wih2_p = _pad_gates(wih2, HID_P)
    whh2_p = _pad_gates(whh2, HID_P)

    wih_l2_p = jnp.zeros((HID_P, 4), jnp.float32).at[:HID, :].set(
        jnp.asarray(wih_l2, jnp.float32).T)                       # (32, 4)
    whh_l2_row = jnp.asarray(whh_l2, jnp.float32).T               # (1, 4)
    wlin_v = jnp.asarray(wlin, jnp.float32).reshape(N_LIN)        # (4,)  -> SMEM
    blin_v = jnp.asarray(blin, jnp.float32).reshape(1)            # (1,)  -> SMEM

    vmem = pl.BlockSpec(memory_space=pltpu.MemorySpace.VMEM)
    smem = pl.BlockSpec(memory_space=pltpu.MemorySpace.SMEM)

    out = pl.pallas_call(
        simple_lstm_kernel,
        out_shape=jax.ShapeDtypeStruct((B, 1), jnp.float32),
        in_specs=[vmem] * 9 + [smem, smem],
        out_specs=vmem,
        scratch_shapes=[pltpu.VMEM((T * B, HID_P), jnp.float32)],  # flat seq buffer
    )(x_flat, wih0_p, whh0_p, wih1_p, whh1_p, wih2_p, whh2_p,
      wih_l2_p, whh_l2_row, wlin_v, blin_v)
    return out[:, 0]


# ------------------------- pure-JAX reference ------------------------------
def _lstm_stack_ref(x, w_ih_list, w_hh_list, hsz):
    out = x
    for w_ih, w_hh in zip(w_ih_list, w_hh_list):
        Bn, Tn, _ = out.shape
        h = jnp.zeros((Bn, hsz), jnp.float32)
        c = jnp.zeros((Bn, hsz), jnp.float32)
        ys = []
        for t in range(Tn):
            g = out[:, t] @ w_ih.T + h @ w_hh.T
            i = jax.nn.sigmoid(g[:, :hsz])
            f = jax.nn.sigmoid(g[:, hsz:2 * hsz])
            gg = jnp.tanh(g[:, 2 * hsz:3 * hsz])
            o = jax.nn.sigmoid(g[:, 3 * hsz:])
            c = f * c + i * gg
            h = o * jnp.tanh(c)
            ys.append(h)
        out = jnp.stack(ys, axis=1)
    return out


def reference_forward(x, params):
    (wih0, whh0, wih1, whh1, wih2, whh2, wih_l2, whh_l2, wlin, blin) = params
    h1 = _lstm_stack_ref(x, [wih0, wih1, wih2], [whh0, whh1, whh2], HID)
    h2 = _lstm_stack_ref(h1, [wih_l2], [whh_l2], 1)            # (B, T, 1)
    feats = h2[:, -N_LIN:, 0]                                  # (B, N_LIN)
    z = feats @ wlin.T + blin                                  # (B, 1)
    return jax.nn.sigmoid(z)[:, 0]


def init_params(key):
    """Deterministic PyTorch-style uniform(-1/sqrt(hidden), 1/sqrt(hidden))."""
    keys = jax.random.split(key, 10)

    def u(kk, shape, scale):
        return jax.random.uniform(kk, shape, jnp.float32, -scale, scale)

    k1 = 1.0 / float(HID) ** 0.5
    wih0 = u(keys[0], (4 * HID, IN_F), k1)
    whh0 = u(keys[1], (4 * HID, HID), k1)
    wih1 = u(keys[2], (4 * HID, HID), k1)
    whh1 = u(keys[3], (4 * HID, HID), k1)
    wih2 = u(keys[4], (4 * HID, HID), k1)
    whh2 = u(keys[5], (4 * HID, HID), k1)
    k2 = 1.0                       # 1/sqrt(hidden=1)
    wih_l2 = u(keys[6], (4 * 1, HID), k2)
    whh_l2 = u(keys[7], (4 * 1, 1), k2)
    kl = 1.0 / float(N_LIN) ** 0.5
    wlin = u(keys[8], (1, N_LIN), kl)
    blin = u(keys[9], (1,), kl)
    return (wih0, whh0, wih1, whh1, wih2, whh2, wih_l2, whh_l2, wlin, blin)


if __name__ == "__main__":
    key = jax.random.PRNGKey(0)
    k_param, k_x = jax.random.split(key)
    params = init_params(k_param)
    x = jax.random.normal(k_x, (B, T, IN_F), jnp.float32)

    y = simple_lstm_forward(x, params)
    jax.block_until_ready(y)

    y_ref = reference_forward(x, params)
    assert y.shape == (B,), y.shape
    assert jnp.allclose(y, y_ref, rtol=1e-3, atol=1e-3), (y, y_ref)
    print("KERNEL_OK")
</pallas_src>

<mosaic_0001>
module attributes {stable_mosaic.version = 11 : i64} {
  func.func @simple_lstm_kernel(%arg0: memref<16x10xf32, #tpu.memory_space<vmem>>, %arg1: memref<10x128xf32, #tpu.memory_space<vmem>>, %arg2: memref<32x128xf32, #tpu.memory_space<vmem>>, %arg3: memref<32x128xf32, #tpu.memory_space<vmem>>, %arg4: memref<32x128xf32, #tpu.memory_space<vmem>>, %arg5: memref<32x128xf32, #tpu.memory_space<vmem>>, %arg6: memref<32x128xf32, #tpu.memory_space<vmem>>, %arg7: memref<32x4xf32, #tpu.memory_space<vmem>>, %arg8: memref<1x4xf32, #tpu.memory_space<vmem>>, %arg9: memref<4xf32, #tpu.memory_space<smem>>, %arg10: memref<1xf32, #tpu.memory_space<smem>>, %arg11: memref<2x1xf32, #tpu.memory_space<vmem>>, %arg12: memref<16x32xf32, #tpu.memory_space<vmem>>) attributes {dimension_semantics = [], scalar_prefetch = 0 : i64, scratch_operands = 1 : i64, tpu.core_type = #tpu.core_type<tc>} {
    %c0 = arith.constant 0 : index
    %c0_0 = arith.constant 0 : index
    %0 = vector.load %arg0[%c0, %c0_0] : memref<16x10xf32, #tpu.memory_space<vmem>>, vector<16x10xf32>
    %c0_1 = arith.constant 0 : index
    %c0_2 = arith.constant 0 : index
    %1 = vector.load %arg1[%c0_1, %c0_2] : memref<10x128xf32, #tpu.memory_space<vmem>>, vector<10x128xf32>
    %cst = arith.constant dense<0.000000e+00> : vector<16x128xf32>
    %2 = tpu.matmul %0, %1, %cst {dimension_numbers = #tpu.dot_dimension_numbers<[1], [0], [0], [1], [0, 0, 1, 1], [], []>} : vector<16x10xf32>, vector<10x128xf32>, vector<16x128xf32> -> vector<16x128xf32>
    %c0_3 = arith.constant 0 : index
    %c0_4 = arith.constant 0 : index
    %3 = vector.load %arg2[%c0_3, %c0_4] : memref<32x128xf32, #tpu.memory_space<vmem>>, vector<32x128xf32>
    %cst_5 = arith.constant 0.000000e+00 : f32
    %4 = vector.broadcast %cst_5 : f32 to vector<2x32xf32>
    %cst_6 = arith.constant 0.000000e+00 : f32
    %5 = vector.broadcast %cst_6 : f32 to vector<2x32xf32>
    %6 = vector.extract_strided_slice %2 {offsets = [0, 0], sizes = [2, 128], strides = [1, 1]} : vector<16x128xf32> to vector<2x128xf32>
    %cst_7 = arith.constant dense<0.000000e+00> : vector<2x128xf32>
    %7 = tpu.matmul %4, %3, %cst_7 {dimension_numbers = #tpu.dot_dimension_numbers<[1], [0], [0], [1], [0, 0, 1, 1], [], []>} : vector<2x32xf32>, vector<32x128xf32>, vector<2x128xf32> -> vector<2x128xf32>
    %8 = arith.addf %6, %7 : vector<2x128xf32>
    %9 = arith.negf %8 : vector<2x128xf32>
    %10 = math.exp %9 : vector<2x128xf32>
    %cst_8 = arith.constant 1.000000e+00 : f32
    %11 = vector.broadcast %cst_8 : f32 to vector<2x128xf32>
    %12 = arith.addf %11, %10 : vector<2x128xf32>
    %13 = arith.divf %11, %12 : vector<2x128xf32>
    %14 = math.tanh %8 : vector<2x128xf32>
    %15 = vector.extract_strided_slice %13 {offsets = [0, 0], sizes = [2, 32], strides = [1, 1]} : vector<2x128xf32> to vector<2x32xf32>
    %16 = vector.extract_strided_slice %13 {offsets = [0, 32], sizes = [2, 32], strides = [1, 1]} : vector<2x128xf32> to vector<2x32xf32>
    %17 = vector.extract_strided_slice %14 {offsets = [0, 64], sizes = [2, 32], strides = [1, 1]} : vector<2x128xf32> to vector<2x32xf32>
    %18 = vector.extract_strided_slice %13 {offsets = [0, 96], sizes = [2, 32], strides = [1, 1]} : vector<2x128xf32> to vector<2x32xf32>
    %19 = arith.mulf %16, %5 : vector<2x32xf32>
    %20 = arith.mulf %15, %17 : vector<2x32xf32>
    %21 = arith.addf %19, %20 : vector<2x32xf32>
    %22 = math.tanh %21 : vector<2x32xf32>
    %23 = arith.mulf %18, %22 : vector<2x32xf32>
    %c0_9 = arith.constant 0 : index
    %c0_10 = arith.constant 0 : index
    %24 = vector.load %arg12[%c0_9, %c0_10] : memref<16x32xf32, #tpu.memory_space<vmem>>, vector<2x32xf32>
    tpu.vector_store %arg12[%c0_9, %c0_10], %23 {strides = array<i32>} : memref<16x32xf32, #tpu.memory_space<vmem>>, vector<2x32xf32>,
    %25 = vector.extract_strided_slice %2 {offsets = [2, 0], sizes = [2, 128], strides = [1, 1]} : vector<16x128xf32> to vector<2x128xf32>
    %cst_11 = arith.constant dense<0.000000e+00> : vector<2x128xf32>
    %26 = tpu.matmul %23, %3, %cst_11 {dimension_numbers = #tpu.dot_dimension_numbers<[1], [0], [0], [1], [0, 0, 1, 1], [], []>} : vector<2x32xf32>, vector<32x128xf32>, vector<2x128xf32> -> vector<2x128xf32>
    %27 = arith.addf %25, %26 : vector<2x128xf32>
    %28 = arith.negf %27 : vector<2x128xf32>
    %29 = math.exp %28 : vector<2x128xf32>
    %cst_12 = arith.constant 1.000000e+00 : f32
    %30 = vector.broadcast %cst_12 : f32 to vector<2x128xf32>
    %31 = arith.addf %30, %29 : vector<2x128xf32>
    %32 = arith.divf %30, %31 : vector<2x128xf32>
    %33 = math.tanh %27 : vector<2x128xf32>
    %34 = vector.extract_strided_slice %32 {offsets = [0, 0], sizes = [2, 32], strides = [1, 1]} : vector<2x128xf32> to vector<2x32xf32>
    %35 = vector.extract_strided_slice %32 {offsets = [0, 32], sizes = [2, 32], strides = [1, 1]} : vector<2x128xf32> to vector<2x32xf32>
    %36 = vector.extract_strided_slice %33 {offsets = [0, 64], sizes = [2, 32], strides = [1, 1]} : vector<2x128xf32> to vector<2x32xf32>
    %37 = vector.extract_strided_slice %32 {offsets = [0, 96], sizes = [2, 32], strides = [1, 1]} : vector<2x128xf32> to vector<2x32xf32>
    %38 = arith.mulf %35, %21 : vector<2x32xf32>
    %39 = arith.mulf %34, %36 : vector<2x32xf32>
    %40 = arith.addf %38, %39 : vector<2x32xf32>
    %41 = math.tanh %40 : vector<2x32xf32>
    %42 = arith.mulf %37, %41 : vector<2x32xf32>
    %c2 = arith.constant 2 : index
    %c0_13 = arith.constant 0 : index
    %43 = vector.load %arg12[%c2, %c0_13] : memref<16x32xf32, #tpu.memory_space<vmem>>, vector<2x32xf32>
    tpu.vector_store %arg12[%c2, %c0_13], %42 {strides = array<i32>} : memref<16x32xf32, #tpu.memory_space<vmem>>, vector<2x32xf32>,
    %44 = vector.extract_strided_slice %2 {offsets = [4, 0], sizes = [2, 128], strides = [1, 1]} : vector<16x128xf32> to vector<2x128xf32>
    %cst_14 = arith.constant dense<0.000000e+00> : vector<2x128xf32>
    %45 = tpu.matmul %42, %3, %cst_14 {dimension_numbers = #tpu.dot_dimension_numbers<[1], [0], [0], [1], [0, 0, 1, 1], [], []>} : vector<2x32xf32>, vector<32x128xf32>, vector<2x128xf32> -> vector<2x128xf32>
    %46 = arith.addf %44, %45 : vector<2x128xf32>
    %47 = arith.negf %46 : vector<2x128xf32>
    %48 = math.exp %47 : vector<2x128xf32>
    %cst_15 = arith.constant 1.000000e+00 : f32
    %49 = vector.broadcast %cst_15 : f32 to vector<2x128xf32>
    %50 = arith.addf %49, %48 : vector<2x128xf32>
    %51 = arith.divf %49, %50 : vector<2x128xf32>
    %52 = math.tanh %46 : vector<2x128xf32>
    %53 = vector.extract_strided_slice %51 {offsets = [0, 0], sizes = [2, 32], strides = [1, 1]} : vector<2x128xf32> to vector<2x32xf32>
    %54 = vector.extract_strided_slice %51 {offsets = [0, 32], sizes = [2, 32], strides = [1, 1]} : vector<2x128xf32> to vector<2x32xf32>
    %55 = vector.extract_strided_slice %52 {offsets = [0, 64], sizes = [2, 32], strides = [1, 1]} : vector<2x128xf32> to vector<2x32xf32>
    %56 = vector.extract_strided_slice %51 {offsets = [0, 96], sizes = [2, 32], strides = [1, 1]} : vector<2x128xf32> to vector<2x32xf32>
    %57 = arith.mulf %54, %40 : vector<2x32xf32>
    %58 = arith.mulf %53, %55 : vector<2x32xf32>
    %59 = arith.addf %57, %58 : vector<2x32xf32>
    %60 = math.tanh %59 : vector<2x32xf32>
    %61 = arith.mulf %56, %60 : vector<2x32xf32>
    %c4 = arith.constant 4 : index
    %c0_16 = arith.constant 0 : index
    %62 = vector.load %arg12[%c4, %c0_16] : memref<16x32xf32, #tpu.memory_space<vmem>>, vector<2x32xf32>
    tpu.vector_store %arg12[%c4, %c0_16], %61 {strides = array<i32>} : memref<16x32xf32, #tpu.memory_space<vmem>>, vector<2x32xf32>,
    %63 = vector.extract_strided_slice %2 {offsets = [6, 0], sizes = [2, 128], strides = [1, 1]} : vector<16x128xf32> to vector<2x128xf32>
    %cst_17 = arith.constant dense<0.000000e+00> : vector<2x128xf32>
    %64 = tpu.matmul %61, %3, %cst_17 {dimension_numbers = #tpu.dot_dimension_numbers<[1], [0], [0], [1], [0, 0, 1, 1], [], []>} : vector<2x32xf32>, vector<32x128xf32>, vector<2x128xf32> -> vector<2x128xf32>
    %65 = arith.addf %63, %64 : vector<2x128xf32>
    %66 = arith.negf %65 : vector<2x128xf32>
    %67 = math.exp %66 : vector<2x128xf32>
    %cst_18 = arith.constant 1.000000e+00 : f32
    %68 = vector.broadcast %cst_18 : f32 to vector<2x128xf32>
    %69 = arith.addf %68, %67 : vector<2x128xf32>
    %70 = arith.divf %68, %69 : vector<2x128xf32>
    %71 = math.tanh %65 : vector<2x128xf32>
    %72 = vector.extract_strided_slice %70 {offsets = [0, 0], sizes = [2, 32], strides = [1, 1]} : vector<2x128xf32> to vector<2x32xf32>
    %73 = vector.extract_strided_slice %70 {offsets = [0, 32], sizes = [2, 32], strides = [1, 1]} : vector<2x128xf32> to vector<2x32xf32>
    %74 = vector.extract_strided_slice %71 {offsets = [0, 64], sizes = [2, 32], strides = [1, 1]} : vector<2x128xf32> to vector<2x32xf32>
    %75 = vector.extract_strided_slice %70 {offsets = [0, 96], sizes = [2, 32], strides = [1, 1]} : vector<2x128xf32> to vector<2x32xf32>
    %76 = arith.mulf %73, %59 : vector<2x32xf32>
    %77 = arith.mulf %72, %74 : vector<2x32xf32>
    %78 = arith.addf %76, %77 : vector<2x32xf32>
    %79 = math.tanh %78 : vector<2x32xf32>
    %80 = arith.mulf %75, %79 : vector<2x32xf32>
    %c6 = arith.constant 6 : index
    %c0_19 = arith.constant 0 : index
    %81 = vector.load %arg12[%c6, %c0_19] : memref<16x32xf32, #tpu.memory_space<vmem>>, vector<2x32xf32>
    tpu.vector_store %arg12[%c6, %c0_19], %80 {strides = array<i32>} : memref<16x32xf32, #tpu.memory_space<vmem>>, vector<2x32xf32>,
    %82 = vector.extract_strided_slice %2 {offsets = [8, 0], sizes = [2, 128], strides = [1, 1]} : vector<16x128xf32> to vector<2x128xf32>
    %cst_20 = arith.constant dense<0.000000e+00> : vector<2x128xf32>
    %83 = tpu.matmul %80, %3, %cst_20 {dimension_numbers = #tpu.dot_dimension_numbers<[1], [0], [0], [1], [0, 0, 1, 1], [], []>} : vector<2x32xf32>, vector<32x128xf32>, vector<2x128xf32> -> vector<2x128xf32>
    %84 = arith.addf %82, %83 : vector<2x128xf32>
    %85 = arith.negf %84 : vector<2x128xf32>
    %86 = math.exp %85 : vector<2x128xf32>
    %cst_21 = arith.constant 1.000000e+00 : f32
    %87 = vector.broadcast %cst_21 : f32 to vector<2x128xf32>
    %88 = arith.addf %87, %86 : vector<2x128xf32>
    %89 = arith.divf %87, %88 : vector<2x128xf32>
    %90 = math.tanh %84 : vector<2x128xf32>
    %91 = vector.extract_strided_slice %89 {offsets = [0, 0], sizes = [2, 32], strides = [1, 1]} : vector<2x128xf32> to vector<2x32xf32>
    %92 = vector.extract_strided_slice %89 {offsets = [0, 32], sizes = [2, 32], strides = [1, 1]} : vector<2x128xf32> to vector<2x32xf32>
    %93 = vector.extract_strided_slice %90 {offsets = [0, 64], sizes = [2, 32], strides = [1, 1]} : vector<2x128xf32> to vector<2x32xf32>
    %94 = vector.extract_strided_slice %89 {offsets = [0, 96], sizes = [2, 32], strides = [1, 1]} : vector<2x128xf32> to vector<2x32xf32>
    %95 = arith.mulf %92, %78 : vector<2x32xf32>
    %96 = arith.mulf %91, %93 : vector<2x32xf32>
    %97 = arith.addf %95, %96 : vector<2x32xf32>
    %98 = math.tanh %97 : vector<2x32xf32>
    %99 = arith.mulf %94, %98 : vector<2x32xf32>
    %c8 = arith.constant 8 : index
    %c0_22 = arith.constant 0 : index
    %100 = vector.load %arg12[%c8, %c0_22] : memref<16x32xf32, #tpu.memory_space<vmem>>, vector<2x32xf32>
    tpu.vector_store %arg12[%c8, %c0_22], %99 {strides = array<i32>} : memref<16x32xf32, #tpu.memory_space<vmem>>, vector<2x32xf32>,
    %101 = vector.extract_strided_slice %2 {offsets = [10, 0], sizes = [2, 128], strides = [1, 1]} : vector<16x128xf32> to vector<2x128xf32>
    %cst_23 = arith.constant dense<0.000000e+00> : vector<2x128xf32>
    %102 = tpu.matmul %99, %3, %cst_23 {dimension_numbers = #tpu.dot_dimension_numbers<[1], [0], [0], [1], [0, 0, 1, 1], [], []>} : vector<2x32xf32>, vector<32x128xf32>, vector<2x128xf32> -> vector<2x128xf32>
    %103 = arith.addf %101, %102 : vector<2x128xf32>
    %104 = arith.negf %103 : vector<2x128xf32>
    %105 = math.exp %104 : vector<2x128xf32>
    %cst_24 = arith.constant 1.000000e+00 : f32
    %106 = vector.broadcast %cst_24 : f32 to vector<2x128xf32>
    %107 = arith.addf %106, %105 : vector<2x128xf32>
    %108 = arith.divf %106, %107 : vector<2x128xf32>
    %109 = math.tanh %103 : vector<2x128xf32>
    %110 = vector.extract_strided_slice %108 {offsets = [0, 0], sizes = [2, 32], strides = [1, 1]} : vector<2x128xf32> to vector<2x32xf32>
    %111 = vector.extract_strided_slice %108 {offsets = [0, 32], sizes = [2, 32], strides = [1, 1]} : vector<2x128xf32> to vector<2x32xf32>
    %112 = vector.extract_strided_slice %109 {offsets = [0, 64], sizes = [2, 32], strides = [1, 1]} : vector<2x128xf32> to vector<2x32xf32>
    %113 = vector.extract_strided_slice %108 {offsets = [0, 96], sizes = [2, 32], strides = [1, 1]} : vector<2x128xf32> to vector<2x32xf32>
    %114 = arith.mulf %111, %97 : vector<2x32xf32>
    %115 = arith.mulf %110, %112 : vector<2x32xf32>
    %116 = arith.addf %114, %115 : vector<2x32xf32>
    %117 = math.tanh %116 : vector<2x32xf32>
    %118 = arith.mulf %113, %117 : vector<2x32xf32>
    %c10 = arith.constant 10 : index
    %c0_25 = arith.constant 0 : index
    %119 = vector.load %arg12[%c10, %c0_25] : memref<16x32xf32, #tpu.memory_space<vmem>>, vector<2x32xf32>
    tpu.vector_store %arg12[%c10, %c0_25], %118 {strides = array<i32>} : memref<16x32xf32, #tpu.memory_space<vmem>>, vector<2x32xf32>,
    %120 = vector.extract_strided_slice %2 {offsets = [12, 0], sizes = [2, 128], strides = [1, 1]} : vector<16x128xf32> to vector<2x128xf32>
    %cst_26 = arith.constant dense<0.000000e+00> : vector<2x128xf32>
    %121 = tpu.matmul %118, %3, %cst_26 {dimension_numbers = #tpu.dot_dimension_numbers<[1], [0], [0], [1], [0, 0, 1, 1], [], []>} : vector<2x32xf32>, vector<32x128xf32>, vector<2x128xf32> -> vector<2x128xf32>
    %122 = arith.addf %120, %121 : vector<2x128xf32>
    %123 = arith.negf %122 : vector<2x128xf32>
    %124 = math.exp %123 : vector<2x128xf32>
    %cst_27 = arith.constant 1.000000e+00 : f32
    %125 = vector.broadcast %cst_27 : f32 to vector<2x128xf32>
    %126 = arith.addf %125, %124 : vector<2x128xf32>
    %127 = arith.divf %125, %126 : vector<2x128xf32>
    %128 = math.tanh %122 : vector<2x128xf32>
    %129 = vector.extract_strided_slice %127 {offsets = [0, 0], sizes = [2, 32], strides = [1, 1]} : vector<2x128xf32> to vector<2x32xf32>
    %130 = vector.extract_strided_slice %127 {offsets = [0, 32], sizes = [2, 32], strides = [1, 1]} : vector<2x128xf32> to vector<2x32xf32>
    %131 = vector.extract_strided_slice %128 {offsets = [0, 64], sizes = [2, 32], strides = [1, 1]} : vector<2x128xf32> to vector<2x32xf32>
    %132 = vector.extract_strided_slice %127 {offsets = [0, 96], sizes = [2, 32], strides = [1, 1]} : vector<2x128xf32> to vector<2x32xf32>
    %133 = arith.mulf %130, %116 : vector<2x32xf32>
    %134 = arith.mulf %129, %131 : vector<2x32xf32>
    %135 = arith.addf %133, %134 : vector<2x32xf32>
    %136 = math.tanh %135 : vector<2x32xf32>
    %137 = arith.mulf %132, %136 : vector<2x32xf32>
    %c12 = arith.constant 12 : index
    %c0_28 = arith.constant 0 : index
    %138 = vector.load %arg12[%c12, %c0_28] : memref<16x32xf32, #tpu.memory_space<vmem>>, vector<2x32xf32>
    tpu.vector_store %arg12[%c12, %c0_28], %137 {strides = array<i32>} : memref<16x32xf32, #tpu.memory_space<vmem>>, vector<2x32xf32>,
    %139 = vector.extract_strided_slice %2 {offsets = [14, 0], sizes = [2, 128], strides = [1, 1]} : vector<16x128xf32> to vector<2x128xf32>
    %cst_29 = arith.constant dense<0.000000e+00> : vector<2x128xf32>
    %140 = tpu.matmul %137, %3, %cst_29 {dimension_numbers = #tpu.dot_dimension_numbers<[1], [0], [0], [1], [0, 0, 1, 1], [], []>} : vector<2x32xf32>, vector<32x128xf32>, vector<2x128xf32> -> vector<2x128xf32>
    %141 = arith.addf %139, %140 : vector<2x128xf32>
    %142 = arith.negf %141 : vector<2x128xf32>
    %143 = math.exp %142 : vector<2x128xf32>
    %cst_30 = arith.constant 1.000000e+00 : f32
    %144 = vector.broadcast %cst_30 : f32 to vector<2x128xf32>
    %145 = arith.addf %144, %143 : vector<2x128xf32>
    %146 = arith.divf %144, %145 : vector<2x128xf32>
    %147 = math.tanh %141 : vector<2x128xf32>
    %148 = vector.extract_strided_slice %146 {offsets = [0, 0], sizes = [2, 32], strides = [1, 1]} : vector<2x128xf32> to vector<2x32xf32>
    %149 = vector.extract_strided_slice %146 {offsets = [0, 32], sizes = [2, 32], strides = [1, 1]} : vector<2x128xf32> to vector<2x32xf32>
    %150 = vector.extract_strided_slice %147 {offsets = [0, 64], sizes = [2, 32], strides = [1, 1]} : vector<2x128xf32> to vector<2x32xf32>
    %151 = vector.extract_strided_slice %146 {offsets = [0, 96], sizes = [2, 32], strides = [1, 1]} : vector<2x128xf32> to vector<2x32xf32>
    %152 = arith.mulf %149, %135 : vector<2x32xf32>
    %153 = arith.mulf %148, %150 : vector<2x32xf32>
    %154 = arith.addf %152, %153 : vector<2x32xf32>
    %155 = math.tanh %154 : vector<2x32xf32>
    %156 = arith.mulf %151, %155 : vector<2x32xf32>
    %c14 = arith.constant 14 : index
    %c0_31 = arith.constant 0 : index
    %157 = vector.load %arg12[%c14, %c0_31] : memref<16x32xf32, #tpu.memory_space<vmem>>, vector<2x32xf32>
    tpu.vector_store %arg12[%c14, %c0_31], %156 {strides = array<i32>} : memref<16x32xf32, #tpu.memory_space<vmem>>, vector<2x32xf32>,
    %c0_32 = arith.constant 0 : index
    %c0_33 = arith.constant 0 : index
    %158 = vector.load %arg12[%c0_32, %c0_33] : memref<16x32xf32, #tpu.memory_space<vmem>>, vector<16x32xf32>
    %c0_34 = arith.constant 0 : index
    %c0_35 = arith.constant 0 : index
    %159 = vector.load %arg3[%c0_34, %c0_35] : memref<32x128xf32, #tpu.memory_space<vmem>>, vector<32x128xf32>
    %cst_36 = arith.constant dense<0.000000e+00> : vector<16x128xf32>
    %160 = tpu.matmul %158, %159, %cst_36 {dimension_numbers = #tpu.dot_dimension_numbers<[1], [0], [0], [1], [0, 0, 1, 1], [], []>} : vector<16x32xf32>, vector<32x128xf32>, vector<16x128xf32> -> vector<16x128xf32>
    %c0_37 = arith.constant 0 : index
    %c0_38 = arith.constant 0 : index
    %161 = vector.load %arg4[%c0_37, %c0_38] : memref<32x128xf32, #tpu.memory_space<vmem>>, vector<32x128xf32>
    %cst_39 = arith.constant 0.000000e+00 : f32
    %162 = vector.broadcast %cst_39 : f32 to vector<2x32xf32>
    %cst_40 = arith.constant 0.000000e+00 : f32
    %163 = vector.broadcast %cst_40 : f32 to vector<2x32xf32>
    %164 = vector.extract_strided_slice %160 {offsets = [0, 0], sizes = [2, 128], strides = [1, 1]} : vector<16x128xf32> to vector<2x128xf32>
    %cst_41 = arith.constant dense<0.000000e+00> : vector<2x128xf32>
    %165 = tpu.matmul %162, %161, %cst_41 {dimension_numbers = #tpu.dot_dimension_numbers<[1], [0], [0], [1], [0, 0, 1, 1], [], []>} : vector<2x32xf32>, vector<32x128xf32>, vector<2x128xf32> -> vector<2x128xf32>
    %166 = arith.addf %164, %165 : vector<2x128xf32>
    %167 = arith.negf %166 : vector<2x128xf32>
    %168 = math.exp %167 : vector<2x128xf32>
    %cst_42 = arith.constant 1.000000e+00 : f32
    %169 = vector.broadcast %cst_42 : f32 to vector<2x128xf32>
    %170 = arith.addf %169, %168 : vector<2x128xf32>
    %171 = arith.divf %169, %170 : vector<2x128xf32>
    %172 = math.tanh %166 : vector<2x128xf32>
    %173 = vector.extract_strided_slice %171 {offsets = [0, 0], sizes = [2, 32], strides = [1, 1]} : vector<2x128xf32> to vector<2x32xf32>
    %174 = vector.extract_strided_slice %171 {offsets = [0, 32], sizes = [2, 32], strides = [1, 1]} : vector<2x128xf32> to vector<2x32xf32>
    %175 = vector.extract_strided_slice %172 {offsets = [0, 64], sizes = [2, 32], strides = [1, 1]} : vector<2x128xf32> to vector<2x32xf32>
    %176 = vector.extract_strided_slice %171 {offsets = [0, 96], sizes = [2, 32], strides = [1, 1]} : vector<2x128xf32> to vector<2x32xf32>
    %177 = arith.mulf %174, %163 : vector<2x32xf32>
    %178 = arith.mulf %173, %175 : vector<2x32xf32>
    %179 = arith.addf %177, %178 : vector<2x32xf32>
    %180 = math.tanh %179 : vector<2x32xf32>
    %181 = arith.mulf %176, %180 : vector<2x32xf32>
    %c0_43 = arith.constant 0 : index
    %c0_44 = arith.constant 0 : index
    %182 = vector.load %arg12[%c0_43, %c0_44] : memref<16x32xf32, #tpu.memory_space<vmem>>, vector<2x32xf32>
    tpu.vector_store %arg12[%c0_43, %c0_44], %181 {strides = array<i32>} : memref<16x32xf32, #tpu.memory_space<vmem>>, vector<2x32xf32>,
    %183 = vector.extract_strided_slice %160 {offsets = [2, 0], sizes = [2, 128], strides = [1, 1]} : vector<16x128xf32> to vector<2x128xf32>
    %cst_45 = arith.constant dense<0.000000e+00> : vector<2x128xf32>
    %184 = tpu.matmul %181, %161, %cst_45 {dimension_numbers = #tpu.dot_dimension_numbers<[1], [0], [0], [1], [0, 0, 1, 1], [], []>} : vector<2x32xf32>, vector<32x128xf32>, vector<2x128xf32> -> vector<2x128xf32>
    %185 = arith.addf %183, %184 : vector<2x128xf32>
    %186 = arith.negf %185 : vector<2x128xf32>
    %187 = math.exp %186 : vector<2x128xf32>
    %cst_46 = arith.constant 1.000000e+00 : f32
    %188 = vector.broadcast %cst_46 : f32 to vector<2x128xf32>
    %189 = arith.addf %188, %187 : vector<2x128xf32>
    %190 = arith.divf %188, %189 : vector<2x128xf32>
    %191 = math.tanh %185 : vector<2x128xf32>
    %192 = vector.extract_strided_slice %190 {offsets = [0, 0], sizes = [2, 32], strides = [1, 1]} : vector<2x128xf32> to vector<2x32xf32>
    %193 = vector.extract_strided_slice %190 {offsets = [0, 32], sizes = [2, 32], strides = [1, 1]} : vector<2x128xf32> to vector<2x32xf32>
    %194 = vector.extract_strided_slice %191 {offsets = [0, 64], sizes = [2, 32], strides = [1, 1]} : vector<2x128xf32> to vector<2x32xf32>
    %195 = vector.extract_strided_slice %190 {offsets = [0, 96], sizes = [2, 32], strides = [1, 1]} : vector<2x128xf32> to vector<2x32xf32>
    %196 = arith.mulf %193, %179 : vector<2x32xf32>
    %197 = arith.mulf %192, %194 : vector<2x32xf32>
    %198 = arith.addf %196, %197 : vector<2x32xf32>
    %199 = math.tanh %198 : vector<2x32xf32>
    %200 = arith.mulf %195, %199 : vector<2x32xf32>
    %c2_47 = arith.constant 2 : index
    %c0_48 = arith.constant 0 : index
    %201 = vector.load %arg12[%c2_47, %c0_48] : memref<16x32xf32, #tpu.memory_space<vmem>>, vector<2x32xf32>
    tpu.vector_store %arg12[%c2_47, %c0_48], %200 {strides = array<i32>} : memref<16x32xf32, #tpu.memory_space<vmem>>, vector<2x32xf32>,
    %202 = vector.extract_strided_slice %160 {offsets = [4, 0], sizes = [2, 128], strides = [1, 1]} : vector<16x128xf32> to vector<2x128xf32>
    %cst_49 = arith.constant dense<0.000000e+00> : vector<2x128xf32>
    %203 = tpu.matmul %200, %161, %cst_49 {dimension_numbers = #tpu.dot_dimension_numbers<[1], [0], [0], [1], [0, 0, 1, 1], [], []>} : vector<2x32xf32>, vector<32x128xf32>, vector<2x128xf32> -> vector<2x128xf32>
    %204 = arith.addf %202, %203 : vector<2x128xf32>
    %205 = arith.negf %204 : vector<2x128xf32>
    %206 = math.exp %205 : vector<2x128xf32>
    %cst_50 = arith.constant 1.000000e+00 : f32
    %207 = vector.broadcast %cst_50 : f32 to vector<2x128xf32>
    %208 = arith.addf %207, %206 : vector<2x128xf32>
    %209 = arith.divf %207, %208 : vector<2x128xf32>
    %210 = math.tanh %204 : vector<2x128xf32>
    %211 = vector.extract_strided_slice %209 {offsets = [0, 0], sizes = [2, 32], strides = [1, 1]} : vector<2x128xf32> to vector<2x32xf32>
    %212 = vector.extract_strided_slice %209 {offsets = [0, 32], sizes = [2, 32], strides = [1, 1]} : vector<2x128xf32> to vector<2x32xf32>
    %213 = vector.extract_strided_slice %210 {offsets = [0, 64], sizes = [2, 32], strides = [1, 1]} : vector<2x128xf32> to vector<2x32xf32>
    %214 = vector.extract_strided_slice %209 {offsets = [0, 96], sizes = [2, 32], strides = [1, 1]} : vector<2x128xf32> to vector<2x32xf32>
    %215 = arith.mulf %212, %198 : vector<2x32xf32>
    %216 = arith.mulf %211, %213 : vector<2x32xf32>
    %217 = arith.addf %215, %216 : vector<2x32xf32>
    %218 = math.tanh %217 : vector<2x32xf32>
    %219 = arith.mulf %214, %218 : vector<2x32xf32>
    %c4_51 = arith.constant 4 : index
    %c0_52 = arith.constant 0 : index
    %220 = vector.load %arg12[%c4_51, %c0_52] : memref<16x32xf32, #tpu.memory_space<vmem>>, vector<2x32xf32>
    tpu.vector_store %arg12[%c4_51, %c0_52], %219 {strides = array<i32>} : memref<16x32xf32, #tpu.memory_space<vmem>>, vector<2x32xf32>,
    %221 = vector.extract_strided_slice %160 {offsets = [6, 0], sizes = [2, 128], strides = [1, 1]} : vector<16x128xf32> to vector<2x128xf32>
    %cst_53 = arith.constant dense<0.000000e+00> : vector<2x128xf32>
    %222 = tpu.matmul %219, %161, %cst_53 {dimension_numbers = #tpu.dot_dimension_numbers<[1], [0], [0], [1], [0, 0, 1, 1], [], []>} : vector<2x32xf32>, vector<32x128xf32>, vector<2x128xf32> -> vector<2x128xf32>
    %223 = arith.addf %221, %222 : vector<2x128xf32>
    %224 = arith.negf %223 : vector<2x128xf32>
    %225 = math.exp %224 : vector<2x128xf32>
    %cst_54 = arith.constant 1.000000e+00 : f32
    %226 = vector.broadcast %cst_54 : f32 to vector<2x128xf32>
    %227 = arith.addf %226, %225 : vector<2x128xf32>
    %228 = arith.divf %226, %227 : vector<2x128xf32>
    %229 = math.tanh %223 : vector<2x128xf32>
    %230 = vector.extract_strided_slice %228 {offsets = [0, 0], sizes = [2, 32], strides = [1, 1]} : vector<2x128xf32> to vector<2x32xf32>
    %231 = vector.extract_strided_slice %228 {offsets = [0, 32], sizes = [2, 32], strides = [1, 1]} : vector<2x128xf32> to vector<2x32xf32>
    %232 = vector.extract_strided_slice %229 {offsets = [0, 64], sizes = [2, 32], strides = [1, 1]} : vector<2x128xf32> to vector<2x32xf32>
    %233 = vector.extract_strided_slice %228 {offsets = [0, 96], sizes = [2, 32], strides = [1, 1]} : vector<2x128xf32> to vector<2x32xf32>
    %234 = arith.mulf %231, %217 : vector<2x32xf32>
    %235 = arith.mulf %230, %232 : vector<2x32xf32>
    %236 = arith.addf %234, %235 : vector<2x32xf32>
    %237 = math.tanh %236 : vector<2x32xf32>
    %238 = arith.mulf %233, %237 : vector<2x32xf32>
    %c6_55 = arith.constant 6 : index
    %c0_56 = arith.constant 0 : index
    %239 = vector.load %arg12[%c6_55, %c0_56] : memref<16x32xf32, #tpu.memory_space<vmem>>, vector<2x32xf32>
    tpu.vector_store %arg12[%c6_55, %c0_56], %238 {strides = array<i32>} : memref<16x32xf32, #tpu.memory_space<vmem>>, vector<2x32xf32>,
    %240 = vector.extract_strided_slice %160 {offsets = [8, 0], sizes = [2, 128], strides = [1, 1]} : vector<16x128xf32> to vector<2x128xf32>
    %cst_57 = arith.constant dense<0.000000e+00> : vector<2x128xf32>
    %241 = tpu.matmul %238, %161, %cst_57 {dimension_numbers = #tpu.dot_dimension_numbers<[1], [0], [0], [1], [0, 0, 1, 1], [], []>} : vector<2x32xf32>, vector<32x128xf32>, vector<2x128xf32> -> vector<2x128xf32>
    %242 = arith.addf %240, %241 : vector<2x128xf32>
    %243 = arith.negf %242 : vector<2x128xf32>
    %244 = math.exp %243 : vector<2x128xf32>
    %cst_58 = arith.constant 1.000000e+00 : f32
    %245 = vector.broadcast %cst_58 : f32 to vector<2x128xf32>
    %246 = arith.addf %245, %244 : vector<2x128xf32>
    %247 = arith.divf %245, %246 : vector<2x128xf32>
    %248 = math.tanh %242 : vector<2x128xf32>
    %249 = vector.extract_strided_slice %247 {offsets = [0, 0], sizes = [2, 32], strides = [1, 1]} : vector<2x128xf32> to vector<2x32xf32>
    %250 = vector.extract_strided_slice %247 {offsets = [0, 32], sizes = [2, 32], strides = [1, 1]} : vector<2x128xf32> to vector<2x32xf32>
    %251 = vector.extract_strided_slice %248 {offsets = [0, 64], sizes = [2, 32], strides = [1, 1]} : vector<2x128xf32> to vector<2x32xf32>
    %252 = vector.extract_strided_slice %247 {offsets = [0, 96], sizes = [2, 32], strides = [1, 1]} : vector<2x128xf32> to vector<2x32xf32>
    %253 = arith.mulf %250, %236 : vector<2x32xf32>
    %254 = arith.mulf %249, %251 : vector<2x32xf32>
    %255 = arith.addf %253, %254 : vector<2x32xf32>
    %256 = math.tanh %255 : vector<2x32xf32>
    %257 = arith.mulf %252, %256 : vector<2x32xf32>
    %c8_59 = arith.constant 8 : index
    %c0_60 = arith.constant 0 : index
    %258 = vector.load %arg12[%c8_59, %c0_60] : memref<16x32xf32, #tpu.memory_space<vmem>>, vector<2x32xf32>
    tpu.vector_store %arg12[%c8_59, %c0_60], %257 {strides = array<i32>} : memref<16x32xf32, #tpu.memory_space<vmem>>, vector<2x32xf32>,
    %259 = vector.extract_strided_slice %160 {offsets = [10, 0], sizes = [2, 128], strides = [1, 1]} : vector<16x128xf32> to vector<2x128xf32>
    %cst_61 = arith.constant dense<0.000000e+00> : vector<2x128xf32>
    %260 = tpu.matmul %257, %161, %cst_61 {dimension_numbers = #tpu.dot_dimension_numbers<[1], [0], [0], [1], [0, 0, 1, 1], [], []>} : vector<2x32xf32>, vector<32x128xf32>, vector<2x128xf32> -> vector<2x128xf32>
    %261 = arith.addf %259, %260 : vector<2x128xf32>
    %262 = arith.negf %261 : vector<2x128xf32>
    %263 = math.exp %262 : vector<2x128xf32>
    %cst_62 = arith.constant 1.000000e+00 : f32
    %264 = vector.broadcast %cst_62 : f32 to vector<2x128xf32>
    %265 = arith.addf %264, %263 : vector<2x128xf32>
    %266 = arith.divf %264, %265 : vector<2x128xf32>
    %267 = math.tanh %261 : vector<2x128xf32>
    %268 = vector.extract_strided_slice %266 {offsets = [0, 0], sizes = [2, 32], strides = [1, 1]} : vector<2x128xf32> to vector<2x32xf32>
    %269 = vector.extract_strided_slice %266 {offsets = [0, 32], sizes = [2, 32], strides = [1, 1]} : vector<2x128xf32> to vector<2x32xf32>
    %270 = vector.extract_strided_slice %267 {offsets = [0, 64], sizes = [2, 32], strides = [1, 1]} : vector<2x128xf32> to vector<2x32xf32>
    %271 = vector.extract_strided_slice %266 {offsets = [0, 96], sizes = [2, 32], strides = [1, 1]} : vector<2x128xf32> to vector<2x32xf32>
    %272 = arith.mulf %269, %255 : vector<2x32xf32>
    %273 = arith.mulf %268, %270 : vector<2x32xf32>
    %274 = arith.addf %272, %273 : vector<2x32xf32>
    %275 = math.tanh %274 : vector<2x32xf32>
    %276 = arith.mulf %271, %275 : vector<2x32xf32>
    %c10_63 = arith.constant 10 : index
    %c0_64 = arith.constant 0 : index
    %277 = vector.load %arg12[%c10_63, %c0_64] : memref<16x32xf32, #tpu.memory_space<vmem>>, vector<2x32xf32>
    tpu.vector_store %arg12[%c10_63, %c0_64], %276 {strides = array<i32>} : memref<16x32xf32, #tpu.memory_space<vmem>>, vector<2x32xf32>,
    %278 = vector.extract_strided_slice %160 {offsets = [12, 0], sizes = [2, 128], strides = [1, 1]} : vector<16x128xf32> to vector<2x128xf32>
    %cst_65 = arith.constant dense<0.000000e+00> : vector<2x128xf32>
    %279 = tpu.matmul %276, %161, %cst_65 {dimension_numbers = #tpu.dot_dimension_numbers<[1], [0], [0], [1], [0, 0, 1, 1], [], []>} : vector<2x32xf32>, vector<32x128xf32>, vector<2x128xf32> -> vector<2x128xf32>
    %280 = arith.addf %278, %279 : vector<2x128xf32>
    %281 = arith.negf %280 : vector<2x128xf32>
    %282 = math.exp %281 : vector<2x128xf32>
    %cst_66 = arith.constant 1.000000e+00 : f32
    %283 = vector.broadcast %cst_66 : f32 to vector<2x128xf32>
    %284 = arith.addf %283, %282 : vector<2x128xf32>
    %285 = arith.divf %283, %284 : vector<2x128xf32>
    %286 = math.tanh %280 : vector<2x128xf32>
    %287 = vector.extract_strided_slice %285 {offsets = [0, 0], sizes = [2, 32], strides = [1, 1]} : vector<2x128xf32> to vector<2x32xf32>
    %288 = vector.extract_strided_slice %285 {offsets = [0, 32], sizes = [2, 32], strides = [1, 1]} : vector<2x128xf32> to vector<2x32xf32>
    %289 = vector.extract_strided_slice %286 {offsets = [0, 64], sizes = [2, 32], strides = [1, 1]} : vector<2x128xf32> to vector<2x32xf32>
    %290 = vector.extract_strided_slice %285 {offsets = [0, 96], sizes = [2, 32], strides = [1, 1]} : vector<2x128xf32> to vector<2x32xf32>
    %291 = arith.mulf %288, %274 : vector<2x32xf32>
    %292 = arith.mulf %287, %289 : vector<2x32xf32>
    %293 = arith.addf %291, %292 : vector<2x32xf32>
    %294 = math.tanh %293 : vector<2x32xf32>
    %295 = arith.mulf %290, %294 : vector<2x32xf32>
    %c12_67 = arith.constant 12 : index
    %c0_68 = arith.constant 0 : index
    %296 = vector.load %arg12[%c12_67, %c0_68] : memref<16x32xf32, #tpu.memory_space<vmem>>, vector<2x32xf32>
    tpu.vector_store %arg12[%c12_67, %c0_68], %295 {strides = array<i32>} : memref<16x32xf32, #tpu.memory_space<vmem>>, vector<2x32xf32>,
    %297 = vector.extract_strided_slice %160 {offsets = [14, 0], sizes = [2, 128], strides = [1, 1]} : vector<16x128xf32> to vector<2x128xf32>
    %cst_69 = arith.constant dense<0.000000e+00> : vector<2x128xf32>
    %298 = tpu.matmul %295, %161, %cst_69 {dimension_numbers = #tpu.dot_dimension_numbers<[1], [0], [0], [1], [0, 0, 1, 1], [], []>} : vector<2x32xf32>, vector<32x128xf32>, vector<2x128xf32> -> vector<2x128xf32>
    %299 = arith.addf %297, %298 : vector<2x128xf32>
    %300 = arith.negf %299 : vector<2x128xf32>
    %301 = math.exp %300 : vector<2x128xf32>
    %cst_70 = arith.constant 1.000000e+00 : f32
    %302 = vector.broadcast %cst_70 : f32 to vector<2x128xf32>
    %303 = arith.addf %302, %301 : vector<2x128xf32>
    %304 = arith.divf %302, %303 : vector<2x128xf32>
    %305 = math.tanh %299 : vector<2x128xf32>
    %306 = vector.extract_strided_slice %304 {offsets = [0, 0], sizes = [2, 32], strides = [1, 1]} : vector<2x128xf32> to vector<2x32xf32>
    %307 = vector.extract_strided_slice %304 {offsets = [0, 32], sizes = [2, 32], strides = [1, 1]} : vector<2x128xf32> to vector<2x32xf32>
    %308 = vector.extract_strided_slice %305 {offsets = [0, 64], sizes = [2, 32], strides = [1, 1]} : vector<2x128xf32> to vector<2x32xf32>
    %309 = vector.extract_strided_slice %304 {offsets = [0, 96], sizes = [2, 32], strides = [1, 1]} : vector<2x128xf32> to vector<2x32xf32>
    %310 = arith.mulf %307, %293 : vector<2x32xf32>
    %311 = arith.mulf %306, %308 : vector<2x32xf32>
    %312 = arith.addf %310, %311 : vector<2x32xf32>
    %313 = math.tanh %312 : vector<2x32xf32>
    %314 = arith.mulf %309, %313 : vector<2x32xf32>
    %c14_71 = arith.constant 14 : index
    %c0_72 = arith.constant 0 : index
    %315 = vector.load %arg12[%c14_71, %c0_72] : memref<16x32xf32, #tpu.memory_space<vmem>>, vector<2x32xf32>
    tpu.vector_store %arg12[%c14_71, %c0_72], %314 {strides = array<i32>} : memref<16x32xf32, #tpu.memory_space<vmem>>, vector<2x32xf32>,
    %c0_73 = arith.constant 0 : index
    %c0_74 = arith.constant 0 : index
    %316 = vector.load %arg12[%c0_73, %c0_74] : memref<16x32xf32, #tpu.memory_space<vmem>>, vector<16x32xf32>
    %c0_75 = arith.constant 0 : index
    %c0_76 = arith.constant 0 : index
    %317 = vector.load %arg5[%c0_75, %c0_76] : memref<32x128xf32, #tpu.memory_space<vmem>>, vector<32x128xf32>
    %cst_77 = arith.constant dense<0.000000e+00> : vector<16x128xf32>
    %318 = tpu.matmul %316, %317, %cst_77 {dimension_numbers = #tpu.dot_dimension_numbers<[1], [0], [0], [1], [0, 0, 1, 1], [], []>} : vector<16x32xf32>, vector<32x128xf32>, vector<16x128xf32> -> vector<16x128xf32>
    %c0_78 = arith.constant 0 : index
    %c0_79 = arith.constant 0 : index
    %319 = vector.load %arg6[%c0_78, %c0_79] : memref<32x128xf32, #tpu.memory_space<vmem>>, vector<32x128xf32>
    %cst_80 = arith.constant 0.000000e+00 : f32
    %320 = vector.broadcast %cst_80 : f32 to vector<2x32xf32>
    %cst_81 = arith.constant 0.000000e+00 : f32
    %321 = vector.broadcast %cst_81 : f32 to vector<2x32xf32>
    %322 = vector.extract_strided_slice %318 {offsets = [0, 0], sizes = [2, 128], strides = [1, 1]} : vector<16x128xf32> to vector<2x128xf32>
    %cst_82 = arith.constant dense<0.000000e+00> : vector<2x128xf32>
    %323 = tpu.matmul %320, %319, %cst_82 {dimension_numbers = #tpu.dot_dimension_numbers<[1], [0], [0], [1], [0, 0, 1, 1], [], []>} : vector<2x32xf32>, vector<32x128xf32>, vector<2x128xf32> -> vector<2x128xf32>
    %324 = arith.addf %322, %323 : vector<2x128xf32>
    %325 = arith.negf %324 : vector<2x128xf32>
    %326 = math.exp %325 : vector<2x128xf32>
    %cst_83 = arith.constant 1.000000e+00 : f32
    %327 = vector.broadcast %cst_83 : f32 to vector<2x128xf32>
    %328 = arith.addf %327, %326 : vector<2x128xf32>
    %329 = arith.divf %327, %328 : vector<2x128xf32>
    %330 = math.tanh %324 : vector<2x128xf32>
    %331 = vector.extract_strided_slice %329 {offsets = [0, 0], sizes = [2, 32], strides = [1, 1]} : vector<2x128xf32> to vector<2x32xf32>
    %332 = vector.extract_strided_slice %329 {offsets = [0, 32], sizes = [2, 32], strides = [1, 1]} : vector<2x128xf32> to vector<2x32xf32>
    %333 = vector.extract_strided_slice %330 {offsets = [0, 64], sizes = [2, 32], strides = [1, 1]} : vector<2x128xf32> to vector<2x32xf32>
    %334 = vector.extract_strided_slice %329 {offsets = [0, 96], sizes = [2, 32], strides = [1, 1]} : vector<2x128xf32> to vector<2x32xf32>
    %335 = arith.mulf %332, %321 : vector<2x32xf32>
    %336 = arith.mulf %331, %333 : vector<2x32xf32>
    %337 = arith.addf %335, %336 : vector<2x32xf32>
    %338 = math.tanh %337 : vector<2x32xf32>
    %339 = arith.mulf %334, %338 : vector<2x32xf32>
    %c0_84 = arith.constant 0 : index
    %c0_85 = arith.constant 0 : index
    %340 = vector.load %arg12[%c0_84, %c0_85] : memref<16x32xf32, #tpu.memory_space<vmem>>, vector<2x32xf32>
    tpu.vector_store %arg12[%c0_84, %c0_85], %339 {strides = array<i32>} : memref<16x32xf32, #tpu.memory_space<vmem>>, vector<2x32xf32>,
    %341 = vector.extract_strided_slice %318 {offsets = [2, 0], sizes = [2, 128], strides = [1, 1]} : vector<16x128xf32> to vector<2x128xf32>
    %cst_86 = arith.constant dense<0.000000e+00> : vector<2x128xf32>
    %342 = tpu.matmul %339, %319, %cst_86 {dimension_numbers = #tpu.dot_dimension_numbers<[1], [0], [0], [1], [0, 0, 1, 1], [], []>} : vector<2x32xf32>, vector<32x128xf32>, vector<2x128xf32> -> vector<2x128xf32>
    %343 = arith.addf %341, %342 : vector<2x128xf32>
    %344 = arith.negf %343 : vector<2x128xf32>
    %345 = math.exp %344 : vector<2x128xf32>
    %cst_87 = arith.constant 1.000000e+00 : f32
    %346 = vector.broadcast %cst_87 : f32 to vector<2x128xf32>
    %347 = arith.addf %346, %345 : vector<2x128xf32>
    %348 = arith.divf %346, %347 : vector<2x128xf32>
    %349 = math.tanh %343 : vector<2x128xf32>
    %350 = vector.extract_strided_slice %348 {offsets = [0, 0], sizes = [2, 32], strides = [1, 1]} : vector<2x128xf32> to vector<2x32xf32>
    %351 = vector.extract_strided_slice %348 {offsets = [0, 32], sizes = [2, 32], strides = [1, 1]} : vector<2x128xf32> to vector<2x32xf32>
    %352 = vector.extract_strided_slice %349 {offsets = [0, 64], sizes = [2, 32], strides = [1, 1]} : vector<2x128xf32> to vector<2x32xf32>
    %353 = vector.extract_strided_slice %348 {offsets = [0, 96], sizes = [2, 32], strides = [1, 1]} : vector<2x128xf32> to vector<2x32xf32>
    %354 = arith.mulf %351, %337 : vector<2x32xf32>
    %355 = arith.mulf %350, %352 : vector<2x32xf32>
    %356 = arith.addf %354, %355 : vector<2x32xf32>
    %357 = math.tanh %356 : vector<2x32xf32>
    %358 = arith.mulf %353, %357 : vector<2x32xf32>
    %c2_88 = arith.constant 2 : index
    %c0_89 = arith.constant 0 : index
    %359 = vector.load %arg12[%c2_88, %c0_89] : memref<16x32xf32, #tpu.memory_space<vmem>>, vector<2x32xf32>
    tpu.vector_store %arg12[%c2_88, %c0_89], %358 {strides = array<i32>} : memref<16x32xf32, #tpu.memory_space<vmem>>, vector<2x32xf32>,
    %360 = vector.extract_strided_slice %318 {offsets = [4, 0], sizes = [2, 128], strides = [1, 1]} : vector<16x128xf32> to vector<2x128xf32>
    %cst_90 = arith.constant dense<0.000000e+00> : vector<2x128xf32>
    %361 = tpu.matmul %358, %319, %cst_90 {dimension_numbers = #tpu.dot_dimension_numbers<[1], [0], [0], [1], [0, 0, 1, 1], [], []>} : vector<2x32xf32>, vector<32x128xf32>, vector<2x128xf32> -> vector<2x128xf32>
    %362 = arith.addf %360, %361 : vector<2x128xf32>
    %363 = arith.negf %362 : vector<2x128xf32>
    %364 = math.exp %363 : vector<2x128xf32>
    %cst_91 = arith.constant 1.000000e+00 : f32
    %365 = vector.broadcast %cst_91 : f32 to vector<2x128xf32>
    %366 = arith.addf %365, %364 : vector<2x128xf32>
    %367 = arith.divf %365, %366 : vector<2x128xf32>
    %368 = math.tanh %362 : vector<2x128xf32>
    %369 = vector.extract_strided_slice %367 {offsets = [0, 0], sizes = [2, 32], strides = [1, 1]} : vector<2x128xf32> to vector<2x32xf32>
    %370 = vector.extract_strided_slice %367 {offsets = [0, 32], sizes = [2, 32], strides = [1, 1]} : vector<2x128xf32> to vector<2x32xf32>
    %371 = vector.extract_strided_slice %368 {offsets = [0, 64], sizes = [2, 32], strides = [1, 1]} : vector<2x128xf32> to vector<2x32xf32>
    %372 = vector.extract_strided_slice %367 {offsets = [0, 96], sizes = [2, 32], strides = [1, 1]} : vector<2x128xf32> to vector<2x32xf32>
    %373 = arith.mulf %370, %356 : vector<2x32xf32>
    %374 = arith.mulf %369, %371 : vector<2x32xf32>
    %375 = arith.addf %373, %374 : vector<2x32xf32>
    %376 = math.tanh %375 : vector<2x32xf32>
    %377 = arith.mulf %372, %376 : vector<2x32xf32>
    %c4_92 = arith.constant 4 : index
    %c0_93 = arith.constant 0 : index
    %378 = vector.load %arg12[%c4_92, %c0_93] : memref<16x32xf32, #tpu.memory_space<vmem>>, vector<2x32xf32>
    tpu.vector_store %arg12[%c4_92, %c0_93], %377 {strides = array<i32>} : memref<16x32xf32, #tpu.memory_space<vmem>>, vector<2x32xf32>,
    %379 = vector.extract_strided_slice %318 {offsets = [6, 0], sizes = [2, 128], strides = [1, 1]} : vector<16x128xf32> to vector<2x128xf32>
    %cst_94 = arith.constant dense<0.000000e+00> : vector<2x128xf32>
    %380 = tpu.matmul %377, %319, %cst_94 {dimension_numbers = #tpu.dot_dimension_numbers<[1], [0], [0], [1], [0, 0, 1, 1], [], []>} : vector<2x32xf32>, vector<32x128xf32>, vector<2x128xf32> -> vector<2x128xf32>
    %381 = arith.addf %379, %380 : vector<2x128xf32>
    %382 = arith.negf %381 : vector<2x128xf32>
    %383 = math.exp %382 : vector<2x128xf32>
    %cst_95 = arith.constant 1.000000e+00 : f32
    %384 = vector.broadcast %cst_95 : f32 to vector<2x128xf32>
    %385 = arith.addf %384, %383 : vector<2x128xf32>
    %386 = arith.divf %384, %385 : vector<2x128xf32>
    %387 = math.tanh %381 : vector<2x128xf32>
    %388 = vector.extract_strided_slice %386 {offsets = [0, 0], sizes = [2, 32], strides = [1, 1]} : vector<2x128xf32> to vector<2x32xf32>
    %389 = vector.extract_strided_slice %386 {offsets = [0, 32], sizes = [2, 32], strides = [1, 1]} : vector<2x128xf32> to vector<2x32xf32>
    %390 = vector.extract_strided_slice %387 {offsets = [0, 64], sizes = [2, 32], strides = [1, 1]} : vector<2x128xf32> to vector<2x32xf32>
    %391 = vector.extract_strided_slice %386 {offsets = [0, 96], sizes = [2, 32], strides = [1, 1]} : vector<2x128xf32> to vector<2x32xf32>
    %392 = arith.mulf %389, %375 : vector<2x32xf32>
    %393 = arith.mulf %388, %390 : vector<2x32xf32>
    %394 = arith.addf %392, %393 : vector<2x32xf32>
    %395 = math.tanh %394 : vector<2x32xf32>
    %396 = arith.mulf %391, %395 : vector<2x32xf32>
    %c6_96 = arith.constant 6 : index
    %c0_97 = arith.constant 0 : index
    %397 = vector.load %arg12[%c6_96, %c0_97] : memref<16x32xf32, #tpu.memory_space<vmem>>, vector<2x32xf32>
    tpu.vector_store %arg12[%c6_96, %c0_97], %396 {strides = array<i32>} : memref<16x32xf32, #tpu.memory_space<vmem>>, vector<2x32xf32>,
    %398 = vector.extract_strided_slice %318 {offsets = [8, 0], sizes = [2, 128], strides = [1, 1]} : vector<16x128xf32> to vector<2x128xf32>
    %cst_98 = arith.constant dense<0.000000e+00> : vector<2x128xf32>
    %399 = tpu.matmul %396, %319, %cst_98 {dimension_numbers = #tpu.dot_dimension_numbers<[1], [0], [0], [1], [0, 0, 1, 1], [], []>} : vector<2x32xf32>, vector<32x128xf32>, vector<2x128xf32> -> vector<2x128xf32>
    %400 = arith.addf %398, %399 : vector<2x128xf32>
    %401 = arith.negf %400 : vector<2x128xf32>
    %402 = math.exp %401 : vector<2x128xf32>
    %cst_99 = arith.constant 1.000000e+00 : f32
    %403 = vector.broadcast %cst_99 : f32 to vector<2x128xf32>
    %404 = arith.addf %403, %402 : vector<2x128xf32>
    %405 = arith.divf %403, %404 : vector<2x128xf32>
    %406 = math.tanh %400 : vector<2x128xf32>
    %407 = vector.extract_strided_slice %405 {offsets = [0, 0], sizes = [2, 32], strides = [1, 1]} : vector<2x128xf32> to vector<2x32xf32>
    %408 = vector.extract_strided_slice %405 {offsets = [0, 32], sizes = [2, 32], strides = [1, 1]} : vector<2x128xf32> to vector<2x32xf32>
    %409 = vector.extract_strided_slice %406 {offsets = [0, 64], sizes = [2, 32], strides = [1, 1]} : vector<2x128xf32> to vector<2x32xf32>
    %410 = vector.extract_strided_slice %405 {offsets = [0, 96], sizes = [2, 32], strides = [1, 1]} : vector<2x128xf32> to vector<2x32xf32>
    %411 = arith.mulf %408, %394 : vector<2x32xf32>
    %412 = arith.mulf %407, %409 : vector<2x32xf32>
    %413 = arith.addf %411, %412 : vector<2x32xf32>
    %414 = math.tanh %413 : vector<2x32xf32>
    %415 = arith.mulf %410, %414 : vector<2x32xf32>
    %c8_100 = arith.constant 8 : index
    %c0_101 = arith.constant 0 : index
    %416 = vector.load %arg12[%c8_100, %c0_101] : memref<16x32xf32, #tpu.memory_space<vmem>>, vector<2x32xf32>
    tpu.vector_store %arg12[%c8_100, %c0_101], %415 {strides = array<i32>} : memref<16x32xf32, #tpu.memory_space<vmem>>, vector<2x32xf32>,
    %417 = vector.extract_strided_slice %318 {offsets = [10, 0], sizes = [2, 128], strides = [1, 1]} : vector<16x128xf32> to vector<2x128xf32>
    %cst_102 = arith.constant dense<0.000000e+00> : vector<2x128xf32>
    %418 = tpu.matmul %415, %319, %cst_102 {dimension_numbers = #tpu.dot_dimension_numbers<[1], [0], [0], [1], [0, 0, 1, 1], [], []>} : vector<2x32xf32>, vector<32x128xf32>, vector<2x128xf32> -> vector<2x128xf32>
    %419 = arith.addf %417, %418 : vector<2x128xf32>
    %420 = arith.negf %419 : vector<2x128xf32>
    %421 = math.exp %420 : vector<2x128xf32>
    %cst_103 = arith.constant 1.000000e+00 : f32
    %422 = vector.broadcast %cst_103 : f32 to vector<2x128xf32>
    %423 = arith.addf %422, %421 : vector<2x128xf32>
    %424 = arith.divf %422, %423 : vector<2x128xf32>
    %425 = math.tanh %419 : vector<2x128xf32>
    %426 = vector.extract_strided_slice %424 {offsets = [0, 0], sizes = [2, 32], strides = [1, 1]} : vector<2x128xf32> to vector<2x32xf32>
    %427 = vector.extract_strided_slice %424 {offsets = [0, 32], sizes = [2, 32], strides = [1, 1]} : vector<2x128xf32> to vector<2x32xf32>
    %428 = vector.extract_strided_slice %425 {offsets = [0, 64], sizes = [2, 32], strides = [1, 1]} : vector<2x128xf32> to vector<2x32xf32>
    %429 = vector.extract_strided_slice %424 {offsets = [0, 96], sizes = [2, 32], strides = [1, 1]} : vector<2x128xf32> to vector<2x32xf32>
    %430 = arith.mulf %427, %413 : vector<2x32xf32>
    %431 = arith.mulf %426, %428 : vector<2x32xf32>
    %432 = arith.addf %430, %431 : vector<2x32xf32>
    %433 = math.tanh %432 : vector<2x32xf32>
    %434 = arith.mulf %429, %433 : vector<2x32xf32>
    %c10_104 = arith.constant 10 : index
    %c0_105 = arith.constant 0 : index
    %435 = vector.load %arg12[%c10_104, %c0_105] : memref<16x32xf32, #tpu.memory_space<vmem>>, vector<2x32xf32>
    tpu.vector_store %arg12[%c10_104, %c0_105], %434 {strides = array<i32>} : memref<16x32xf32, #tpu.memory_space<vmem>>, vector<2x32xf32>,
    %436 = vector.extract_strided_slice %318 {offsets = [12, 0], sizes = [2, 128], strides = [1, 1]} : vector<16x128xf32> to vector<2x128xf32>
    %cst_106 = arith.constant dense<0.000000e+00> : vector<2x128xf32>
    %437 = tpu.matmul %434, %319, %cst_106 {dimension_numbers = #tpu.dot_dimension_numbers<[1], [0], [0], [1], [0, 0, 1, 1], [], []>} : vector<2x32xf32>, vector<32x128xf32>, vector<2x128xf32> -> vector<2x128xf32>
    %438 = arith.addf %436, %437 : vector<2x128xf32>
    %439 = arith.negf %438 : vector<2x128xf32>
    %440 = math.exp %439 : vector<2x128xf32>
    %cst_107 = arith.constant 1.000000e+00 : f32
    %441 = vector.broadcast %cst_107 : f32 to vector<2x128xf32>
    %442 = arith.addf %441, %440 : vector<2x128xf32>
    %443 = arith.divf %441, %442 : vector<2x128xf32>
    %444 = math.tanh %438 : vector<2x128xf32>
    %445 = vector.extract_strided_slice %443 {offsets = [0, 0], sizes = [2, 32], strides = [1, 1]} : vector<2x128xf32> to vector<2x32xf32>
    %446 = vector.extract_strided_slice %443 {offsets = [0, 32], sizes = [2, 32], strides = [1, 1]} : vector<2x128xf32> to vector<2x32xf32>
    %447 = vector.extract_strided_slice %444 {offsets = [0, 64], sizes = [2, 32], strides = [1, 1]} : vector<2x128xf32> to vector<2x32xf32>
    %448 = vector.extract_strided_slice %443 {offsets = [0, 96], sizes = [2, 32], strides = [1, 1]} : vector<2x128xf32> to vector<2x32xf32>
    %449 = arith.mulf %446, %432 : vector<2x32xf32>
    %450 = arith.mulf %445, %447 : vector<2x32xf32>
    %451 = arith.addf %449, %450 : vector<2x32xf32>
    %452 = math.tanh %451 : vector<2x32xf32>
    %453 = arith.mulf %448, %452 : vector<2x32xf32>
    %c12_108 = arith.constant 12 : index
    %c0_109 = arith.constant 0 : index
    %454 = vector.load %arg12[%c12_108, %c0_109] : memref<16x32xf32, #tpu.memory_space<vmem>>, vector<2x32xf32>
    tpu.vector_store %arg12[%c12_108, %c0_109], %453 {strides = array<i32>} : memref<16x32xf32, #tpu.memory_space<vmem>>, vector<2x32xf32>,
    %455 = vector.extract_strided_slice %318 {offsets = [14, 0], sizes = [2, 128], strides = [1, 1]} : vector<16x128xf32> to vector<2x128xf32>
    %cst_110 = arith.constant dense<0.000000e+00> : vector<2x128xf32>
    %456 = tpu.matmul %453, %319, %cst_110 {dimension_numbers = #tpu.dot_dimension_numbers<[1], [0], [0], [1], [0, 0, 1, 1], [], []>} : vector<2x32xf32>, vector<32x128xf32>, vector<2x128xf32> -> vector<2x128xf32>
    %457 = arith.addf %455, %456 : vector<2x128xf32>
    %458 = arith.negf %457 : vector<2x128xf32>
    %459 = math.exp %458 : vector<2x128xf32>
    %cst_111 = arith.constant 1.000000e+00 : f32
    %460 = vector.broadcast %cst_111 : f32 to vector<2x128xf32>
    %461 = arith.addf %460, %459 : vector<2x128xf32>
    %462 = arith.divf %460, %461 : vector<2x128xf32>
    %463 = math.tanh %457 : vector<2x128xf32>
    %464 = vector.extract_strided_slice %462 {offsets = [0, 0], sizes = [2, 32], strides = [1, 1]} : vector<2x128xf32> to vector<2x32xf32>
    %465 = vector.extract_strided_slice %462 {offsets = [0, 32], sizes = [2, 32], strides = [1, 1]} : vector<2x128xf32> to vector<2x32xf32>
    %466 = vector.extract_strided_slice %463 {offsets = [0, 64], sizes = [2, 32], strides = [1, 1]} : vector<2x128xf32> to vector<2x32xf32>
    %467 = vector.extract_strided_slice %462 {offsets = [0, 96], sizes = [2, 32], strides = [1, 1]} : vector<2x128xf32> to vector<2x32xf32>
    %468 = arith.mulf %465, %451 : vector<2x32xf32>
    %469 = arith.mulf %464, %466 : vector<2x32xf32>
    %470 = arith.addf %468, %469 : vector<2x32xf32>
    %471 = math.tanh %470 : vector<2x32xf32>
    %472 = arith.mulf %467, %471 : vector<2x32xf32>
    %c14_112 = arith.constant 14 : index
    %c0_113 = arith.constant 0 : index
    %473 = vector.load %arg12[%c14_112, %c0_113] : memref<16x32xf32, #tpu.memory_space<vmem>>, vector<2x32xf32>
    tpu.vector_store %arg12[%c14_112, %c0_113], %472 {strides = array<i32>} : memref<16x32xf32, #tpu.memory_space<vmem>>, vector<2x32xf32>,
    %c0_114 = arith.constant 0 : index
    %c0_115 = arith.constant 0 : index
    %474 = vector.load %arg12[%c0_114, %c0_115] : memref<16x32xf32, #tpu.memory_space<vmem>>, vector<16x32xf32>
    %c0_116 = arith.constant 0 : index
    %c0_117 = arith.constant 0 : index
    %475 = vector.load %arg7[%c0_116, %c0_117] : memref<32x4xf32, #tpu.memory_space<vmem>>, vector<32x4xf32>
    %cst_118 = arith.constant dense<0.000000e+00> : vector<16x4xf32>
    %476 = tpu.matmul %474, %475, %cst_118 {dimension_numbers = #tpu.dot_dimension_numbers<[1], [0], [0], [1], [0, 0, 1, 1], [], []>} : vector<16x32xf32>, vector<32x4xf32>, vector<16x4xf32> -> vector<16x4xf32>
    %c0_119 = arith.constant 0 : index
    %c0_120 = arith.constant 0 : index
    %477 = vector.load %arg8[%c0_119, %c0_120] : memref<1x4xf32, #tpu.memory_space<vmem>>, vector<1x4xf32>
    %cst_121 = arith.constant 0.000000e+00 : f32
    %478 = vector.broadcast %cst_121 : f32 to vector<2x1xf32>
    %cst_122 = arith.constant 0.000000e+00 : f32
    %479 = vector.broadcast %cst_122 : f32 to vector<2x1xf32>
    %cst_123 = arith.constant 0.000000e+00 : f32
    %480 = vector.broadcast %cst_123 : f32 to vector<2x1xf32>
    %481 = vector.extract_strided_slice %476 {offsets = [0, 0], sizes = [2, 4], strides = [1, 1]} : vector<16x4xf32> to vector<2x4xf32>
    %482 = vector.broadcast %478 : vector<2x1xf32> to vector<2x4xf32>
    %483 = vector.broadcast %477 : vector<1x4xf32> to vector<2x4xf32>
    %484 = arith.mulf %482, %483 : vector<2x4xf32>
    %485 = arith.addf %481, %484 : vector<2x4xf32>
    %486 = arith.negf %485 : vector<2x4xf32>
    %487 = math.exp %486 : vector<2x4xf32>
    %cst_124 = arith.constant 1.000000e+00 : f32
    %488 = vector.broadcast %cst_124 : f32 to vector<2x4xf32>
    %489 = arith.addf %488, %487 : vector<2x4xf32>
    %490 = arith.divf %488, %489 : vector<2x4xf32>
    %491 = math.tanh %485 : vector<2x4xf32>
    %492 = vector.extract_strided_slice %490 {offsets = [0, 1], sizes = [2, 1], strides = [1, 1]} : vector<2x4xf32> to vector<2x1xf32>
    %493 = arith.mulf %492, %479 : vector<2x1xf32>
    %494 = vector.extract_strided_slice %490 {offsets = [0, 0], sizes = [2, 1], strides = [1, 1]} : vector<2x4xf32> to vector<2x1xf32>
    %495 = vector.extract_strided_slice %491 {offsets = [0, 2], sizes = [2, 1], strides = [1, 1]} : vector<2x4xf32> to vector<2x1xf32>
    %496 = arith.mulf %494, %495 : vector<2x1xf32>
    %497 = arith.addf %493, %496 : vector<2x1xf32>
    %498 = vector.extract_strided_slice %490 {offsets = [0, 3], sizes = [2, 1], strides = [1, 1]} : vector<2x4xf32> to vector<2x1xf32>
    %499 = math.tanh %497 : vector<2x1xf32>
    %500 = arith.mulf %498, %499 : vector<2x1xf32>
    %501 = vector.extract_strided_slice %476 {offsets = [2, 0], sizes = [2, 4], strides = [1, 1]} : vector<16x4xf32> to vector<2x4xf32>
    %502 = vector.broadcast %500 : vector<2x1xf32> to vector<2x4xf32>
    %503 = vector.broadcast %477 : vector<1x4xf32> to vector<2x4xf32>
    %504 = arith.mulf %502, %503 : vector<2x4xf32>
    %505 = arith.addf %501, %504 : vector<2x4xf32>
    %506 = arith.negf %505 : vector<2x4xf32>
    %507 = math.exp %506 : vector<2x4xf32>
    %cst_125 = arith.constant 1.000000e+00 : f32
    %508 = vector.broadcast %cst_125 : f32 to vector<2x4xf32>
    %509 = arith.addf %508, %507 : vector<2x4xf32>
    %510 = arith.divf %508, %509 : vector<2x4xf32>
    %511 = math.tanh %505 : vector<2x4xf32>
    %512 = vector.extract_strided_slice %510 {offsets = [0, 1], sizes = [2, 1], strides = [1, 1]} : vector<2x4xf32> to vector<2x1xf32>
    %513 = arith.mulf %512, %497 : vector<2x1xf32>
    %514 = vector.extract_strided_slice %510 {offsets = [0, 0], sizes = [2, 1], strides = [1, 1]} : vector<2x4xf32> to vector<2x1xf32>
    %515 = vector.extract_strided_slice %511 {offsets = [0, 2], sizes = [2, 1], strides = [1, 1]} : vector<2x4xf32> to vector<2x1xf32>
    %516 = arith.mulf %514, %515 : vector<2x1xf32>
    %517 = arith.addf %513, %516 : vector<2x1xf32>
    %518 = vector.extract_strided_slice %510 {offsets = [0, 3], sizes = [2, 1], strides = [1, 1]} : vector<2x4xf32> to vector<2x1xf32>
    %519 = math.tanh %517 : vector<2x1xf32>
    %520 = arith.mulf %518, %519 : vector<2x1xf32>
    %521 = vector.extract_strided_slice %476 {offsets = [4, 0], sizes = [2, 4], strides = [1, 1]} : vector<16x4xf32> to vector<2x4xf32>
    %522 = vector.broadcast %520 : vector<2x1xf32> to vector<2x4xf32>
    %523 = vector.broadcast %477 : vector<1x4xf32> to vector<2x4xf32>
    %524 = arith.mulf %522, %523 : vector<2x4xf32>
    %525 = arith.addf %521, %524 : vector<2x4xf32>
    %526 = arith.negf %525 : vector<2x4xf32>
    %527 = math.exp %526 : vector<2x4xf32>
    %cst_126 = arith.constant 1.000000e+00 : f32
    %528 = vector.broadcast %cst_126 : f32 to vector<2x4xf32>
    %529 = arith.addf %528, %527 : vector<2x4xf32>
    %530 = arith.divf %528, %529 : vector<2x4xf32>
    %531 = math.tanh %525 : vector<2x4xf32>
    %532 = vector.extract_strided_slice %530 {offsets = [0, 1], sizes = [2, 1], strides = [1, 1]} : vector<2x4xf32> to vector<2x1xf32>
    %533 = arith.mulf %532, %517 : vector<2x1xf32>
    %534 = vector.extract_strided_slice %530 {offsets = [0, 0], sizes = [2, 1], strides = [1, 1]} : vector<2x4xf32> to vector<2x1xf32>
    %535 = vector.extract_strided_slice %531 {offsets = [0, 2], sizes = [2, 1], strides = [1, 1]} : vector<2x4xf32> to vector<2x1xf32>
    %536 = arith.mulf %534, %535 : vector<2x1xf32>
    %537 = arith.addf %533, %536 : vector<2x1xf32>
    %538 = vector.extract_strided_slice %530 {offsets = [0, 3], sizes = [2, 1], strides = [1, 1]} : vector<2x4xf32> to vector<2x1xf32>
    %539 = math.tanh %537 : vector<2x1xf32>
    %540 = arith.mulf %538, %539 : vector<2x1xf32>
    %541 = vector.extract_strided_slice %476 {offsets = [6, 0], sizes = [2, 4], strides = [1, 1]} : vector<16x4xf32> to vector<2x4xf32>
    %542 = vector.broadcast %540 : vector<2x1xf32> to vector<2x4xf32>
    %543 = vector.broadcast %477 : vector<1x4xf32> to vector<2x4xf32>
    %544 = arith.mulf %542, %543 : vector<2x4xf32>
    %545 = arith.addf %541, %544 : vector<2x4xf32>
    %546 = arith.negf %545 : vector<2x4xf32>
    %547 = math.exp %546 : vector<2x4xf32>
    %cst_127 = arith.constant 1.000000e+00 : f32
    %548 = vector.broadcast %cst_127 : f32 to vector<2x4xf32>
    %549 = arith.addf %548, %547 : vector<2x4xf32>
    %550 = arith.divf %548, %549 : vector<2x4xf32>
    %551 = math.tanh %545 : vector<2x4xf32>
    %552 = vector.extract_strided_slice %550 {offsets = [0, 1], sizes = [2, 1], strides = [1, 1]} : vector<2x4xf32> to vector<2x1xf32>
    %553 = arith.mulf %552, %537 : vector<2x1xf32>
    %554 = vector.extract_strided_slice %550 {offsets = [0, 0], sizes = [2, 1], strides = [1, 1]} : vector<2x4xf32> to vector<2x1xf32>
    %555 = vector.extract_strided_slice %551 {offsets = [0, 2], sizes = [2, 1], strides = [1, 1]} : vector<2x4xf32> to vector<2x1xf32>
    %556 = arith.mulf %554, %555 : vector<2x1xf32>
    %557 = arith.addf %553, %556 : vector<2x1xf32>
    %558 = vector.extract_strided_slice %550 {offsets = [0, 3], sizes = [2, 1], strides = [1, 1]} : vector<2x4xf32> to vector<2x1xf32>
    %559 = math.tanh %557 : vector<2x1xf32>
    %560 = arith.mulf %558, %559 : vector<2x1xf32>
    %561 = vector.extract_strided_slice %476 {offsets = [8, 0], sizes = [2, 4], strides = [1, 1]} : vector<16x4xf32> to vector<2x4xf32>
    %562 = vector.broadcast %560 : vector<2x1xf32> to vector<2x4xf32>
    %563 = vector.broadcast %477 : vector<1x4xf32> to vector<2x4xf32>
    %564 = arith.mulf %562, %563 : vector<2x4xf32>
    %565 = arith.addf %561, %564 : vector<2x4xf32>
    %566 = arith.negf %565 : vector<2x4xf32>
    %567 = math.exp %566 : vector<2x4xf32>
    %cst_128 = arith.constant 1.000000e+00 : f32
    %568 = vector.broadcast %cst_128 : f32 to vector<2x4xf32>
    %569 = arith.addf %568, %567 : vector<2x4xf32>
    %570 = arith.divf %568, %569 : vector<2x4xf32>
    %571 = math.tanh %565 : vector<2x4xf32>
    %572 = vector.extract_strided_slice %570 {offsets = [0, 1], sizes = [2, 1], strides = [1, 1]} : vector<2x4xf32> to vector<2x1xf32>
    %573 = arith.mulf %572, %557 : vector<2x1xf32>
    %574 = vector.extract_strided_slice %570 {offsets = [0, 0], sizes = [2, 1], strides = [1, 1]} : vector<2x4xf32> to vector<2x1xf32>
    %575 = vector.extract_strided_slice %571 {offsets = [0, 2], sizes = [2, 1], strides = [1, 1]} : vector<2x4xf32> to vector<2x1xf32>
    %576 = arith.mulf %574, %575 : vector<2x1xf32>
    %577 = arith.addf %573, %576 : vector<2x1xf32>
    %578 = vector.extract_strided_slice %570 {offsets = [0, 3], sizes = [2, 1], strides = [1, 1]} : vector<2x4xf32> to vector<2x1xf32>
    %579 = math.tanh %577 : vector<2x1xf32>
    %580 = arith.mulf %578, %579 : vector<2x1xf32>
    %c0_129 = arith.constant 0 : index
    %581 = memref.load %arg9[%c0_129] : memref<4xf32, #tpu.memory_space<smem>>
    %582 = vector.broadcast %581 : f32 to vector<2x1xf32>
    %583 = arith.mulf %580, %582 : vector<2x1xf32>
    %584 = arith.addf %480, %583 : vector<2x1xf32>
    %585 = vector.extract_strided_slice %476 {offsets = [10, 0], sizes = [2, 4], strides = [1, 1]} : vector<16x4xf32> to vector<2x4xf32>
    %586 = vector.broadcast %580 : vector<2x1xf32> to vector<2x4xf32>
    %587 = vector.broadcast %477 : vector<1x4xf32> to vector<2x4xf32>
    %588 = arith.mulf %586, %587 : vector<2x4xf32>
    %589 = arith.addf %585, %588 : vector<2x4xf32>
    %590 = arith.negf %589 : vector<2x4xf32>
    %591 = math.exp %590 : vector<2x4xf32>
    %cst_130 = arith.constant 1.000000e+00 : f32
    %592 = vector.broadcast %cst_130 : f32 to vector<2x4xf32>
    %593 = arith.addf %592, %591 : vector<2x4xf32>
    %594 = arith.divf %592, %593 : vector<2x4xf32>
    %595 = math.tanh %589 : vector<2x4xf32>
    %596 = vector.extract_strided_slice %594 {offsets = [0, 1], sizes = [2, 1], strides = [1, 1]} : vector<2x4xf32> to vector<2x1xf32>
    %597 = arith.mulf %596, %577 : vector<2x1xf32>
    %598 = vector.extract_strided_slice %594 {offsets = [0, 0], sizes = [2, 1], strides = [1, 1]} : vector<2x4xf32> to vector<2x1xf32>
    %599 = vector.extract_strided_slice %595 {offsets = [0, 2], sizes = [2, 1], strides = [1, 1]} : vector<2x4xf32> to vector<2x1xf32>
    %600 = arith.mulf %598, %599 : vector<2x1xf32>
    %601 = arith.addf %597, %600 : vector<2x1xf32>
    %602 = vector.extract_strided_slice %594 {offsets = [0, 3], sizes = [2, 1], strides = [1, 1]} : vector<2x4xf32> to vector<2x1xf32>
    %603 = math.tanh %601 : vector<2x1xf32>
    %604 = arith.mulf %602, %603 : vector<2x1xf32>
    %c1 = arith.constant 1 : index
    %605 = memref.load %arg9[%c1] : memref<4xf32, #tpu.memory_space<smem>>
    %606 = vector.broadcast %605 : f32 to vector<2x1xf32>
    %607 = arith.mulf %604, %606 : vector<2x1xf32>
    %608 = arith.addf %584, %607 : vector<2x1xf32>
    %609 = vector.extract_strided_slice %476 {offsets = [12, 0], sizes = [2, 4], strides = [1, 1]} : vector<16x4xf32> to vector<2x4xf32>
    %610 = vector.broadcast %604 : vector<2x1xf32> to vector<2x4xf32>
    %611 = vector.broadcast %477 : vector<1x4xf32> to vector<2x4xf32>
    %612 = arith.mulf %610, %611 : vector<2x4xf32>
    %613 = arith.addf %609, %612 : vector<2x4xf32>
    %614 = arith.negf %613 : vector<2x4xf32>
    %615 = math.exp %614 : vector<2x4xf32>
    %cst_131 = arith.constant 1.000000e+00 : f32
    %616 = vector.broadcast %cst_131 : f32 to vector<2x4xf32>
    %617 = arith.addf %616, %615 : vector<2x4xf32>
    %618 = arith.divf %616, %617 : vector<2x4xf32>
    %619 = math.tanh %613 : vector<2x4xf32>
    %620 = vector.extract_strided_slice %618 {offsets = [0, 1], sizes = [2, 1], strides = [1, 1]} : vector<2x4xf32> to vector<2x1xf32>
    %621 = arith.mulf %620, %601 : vector<2x1xf32>
    %622 = vector.extract_strided_slice %618 {offsets = [0, 0], sizes = [2, 1], strides = [1, 1]} : vector<2x4xf32> to vector<2x1xf32>
    %623 = vector.extract_strided_slice %619 {offsets = [0, 2], sizes = [2, 1], strides = [1, 1]} : vector<2x4xf32> to vector<2x1xf32>
    %624 = arith.mulf %622, %623 : vector<2x1xf32>
    %625 = arith.addf %621, %624 : vector<2x1xf32>
    %626 = vector.extract_strided_slice %618 {offsets = [0, 3], sizes = [2, 1], strides = [1, 1]} : vector<2x4xf32> to vector<2x1xf32>
    %627 = math.tanh %625 : vector<2x1xf32>
    %628 = arith.mulf %626, %627 : vector<2x1xf32>
    %c2_132 = arith.constant 2 : index
    %629 = memref.load %arg9[%c2_132] : memref<4xf32, #tpu.memory_space<smem>>
    %630 = vector.broadcast %629 : f32 to vector<2x1xf32>
    %631 = arith.mulf %628, %630 : vector<2x1xf32>
    %632 = arith.addf %608, %631 : vector<2x1xf32>
    %633 = vector.extract_strided_slice %476 {offsets = [14, 0], sizes = [2, 4], strides = [1, 1]} : vector<16x4xf32> to vector<2x4xf32>
    %634 = vector.broadcast %628 : vector<2x1xf32> to vector<2x4xf32>
    %635 = vector.broadcast %477 : vector<1x4xf32> to vector<2x4xf32>
    %636 = arith.mulf %634, %635 : vector<2x4xf32>
    %637 = arith.addf %633, %636 : vector<2x4xf32>
    %638 = arith.negf %637 : vector<2x4xf32>
    %639 = math.exp %638 : vector<2x4xf32>
    %cst_133 = arith.constant 1.000000e+00 : f32
    %640 = vector.broadcast %cst_133 : f32 to vector<2x4xf32>
    %641 = arith.addf %640, %639 : vector<2x4xf32>
    %642 = arith.divf %640, %641 : vector<2x4xf32>
    %643 = math.tanh %637 : vector<2x4xf32>
    %644 = vector.extract_strided_slice %642 {offsets = [0, 1], sizes = [2, 1], strides = [1, 1]} : vector<2x4xf32> to vector<2x1xf32>
    %645 = arith.mulf %644, %625 : vector<2x1xf32>
    %646 = vector.extract_strided_slice %642 {offsets = [0, 0], sizes = [2, 1], strides = [1, 1]} : vector<2x4xf32> to vector<2x1xf32>
    %647 = vector.extract_strided_slice %643 {offsets = [0, 2], sizes = [2, 1], strides = [1, 1]} : vector<2x4xf32> to vector<2x1xf32>
    %648 = arith.mulf %646, %647 : vector<2x1xf32>
    %649 = arith.addf %645, %648 : vector<2x1xf32>
    %650 = vector.extract_strided_slice %642 {offsets = [0, 3], sizes = [2, 1], strides = [1, 1]} : vector<2x4xf32> to vector<2x1xf32>
    %651 = math.tanh %649 : vector<2x1xf32>
    %652 = arith.mulf %650, %651 : vector<2x1xf32>
    %c3 = arith.constant 3 : index
    %653 = memref.load %arg9[%c3] : memref<4xf32, #tpu.memory_space<smem>>
    %654 = vector.broadcast %653 : f32 to vector<2x1xf32>
    %655 = arith.mulf %652, %654 : vector<2x1xf32>
    %656 = arith.addf %632, %655 : vector<2x1xf32>
    %c0_134 = arith.constant 0 : index
    %657 = memref.load %arg10[%c0_134] : memref<1xf32, #tpu.memory_space<smem>>
    %658 = vector.broadcast %657 : f32 to vector<2x1xf32>
    %659 = arith.addf %656, %658 : vector<2x1xf32>
    %660 = arith.negf %659 : vector<2x1xf32>
    %661 = math.exp %660 : vector<2x1xf32>
    %cst_135 = arith.constant 1.000000e+00 : f32
    %662 = vector.broadcast %cst_135 : f32 to vector<2x1xf32>
    %663 = arith.addf %662, %661 : vector<2x1xf32>
    %664 = arith.divf %662, %663 : vector<2x1xf32>
    %c0_136 = arith.constant 0 : index
    %c0_137 = arith.constant 0 : index
    %665 = vector.load %arg11[%c0_136, %c0_137] : memref<2x1xf32, #tpu.memory_space<vmem>>, vector<2x1xf32>
    tpu.vector_store %arg11[%c0_136, %c0_137], %664 {strides = array<i32>} : memref<2x1xf32, #tpu.memory_space<vmem>>, vector<2x1xf32>,
    return
  }
}

</mosaic_0001>

<bundles_post_ra>
// kernel: tpu_custom_call.1
= control target key start
LH: loop header
LB: loop body
LE: loop exit
PB: predicated region body
PF: predicated region fallthrough
CT: control target
= control target key end

     0   :  { %17 = vsyncpa [#allocation5], 0  ;;  %s3615_s0 = inlined_call_operand.hbm [shape: f32[16,10], index: 0, kind: input, shape index: {}]   ;;  %s3616_s1 = inlined_call_operand.hbm [shape: f32[10,128], index: 1, kind: input, shape index: {}]   ;;  %s3617_s2 = inlined_call_operand.vmem [shape: f32[32,128], index: 2, kind: input, shape index: {}]   ;;  %s3618_s3 = inlined_call_operand.hbm [shape: f32[32,128], index: 3, kind: input, shape index: {}]   ;;  %s3619_s4 = inlined_call_operand.hbm [shape: f32[32,128], index: 4, kind: input, shape index: {}]   ;;  %s3620_s5 = inlined_call_operand.hbm [shape: f32[32,128], index: 5, kind: input, shape index: {}]   ;;  %s3621_s6 = inlined_call_operand.hbm [shape: f32[32,128], index: 6, kind: input, shape index: {}]   ;;  %s3622_s7 = inlined_call_operand.vmem [shape: f32[32,4], index: 7, kind: input, shape index: {}]   ;;  %s3623_s8 = inlined_call_operand.vmem [shape: f32[1,4], index: 8, kind: input, shape index: {}]   ;;  %s3624_s9 = inlined_call_operand.vmem [shape: f32[4], index: 9, kind: input, shape index: {}]   ;;  %s3625_s10 = inlined_call_operand.<no memory space> [shape: f32[1], index: 10, kind: input, shape index: {}]   ;;  %s3626_s11 = inlined_call_operand.vmem [shape: f32[2,1], index: 11, kind: output, shape index: {}]  }
   0x1   :  { %18 = vsyncpa [#allocation8], 0 }
   0x2   :  { %19 = vsyncpa [#allocation11], 0 }
   0x3   :  { %20 = vsyncpa [#allocation14], 0 }
   0x4   :  { %21 = vsyncpa [#allocation6], 0  ;;  %s39_s19 = sshll.u32 %s3616_s1, 4  ;;  %s2993_s20 = smov [#allocation7]   ;;  %s40_s19 = int_to_ptr.hbm [resolvable:$true] %s39_s19 }
   0x5   :  { %s41_s21 = sshll.u32 %s2993_s20, 4  ;;  %s67_s24 = sshll.u32 %s3619_s4, 4  ;;  %s42_s21 = int_to_ptr.vmem [resolvable:$true] %s41_s21  ;;  %s68_s24 = int_to_ptr.hbm [resolvable:$true] %s67_s24 }
   0x6   :  { %s2994_s25 = smov 128   ;;  %s2995_s26 = smov 8  }
   0x7   :  { %47 = dma.hbm_to_vmem [thread:$0]  %s40_s19, 256, %s42_s21, [#allocation8], %s2994_s25, %s2994_s25, %s2995_s26  }
   0x8   :  { %s2996_s27 = smov [#allocation10]   ;;  %s26_s1 = sshll.u32 %s3615_s0, 4  ;;  %s27_s1 = int_to_ptr.hbm [resolvable:$true] %s26_s1 }
   0x9   :  { %s69_s28 = sshll.u32 %s2996_s27, 4  ;;  %s54_s13 = sshll.u32 %s3618_s3, 4  ;;  %s70_s28 = int_to_ptr.vmem [resolvable:$true] %s69_s28  ;;  %s55_s13 = int_to_ptr.hbm [resolvable:$true] %s54_s13 }
   0xa   :  { %75 = dma.hbm_to_vmem [thread:$0]  %s68_s24, 512, %s70_s28, [#allocation11], %s2994_s25, %s2994_s25, %s2995_s26  }
   0xb   :  { %s2997_s14 = smov [#allocation4]   ;;  %s2998_s16 = smov [#allocation9]  }
   0xc   :  { %s28_s15 = sshll.u32 %s2997_s14, 4  ;;  %s56_s0 = sshll.u32 %s2998_s16, 4  ;;  %s29_s15 = int_to_ptr.vmem [resolvable:$true] %s28_s15  ;;  %s57_s0 = int_to_ptr.vmem [resolvable:$true] %s56_s0 }
   0xd   :  { %34 = dma.hbm_to_vmem [thread:$0]  %s27_s1, 256, %s29_s15, [#allocation5], %s2994_s25, %s2994_s25, %s2995_s26  }
   0xe   :  { %s80_s19 = sshll.u32 %s3620_s5, 4  ;;  %s93_s21 = sshll.u32 %s3621_s6, 4  ;;  %s81_s19 = int_to_ptr.hbm [resolvable:$true] %s80_s19  ;;  %s94_s21 = int_to_ptr.hbm [resolvable:$true] %s93_s21 }
   0xf   :  { %62 = dma.hbm_to_vmem [thread:$0]  %s55_s13, 512, %s57_s0, [#allocation8], %s2994_s25, %s2994_s25, %s2995_s26  }
  0x10   :  { %s2999_s22 = smov [#allocation12]   ;;  %s3000_s24 = smov [#allocation13]  }
  0x11   :  { %s82_s23 = sshll.u32 %s2999_s22, 4  ;;  %s95_s5 = sshll.u32 %s3000_s24, 4  ;;  %s83_s23 = int_to_ptr.vmem [resolvable:$true] %s82_s23  ;;  %s96_s5 = int_to_ptr.vmem [resolvable:$true] %s95_s5 }
  0x12   :  { %88 = dma.hbm_to_vmem [thread:$0]  %s81_s19, 512, %s83_s23, [#allocation11], %s2994_s25, %s2994_s25, %s2995_s26  }
  0x13   :  { %s111_s29 = sshll.u32 %s3624_s9, 4  ;;  %s3001_s6 = smov [#allocation15]   ;;  %s112_s29 = int_to_ptr.vmem [resolvable:$true] %s111_s29 }
  0x14   :  { %101 = dma.hbm_to_vmem [thread:$0]  %s94_s21, 512, %s96_s5, [#allocation14], %s2994_s25, %s2994_s25, %s2995_s26  }
  0x15   :  { %114 = dma.vmem_to_smem %s112_s29, 16, %s3001_s6, [#allocation6]  }
  0x16   :  { %2983 = dma.done.wait [#allocation5], 256  }
  0x17   :  { %2984 = vsyncadd [#allocation5], 4294967040 }
  0x18   :  { %2985 = dma.done.wait [#allocation8], 768  }
  0x19   :  { %2986 = vsyncadd [#allocation8], 4294966528 }
  0x1a   :  { %2987 = dma.done.wait [#allocation11], 1024  }
  0x1b   :  { %2988 = vsyncadd [#allocation11], 4294966272 }
  0x1c   :  { %2989 = dma.done.wait [#allocation14], 512  }
  0x1d   :  { %2990 = vsyncadd [#allocation14], 4294966784 }
  0x1e   :  { %2991 = dma.done.wait [#allocation6], 16  }
  0x1f   :  { %2992 = vsyncadd [#allocation6], 4294967280 }
  0x20   :  { %145 = sfence }
  0x21   :  { %v3112_v0 = vld [vmem:[%s3617_s2 + $0x18] sm:$0xff]  ;;  %v3117_v1 = vld [vmem:[%s3617_s2 + $0x10] sm:$0xff]  ;;  %v149_v2 = vld [vmem:[#allocation7 + $0x8] sm:$0x3]  ;;  %vm157_vm0 = vcmask 1041408   ;;  %vm150_vm1 = vcmask 80896  }
  0x22   :  { %204 = vmatpush.msra.mxu1 %v3112_v0  ;;  %2480 = vmatpush.msk.msra.mxu0 %vm157_vm0, %v149_v2  ;;  %v148_v3 = vld [vmem:[#allocation7] sm:$0xff]  ;;  %v3123_v4 = vld [vmem:[%s3617_s2 + $0x8] sm:$0xff]  ;;  %v146_v5 = vld [vmem:[#allocation4] sm:$0xff]  ;;  %v3002_v7 = vmov 0.0   ;;  %s3004_s14 = smov 32   ;;  %vm254_vm6 = vcmask 254976  }
  0x23   :  { %270 = vmatpush.msra.mxu3 %v3112_v0  ;;  %495 = vmatpush.msra.mxu2 %v3112_v0  ;;  %v3131_v6 = vld [vmem:[%s3617_s2] sm:$0xff]  ;;  %s3003_s2 = smov 64   ;;  %vm188_vm7 = vcmask 261120   ;;  %s3005_s22 = smov 126  }
  0x24   :  { %205 = vmatpush.msra.mxu1 %v3117_v1  ;;  %176 = vmatpush.msra.mxu0 %v148_v3  ;;  %s3007_s23 = smov 2   ;;  %s2540_s24 = sld [smem:[#allocation15 + $0x1]] }
  0x25   :  { %2481 = vmatmul.msk.f32.vlgmr.msra.gmra.mxu0 %vm150_vm1, %v146_v5  ;;  %271 = vmatpush.msra.mxu3 %v3117_v1  ;;  %s2268_s5 = sld [smem:[#allocation15]] }
  0x26   :  { %206 = vmatpush.msra.mxu1 %v3123_v4  ;;  %496 = vmatpush.msra.mxu2 %v3117_v1  ;;  %s2542_s27 = sld [smem:[#allocation15 + $0x2]] }
  0x27   :  { %272 = vmatpush.msra.mxu3 %v3123_v4  ;;  %637 = vmatpush.msrb.mxu0 %v3112_v0  ;;  %s2544_s28 = sld [smem:[#allocation15 + $0x3]] }
  0x28   :  { %207 = vmatpush.msra.mxu1 %v3131_v6  ;;  %497 = vmatpush.msra.mxu2 %v3123_v4 }
  0x29   :  { %208 = vmatmul.f32.vlgmr.msra.gmra.mxu1 %v3002_v7  ;;  %273 = vmatpush.msra.mxu3 %v3131_v6 }
  0x2a   :  { %420 = vmatpush.msrb.mxu1 %v3112_v0  ;;  %498 = vmatpush.msra.mxu2 %v3131_v6 }
  0x2b   :  { %345 = vmatpush.msrb.mxu3 %v3112_v0  ;;  %638 = vmatpush.msrb.mxu0 %v3117_v1 }
  0x2c   :  { %421 = vmatpush.msrb.mxu1 %v3117_v1 }
  0x2d   :  { %346 = vmatpush.msrb.mxu3 %v3117_v1  ;;  %639 = vmatpush.msrb.mxu0 %v3123_v4 }
  0x2e   :  { %422 = vmatpush.msrb.mxu1 %v3123_v4 }
  0x2f   :  { %347 = vmatpush.msrb.mxu3 %v3123_v4  ;;  %640 = vmatpush.msrb.mxu0 %v3131_v6 }
  0x30   :  { %423 = vmatpush.msrb.mxu1 %v3131_v6 }
  0x31   :  { %348 = vmatpush.msrb.mxu3 %v3131_v6 }
  0x32   :  { %711 = vmatpush.msra.mxu1 %v3112_v0 }
  0x34   :  { %712 = vmatpush.msra.mxu1 %v3117_v1 }
  0x36   :  { %713 = vmatpush.msra.mxu1 %v3123_v4 }
  0x38   :  { %714 = vmatpush.msra.mxu1 %v3131_v6 }
  0xa2   :  { %v3159_v8 = vpop.f32.mrf.mxu0 }
  0xa6   :  { %v209_v9 = vpop.f32.mrf.mxu1 }
  0xa7   :  { %v212_v10 = vadd.f32 %v209_v9, %v3159_v8 }
  0xa9   :  { %2567 = vtanh.f32 %v212_v10  ;;  %v2483_v12 = vmul.f32 -1.442695, %v212_v10 }
  0xab   :  { %2569 = vpow2.f32 %v2483_v12 }
  0xaf   :  { %v2568_v11 = vpop.eup %2567 }
  0xb0   :  { %235 = vrot.lane.b32.xlu0 %v2568_v11, %s3003_s2 }
  0xb1   :  { %v2570_v13 = vpop.eup %2569 }
  0xb2   :  { %v216_v14 = vadd.f32 1.0, %v2570_v13 }
  0xb4   :  { %2571 = vrcp.f32 %v216_v14  ;;  %v228_v20 = vand.u32 2147483648, %v216_v14  ;;  %vm222_vm3 = vweird.f32 %v216_v14  ;;  %v226_v21 = vand.u32 2147483647, %v216_v14 }
  0xb6   :  { %v229_v23 = vor.u32 1.1754944e-38, %v228_v20  ;;  %vm227_vm5 = vcmp.eq.f32.partialorder %v226_v21, 8.507059e+37 }
  0xba   :  { %v2572_v15 = vpop.eup %2571 }
  0xbb   :  { %v218_v16 = vmul.f32 %v2572_v15, %v216_v14  ;;  %vm223_vm2 = vweird.f32 %v2572_v15 }
  0xbc   :  { %vm224_vm4 = vmor %vm222_vm3, %vm223_vm2 }
  0xbd   :  { %v219_v17 = vsub.f32 1.0, %v218_v16 }
  0xbf   :  { %v220_v18 = vmul.f32 %v2572_v15, %v219_v17 }
  0xc1   :  { %v221_v19 = vadd.f32 %v2572_v15, %v220_v18 }
  0xc3   :  { %v225_v22 = vsel %vm224_vm4, %v2572_v15, %v221_v19 }
  0xc4   :  { %v230_v25 = vsel %vm227_vm5, %v229_v23, %v225_v22 }
  0xc5   :  { %v233_v27 = vmul.f32 0.0, %v230_v25 }
 0x122   :  { %v236_v24 = vpop.permute.xlu0 %235 }
 0x123   :  { %v238_v26 = vmul.f32 %v236_v24, %v230_v25 }
 0x125   :  { %240 = vrot.lane.b32.xlu0 %v238_v26, %s3004_s14 }
 0x197   :  { %v241_v28 = vpop.permute.xlu0 %240 }
 0x198   :  { %v243_v29 = vadd.f32 %v241_v28, %v233_v27 }
 0x19a   :  { %2573 = vtanh.f32 %v243_v29  ;;  %v303_v53 = vrot.slane %v243_v29, 6 }
 0x1a0   :  { %v2574_v30 = vpop.eup %2573 }
 0x1a1   :  { %246 = vrot.lane.b32.xlu1 %v2574_v30, %s3003_s2 }
 0x213   :  { %v247_v31 = vpop.permute.xlu1 %246 }
 0x214   :  { %v249_v32 = vmul.f32 %v247_v31, %v230_v25 }
 0x216   :  { %251 = vrot.lane.b32.xlu1 %v249_v32, %s3004_s14 }
 0x288   :  { %v252_v33 = vpop.permute.xlu1 %251 }
 0x289   :  { %255 = vst.msk [vmem:[#allocation2] sm:$0x3] %vm254_vm6, %v252_v33  ;;  %2484 = vmatmul.msk.f32.vlgmr.msra.gmra.mxu3 %vm188_vm7, %v252_v33 }
 0x28a   :  { %563 = vmatpush.msra.mxu3 %v3112_v0 }
 0x28c   :  { %564 = vmatpush.msra.mxu3 %v3117_v1 }
 0x28e   :  { %565 = vmatpush.msra.mxu3 %v3123_v4 }
 0x290   :  { %566 = vmatpush.msra.mxu3 %v3131_v6 }
 0x30c   :  { %v275_v34 = vpop.f32.mrf.mxu3 }
 0x30d   :  { %v279_v35 = vrot.slane %v275_v34, 6 }
 0x30f   :  { %v281_v36 = vadd.f32 %v279_v35, %v3159_v8 }
 0x311   :  { %2575 = vtanh.f32 %v281_v36  ;;  %v2485_v38 = vmul.f32 -1.442695, %v281_v36 }
 0x313   :  { %2577 = vpow2.f32 %v2485_v38 }
 0x317   :  { %v2576_v37 = vpop.eup %2575 }
 0x318   :  { %307 = vrot.lane.b32.xlu2 %v2576_v37, %s3003_s2 }
 0x319   :  { %v2578_v39 = vpop.eup %2577 }
 0x31a   :  { %v285_v40 = vadd.f32 1.0, %v2578_v39 }
 0x31c   :  { %2579 = vrcp.f32 %v285_v40  ;;  %v297_v46 = vand.u32 2147483648, %v285_v40  ;;  %vm291_vm9 = vweird.f32 %v285_v40  ;;  %v295_v47 = vand.u32 2147483647, %v285_v40 }
 0x31e   :  { %v298_v49 = vor.u32 1.1754944e-38, %v297_v46  ;;  %vm296_vm11 = vcmp.eq.f32.partialorder %v295_v47, 8.507059e+37 }
 0x322   :  { %v2580_v41 = vpop.eup %2579 }
 0x323   :  { %v287_v42 = vmul.f32 %v2580_v41, %v285_v40  ;;  %vm292_vm8 = vweird.f32 %v2580_v41 }
 0x324   :  { %vm293_vm10 = vmor %vm291_vm9, %vm292_vm8 }
 0x325   :  { %v288_v43 = vsub.f32 1.0, %v287_v42 }
 0x327   :  { %v289_v44 = vmul.f32 %v2580_v41, %v288_v43 }
 0x329   :  { %v290_v45 = vadd.f32 %v2580_v41, %v289_v44 }
 0x32b   :  { %v294_v48 = vsel %vm293_vm10, %v2580_v41, %v290_v45  ;;  %vm326_vm10 = vcmask 257026  }
 0x32c   :  { %v299_v51 = vsel %vm296_vm11, %v298_v49, %v294_v48  ;;  %vm401_vm11 = vcmask 259076  }
 0x32d   :  { %v305_v54 = vmul.f32 %v303_v53, %v299_v51 }
 0x372   :  { %v308_v50 = vpop.permute.xlu2 %307 }
 0x373   :  { %v310_v52 = vmul.f32 %v308_v50, %v299_v51 }
 0x375   :  { %312 = vrot.lane.b32.xlu2 %v310_v52, %s3004_s14 }
 0x3cf   :  { %v313_v55 = vpop.permute.xlu2 %312 }
 0x3d0   :  { %v315_v56 = vadd.f32 %v313_v55, %v305_v54  ;;  %v147_v54 = vld [vmem:[#allocation4 + $0x8] sm:$0xff] }
 0x3d1   :  { %2482 = vmatmul.msk.f32.gmra.mxu0 %vm150_vm1, %v147_v54 }
 0x3d2   :  { %2581 = vtanh.f32 %v315_v56  ;;  %v378_v19 = vrot.slane %v315_v56, 6 }
 0x3d8   :  { %v2582_v57 = vpop.eup %2581 }
 0x3d9   :  { %318 = vrot.lane.b32.xlu0 %v2582_v57, %s3003_s2 }
 0x44b   :  { %v319_v58 = vpop.permute.xlu0 %318 }
 0x44c   :  { %v3176_v59 = vmul.f32 %v319_v58, %v299_v51 }
 0x44e   :  { %v328_v60 = vrot.slane %v3176_v59, 2  ;;  %v3197_v56 = vpop.f32.mrf.mxu0 }
 0x450   :  { %329 = vrot.lane.b32.xlu1 %v328_v60, %s3004_s14 }
 0x4c2   :  { %v330_v61 = vpop.permute.xlu1 %329 }
 0x4c3   :  { %2486 = vmatmul.msk.f32.vlgmr.msrb.gmra.mxu3 %vm188_vm7, %v330_v61 }
 0x546   :  { %v350_v62 = vpop.f32.mrf.mxu3 }
 0x547   :  { %v354_v63 = vrot.slane %v350_v62, 4 }
 0x549   :  { %v356_v0 = vadd.f32 %v354_v63, %v3159_v8 }
 0x54b   :  { %2583 = vtanh.f32 %v356_v0  ;;  %v2487_v2 = vmul.f32 -1.442695, %v356_v0 }
 0x54d   :  { %2585 = vpow2.f32 %v2487_v2 }
 0x551   :  { %v2584_v1 = vpop.eup %2583 }
 0x552   :  { %382 = vrot.lane.b32.xlu2 %v2584_v1, %s3003_s2 }
 0x553   :  { %v2586_v3 = vpop.eup %2585 }
 0x554   :  { %v360_v4 = vadd.f32 1.0, %v2586_v3 }
 0x556   :  { %2587 = vrcp.f32 %v360_v4  ;;  %v372_v12 = vand.u32 2147483648, %v360_v4  ;;  %vm366_vm13 = vweird.f32 %v360_v4  ;;  %v370_v13 = vand.u32 2147483647, %v360_v4 }
 0x558   :  { %v373_v15 = vor.u32 1.1754944e-38, %v372_v12  ;;  %vm371_vm15 = vcmp.eq.f32.partialorder %v370_v13, 8.507059e+37 }
 0x55c   :  { %v2588_v5 = vpop.eup %2587 }
 0x55d   :  { %v362_v6 = vmul.f32 %v2588_v5, %v360_v4  ;;  %vm367_vm12 = vweird.f32 %v2588_v5 }
 0x55e   :  { %vm368_vm14 = vmor %vm366_vm13, %vm367_vm12  ;;  %vm476_vm12 = vcmask 261126  }
 0x55f   :  { %v363_v9 = vsub.f32 1.0, %v362_v6 }
 0x561   :  { %v364_v10 = vmul.f32 %v2588_v5, %v363_v9 }
 0x563   :  { %v365_v11 = vadd.f32 %v2588_v5, %v364_v10 }
 0x565   :  { %v369_v14 = vsel %vm368_vm14, %v2588_v5, %v365_v11 }
 0x566   :  { %v374_v17 = vsel %vm371_vm15, %v373_v15, %v369_v14 }
 0x567   :  { %v380_v20 = vmul.f32 %v378_v19, %v374_v17 }
 0x5ac   :  { %v383_v16 = vpop.permute.xlu2 %382 }
 0x5ad   :  { %v385_v18 = vmul.f32 %v383_v16, %v374_v17 }
 0x5af   :  { %387 = vrot.lane.b32.xlu0 %v385_v18, %s3004_s14 }
 0x621   :  { %v388_v21 = vpop.permute.xlu0 %387 }
 0x622   :  { %v390_v22 = vadd.f32 %v388_v21, %v380_v20 }
 0x624   :  { %2589 = vtanh.f32 %v390_v22  ;;  %v453_v46 = vrot.slane %v390_v22, 6  ;;  %v773_v22 = vld [vmem:[#allocation9 + $0x18] sm:$0xff] }
 0x625   :  { %792 = vmatpush.msrb.mxu2 %v773_v22 }
 0x62a   :  { %v2590_v23 = vpop.eup %2589 }
 0x62b   :  { %393 = vrot.lane.b32.xlu1 %v2590_v23, %s3003_s2  ;;  %v3214_v23 = vld [vmem:[#allocation10 + $0x18] sm:$0xff] }
 0x62c   :  { %819 = vmatpush.msrb.mxu3 %v3214_v23  ;;  %884 = vmatpush.msra.mxu0 %v3214_v23 }
 0x69d   :  { %v394_v24 = vpop.permute.xlu1 %393 }
 0x69e   :  { %v3185_v25 = vmul.f32 %v394_v24, %v374_v17  ;;  %v772_v24 = vld [vmem:[#allocation9 + $0x10] sm:$0xff] }
 0x69f   :  { %793 = vmatpush.msrb.mxu2 %v772_v24 }
 0x6a0   :  { %v403_v26 = vrot.slane %v3185_v25, 4 }
 0x6a2   :  { %404 = vrot.lane.b32.xlu2 %v403_v26, %s3004_s14  ;;  %v3217_v26 = vld [vmem:[#allocation10 + $0x10] sm:$0xff] }
 0x6a3   :  { %820 = vmatpush.msrb.mxu3 %v3217_v26  ;;  %885 = vmatpush.msra.mxu0 %v3217_v26 }
 0x6fc   :  { %v405_v27 = vpop.permute.xlu2 %404 }
 0x6fd   :  { %2488 = vmatmul.msk.f32.vlgmr.msrb.gmra.mxu1 %vm188_vm7, %v405_v27  ;;  %v3219_v27 = vld [vmem:[#allocation10 + $0x8] sm:$0xff] }
 0x6fe   :  { %958 = vmatpush.msrb.mxu1 %v3214_v23  ;;  %821 = vmatpush.msrb.mxu3 %v3219_v27 }
 0x6ff   :  { %886 = vmatpush.msra.mxu0 %v3219_v27 }
 0x700   :  { %959 = vmatpush.msrb.mxu1 %v3217_v26 }
 0x702   :  { %960 = vmatpush.msrb.mxu1 %v3219_v27 }
 0x77a   :  { %v425_v28 = vpop.f32.mrf.mxu1 }
 0x77b   :  { %v429_v29 = vrot.slane %v425_v28, 2  ;;  %v770_v28 = vld [vmem:[#allocation9] sm:$0xff] }
 0x77d   :  { %v431_v30 = vadd.f32 %v429_v29, %v3159_v8  ;;  %v3224_v29 = vld [vmem:[#allocation10] sm:$0xff] }
 0x77e   :  { %822 = vmatpush.msrb.mxu3 %v3224_v29  ;;  %887 = vmatpush.msra.mxu0 %v3224_v29 }
 0x77f   :  { %2591 = vtanh.f32 %v431_v30  ;;  %v2489_v32 = vmul.f32 -1.442695, %v431_v30  ;;  %961 = vmatpush.msrb.mxu1 %v3224_v29 }
 0x781   :  { %2593 = vpow2.f32 %v2489_v32 }
 0x785   :  { %v2592_v31 = vpop.eup %2591 }
 0x786   :  { %457 = vrot.lane.b32.xlu0 %v2592_v31, %s3003_s2 }
 0x787   :  { %v2594_v33 = vpop.eup %2593 }
 0x788   :  { %v435_v34 = vadd.f32 1.0, %v2594_v33 }
 0x78a   :  { %2595 = vrcp.f32 %v435_v34  ;;  %v447_v40 = vand.u32 2147483648, %v435_v34  ;;  %vm441_vm2 = vweird.f32 %v435_v34  ;;  %v445_v41 = vand.u32 2147483647, %v435_v34 }
 0x78c   :  { %v448_v42 = vor.u32 1.1754944e-38, %v447_v40  ;;  %vm446_vm4 = vcmp.eq.f32.partialorder %v445_v41, 8.507059e+37 }
 0x790   :  { %v2596_v35 = vpop.eup %2595 }
 0x791   :  { %v437_v36 = vmul.f32 %v2596_v35, %v435_v34  ;;  %vm442_vm0 = vweird.f32 %v2596_v35 }
 0x792   :  { %vm443_vm3 = vmor %vm441_vm2, %vm442_vm0 }
 0x793   :  { %v438_v37 = vsub.f32 1.0, %v437_v36 }
 0x795   :  { %v439_v38 = vmul.f32 %v2596_v35, %v438_v37 }
 0x797   :  { %v440_v39 = vadd.f32 %v2596_v35, %v439_v38 }
 0x799   :  { %v444_v8 = vsel %vm443_vm3, %v2596_v35, %v440_v39 }
 0x79a   :  { %v449_v44 = vsel %vm446_vm4, %v448_v42, %v444_v8 }
 0x79b   :  { %v455_v47 = vmul.f32 %v453_v46, %v449_v44 }
 0x7f8   :  { %v458_v43 = vpop.permute.xlu0 %457 }
 0x7f9   :  { %v460_v45 = vmul.f32 %v458_v43, %v449_v44 }
 0x7fb   :  { %462 = vrot.lane.b32.xlu1 %v460_v45, %s3004_s14 }
 0x86d   :  { %v463_v48 = vpop.permute.xlu1 %462 }
 0x86e   :  { %v465_v49 = vadd.f32 %v463_v48, %v455_v47 }
 0x870   :  { %2597 = vtanh.f32 %v465_v49  ;;  %v525_v14 = vrot.slane %v465_v49, 6 }
 0x876   :  { %v2598_v50 = vpop.eup %2597 }
 0x877   :  { %468 = vrot.lane.b32.xlu2 %v2598_v50, %s3003_s2 }
 0x8d1   :  { %v469_v51 = vpop.permute.xlu2 %468 }
 0x8d2   :  { %v471_v52 = vmul.f32 %v469_v51, %v449_v44 }
 0x8d4   :  { %v478_v53 = vrot.slane %v471_v52, 6 }
 0x8d6   :  { %479 = vrot.lane.b32.xlu0 %v478_v53, %s3004_s14 }
 0x948   :  { %v480_v55 = vpop.permute.xlu0 %479 }
 0x949   :  { %2490 = vmatmul.msk.f32.vlgmr.msra.gmra.mxu2 %vm188_vm7, %v480_v55 }
 0x9cc   :  { %v500_v57 = vpop.f32.mrf.mxu2 }
 0x9cd   :  { %v503_v58 = vadd.f32 %v500_v57, %v3197_v56 }
 0x9cf   :  { %2599 = vtanh.f32 %v503_v58  ;;  %v2491_v61 = vmul.f32 -1.442695, %v503_v58 }
 0x9d1   :  { %2601 = vpow2.f32 %v2491_v61 }
 0x9d5   :  { %v2600_v60 = vpop.eup %2599 }
 0x9d6   :  { %529 = vrot.lane.b32.xlu1 %v2600_v60, %s3003_s2 }
 0x9d7   :  { %v2602_v62 = vpop.eup %2601 }
 0x9d8   :  { %v507_v63 = vadd.f32 1.0, %v2602_v62 }
 0x9da   :  { %2603 = vrcp.f32 %v507_v63  ;;  %v519_v5 = vand.u32 2147483648, %v507_v63  ;;  %vm513_vm5 = vweird.f32 %v507_v63  ;;  %v517_v6 = vand.u32 2147483647, %v507_v63 }
 0x9dc   :  { %v520_v10 = vor.u32 1.1754944e-38, %v519_v5  ;;  %vm518_vm9 = vcmp.eq.f32.partialorder %v517_v6, 8.507059e+37 }
 0x9e0   :  { %v2604_v0 = vpop.eup %2603 }
 0x9e1   :  { %v509_v1 = vmul.f32 %v2604_v0, %v507_v63  ;;  %vm514_vm1 = vweird.f32 %v2604_v0 }
 0x9e2   :  { %vm515_vm8 = vmor %vm513_vm5, %vm514_vm1 }
 0x9e3   :  { %v510_v2 = vsub.f32 1.0, %v509_v1 }
 0x9e5   :  { %v511_v3 = vmul.f32 %v2604_v0, %v510_v2 }
 0x9e7   :  { %v512_v4 = vadd.f32 %v2604_v0, %v511_v3 }
 0x9e9   :  { %v516_v9 = vsel %vm515_vm8, %v2604_v0, %v512_v4 }
 0x9ea   :  { %v521_v12 = vsel %vm518_vm9, %v520_v10, %v516_v9 }
 0x9eb   :  { %v527_v15 = vmul.f32 %v525_v14, %v521_v12 }
 0xa48   :  { %v530_v11 = vpop.permute.xlu1 %529 }
 0xa49   :  { %v532_v13 = vmul.f32 %v530_v11, %v521_v12 }
 0xa4b   :  { %534 = vrot.lane.b32.xlu2 %v532_v13, %s3004_s14 }
 0xa53   :  { %323 = vrot.lane.b32.xlu2 %v3176_v59, %s3004_s14 }
 0xaa5   :  { %v535_v16 = vpop.permute.xlu2 %534 }
 0xaa6   :  { %v3204_v17 = vadd.f32 %v535_v16, %v527_v15 }
 0xaa8   :  { %2605 = vtanh.f32 %v3204_v17  ;;  %v596_v10 = vrot.slane %v3204_v17, 6 }
 0xaad   :  { %v324_v18 = vpop.permute.xlu2 %323 }
 0xaae   :  { %v2606_v19 = vpop.eup %2605  ;;  %327 = vst.msk [vmem:[#allocation2] sm:$0xc] %vm326_vm10, %v324_v18 }
 0xaaf   :  { %540 = vrot.lane.b32.xlu0 %v2606_v19, %s3003_s2 }
 0xab7   :  { %398 = vrot.lane.b32.xlu0 %v3185_v25, %s3004_s14  ;;  %v771_v25 = vld [vmem:[#allocation9 + $0x8] sm:$0xff] }
 0xab8   :  { %794 = vmatpush.msrb.mxu2 %v771_v25 }
 0xaba   :  { %795 = vmatpush.msrb.mxu2 %v770_v28 }
 0xabc   :  { %1248 = vmatpush.msra.mxu2 %v3214_v23 }
 0xabe   :  { %1249 = vmatpush.msra.mxu2 %v3217_v26 }
 0xac0   :  { %1250 = vmatpush.msra.mxu2 %v3219_v27 }
 0xac2   :  { %1251 = vmatpush.msra.mxu2 %v3224_v29 }
 0xb21   :  { %v541_v20 = vpop.permute.xlu0 %540 }
 0xb22   :  { %v543_v21 = vmul.f32 %v541_v20, %v521_v12 }
 0xb24   :  { %545 = vrot.lane.b32.xlu1 %v543_v21, %s3004_s14 }
 0xb29   :  { %v399_v59 = vpop.permute.xlu0 %398 }
 0xb2a   :  { %402 = vst.msk [vmem:[#allocation2] sm:$0x30] %vm401_vm11, %v399_v59 }
 0xb2c   :  { %473 = vrot.lane.b32.xlu1 %v471_v52, %s3004_s14 }
 0xb96   :  { %v546_v30 = vpop.permute.xlu1 %545 }
 0xb97   :  { %548 = vst.msk [vmem:[#allocation2 + $0x8] sm:$0x3] %vm254_vm6, %v546_v30  ;;  %2492 = vmatmul.msk.f32.vlgmr.msra.gmra.mxu3 %vm188_vm7, %v546_v30 }
 0xb98   :  { %1032 = vmatpush.msra.mxu3 %v3214_v23 }
 0xb9a   :  { %1033 = vmatpush.msra.mxu3 %v3217_v26 }
 0xb9c   :  { %1034 = vmatpush.msra.mxu3 %v3219_v27 }
 0xb9e   :  { %v474_v31 = vpop.permute.xlu1 %473  ;;  %1035 = vmatpush.msra.mxu3 %v3224_v29 }
 0xb9f   :  { %477 = vst.msk [vmem:[#allocation2] sm:$0xc0] %vm476_vm12, %v474_v31  ;;  %823 = vmatmul.f32.vlgmr.msrb.gmra.mxu3 %v3002_v7 }
 0xba0   :  { %1322 = vmatpush.msrb.mxu3 %v3214_v23 }
 0xba2   :  { %1323 = vmatpush.msrb.mxu3 %v3217_v26 }
 0xba4   :  { %1324 = vmatpush.msrb.mxu3 %v3219_v27 }
 0xba6   :  { %v768_v32 = vld [vmem:[#allocation2] sm:$0xff]  ;;  %1325 = vmatpush.msrb.mxu3 %v3224_v29 }
 0xba7   :  { %2498 = vmatmul.msk.f32.vlgmr.msrb.gmra.mxu2 %vm188_vm7, %v768_v32 }
 0xc1a   :  { %v568_v33 = vpop.f32.mrf.mxu3 }
 0xc1b   :  { %v572_v34 = vrot.slane %v568_v33, 6 }
 0xc1d   :  { %v574_v35 = vadd.f32 %v572_v34, %v3197_v56 }
 0xc1f   :  { %2607 = vtanh.f32 %v574_v35  ;;  %v2493_v41 = vmul.f32 -1.442695, %v574_v35 }
 0xc22   :  { %v824_v37 = vpop.f32.mrf.mxu3 }
 0xc25   :  { %v2608_v36 = vpop.eup %2607 }
 0xc26   :  { %600 = vrot.lane.b32.xlu2 %v2608_v36, %s3003_s2 }
 0xc2a   :  { %v3253_v38 = vpop.f32.mrf.mxu2 }
 0xc2b   :  { %v827_v39 = vadd.f32 %v824_v37, %v3253_v38 }
 0xc2d   :  { %2609 = vtanh.f32 %v827_v39  ;;  %v2500_v47 = vmul.f32 -1.442695, %v827_v39 }
 0xc2e   :  { %2611 = vpow2.f32 %v2493_v41 }
 0xc33   :  { %v2610_v40 = vpop.eup %2609 }
 0xc34   :  { %850 = vrot.lane.b32.xlu0 %v2610_v40, %s3003_s2  ;;  %v2612_v8 = vpop.eup %2611 }
 0xc35   :  { %v578_v42 = vadd.f32 1.0, %v2612_v8 }
 0xc37   :  { %2613 = vrcp.f32 %v578_v42  ;;  %v590_v49 = vand.u32 2147483648, %v578_v42  ;;  %vm584_vm14 = vweird.f32 %v578_v42  ;;  %v588_v50 = vand.u32 2147483647, %v578_v42 }
 0xc38   :  { %2615 = vpow2.f32 %v2500_v47 }
 0xc39   :  { %v591_v52 = vor.u32 1.1754944e-38, %v590_v49  ;;  %vm589_vm0 = vcmp.eq.f32.partialorder %v588_v50, 8.507059e+37 }
 0xc3d   :  { %v2614_v43 = vpop.eup %2613 }
 0xc3e   :  { %v580_v44 = vmul.f32 %v2614_v43, %v578_v42  ;;  %vm585_vm13 = vweird.f32 %v2614_v43  ;;  %v2616_v57 = vpop.eup %2615 }
 0xc3f   :  { %vm586_vm15 = vmor %vm584_vm14, %vm585_vm13  ;;  %v831_v58 = vadd.f32 1.0, %v2616_v57 }
 0xc40   :  { %v581_v45 = vsub.f32 1.0, %v580_v44 }
 0xc41   :  { %2617 = vrcp.f32 %v831_v58  ;;  %v843_v1 = vand.u32 2147483648, %v831_v58  ;;  %vm837_vm3 = vweird.f32 %v831_v58  ;;  %v841_v2 = vand.u32 2147483647, %v831_v58 }
 0xc42   :  { %v582_v46 = vmul.f32 %v2614_v43, %v581_v45 }
 0xc43   :  { %v844_v4 = vor.u32 1.1754944e-38, %v843_v1  ;;  %vm842_vm1 = vcmp.eq.f32.partialorder %v841_v2, 8.507059e+37 }
 0xc44   :  { %v583_v48 = vadd.f32 %v2614_v43, %v582_v46 }
 0xc46   :  { %v587_v51 = vsel %vm586_vm15, %v2614_v43, %v583_v48 }
 0xc47   :  { %v592_v54 = vsel %vm589_vm0, %v591_v52, %v587_v51  ;;  %v2618_v60 = vpop.eup %2617 }
 0xc48   :  { %v833_v61 = vmul.f32 %v2618_v60, %v831_v58  ;;  %vm838_vm2 = vweird.f32 %v2618_v60  ;;  %v598_v11 = vmul.f32 %v596_v10, %v592_v54 }
 0xc49   :  { %vm839_vm4 = vmor %vm837_vm3, %vm838_vm2 }
 0xc4a   :  { %v834_v62 = vsub.f32 1.0, %v833_v61 }
 0xc4c   :  { %v835_v63 = vmul.f32 %v2618_v60, %v834_v62 }
 0xc4e   :  { %v836_v0 = vadd.f32 %v2618_v60, %v835_v63 }
 0xc50   :  { %v840_v3 = vsel %vm839_vm4, %v2618_v60, %v836_v0 }
 0xc51   :  { %v845_v6 = vsel %vm842_vm1, %v844_v4, %v840_v3 }
 0xc52   :  { %v848_v15 = vmul.f32 0.0, %v845_v6 }
 0xc80   :  { %v601_v53 = vpop.permute.xlu2 %600 }
 0xc81   :  { %v603_v55 = vmul.f32 %v601_v53, %v592_v54 }
 0xc83   :  { %605 = vrot.lane.b32.xlu1 %v603_v55, %s3004_s14 }
 0xca6   :  { %v851_v5 = vpop.permute.xlu0 %850 }
 0xca7   :  { %v853_v9 = vmul.f32 %v851_v5, %v845_v6 }
 0xca9   :  { %855 = vrot.lane.b32.xlu2 %v853_v9, %s3004_s14 }
 0xcf5   :  { %v606_v12 = vpop.permute.xlu1 %605 }
 0xcf6   :  { %v3260_v13 = vadd.f32 %v606_v12, %v598_v11 }
 0xcf8   :  { %2619 = vtanh.f32 %v3260_v13  ;;  %v670_v5 = vrot.slane %v3260_v13, 6 }
 0xcfe   :  { %v2620_v14 = vpop.eup %2619 }
 0xcff   :  { %611 = vrot.lane.b32.xlu0 %v2620_v14, %s3003_s2 }
 0xd03   :  { %v856_v16 = vpop.permute.xlu2 %855 }
 0xd04   :  { %v3264_v18 = vadd.f32 %v856_v16, %v848_v15 }
 0xd06   :  { %2621 = vtanh.f32 %v3264_v18  ;;  %v917_v12 = vrot.slane %v3264_v18, 6 }
 0xd0c   :  { %v2622_v19 = vpop.eup %2621 }
 0xd0d   :  { %861 = vrot.lane.b32.xlu1 %v2622_v19, %s3003_s2 }
 0xd71   :  { %v612_v20 = vpop.permute.xlu0 %611 }
 0xd72   :  { %v3268_v17 = vmul.f32 %v612_v20, %v592_v54 }
 0xd74   :  { %v620_v21 = vrot.slane %v3268_v17, 2 }
 0xd76   :  { %621 = vrot.lane.b32.xlu2 %v620_v21, %s3004_s14 }
 0xd7f   :  { %v862_v59 = vpop.permute.xlu1 %861 }
 0xd80   :  { %v864_v22 = vmul.f32 %v862_v59, %v845_v6 }
 0xd82   :  { %866 = vrot.lane.b32.xlu0 %v864_v22, %s3004_s14 }
 0xdd0   :  { %v622_v24 = vpop.permute.xlu2 %621 }
 0xdd1   :  { %2494 = vmatmul.msk.f32.vlgmr.msrb.gmra.mxu0 %vm188_vm7, %v622_v24 }
 0xdd2   :  { %1106 = vmatpush.msrb.mxu0 %v3214_v23 }
 0xdd4   :  { %1107 = vmatpush.msrb.mxu0 %v3217_v26 }
 0xdd6   :  { %1108 = vmatpush.msrb.mxu0 %v3219_v27 }
 0xdd8   :  { %1109 = vmatpush.msrb.mxu0 %v3224_v29 }
 0xdf4   :  { %v867_v25 = vpop.permute.xlu0 %866 }
 0xdf5   :  { %869 = vst.msk [vmem:[#allocation2] sm:$0x3] %vm254_vm6, %v867_v25  ;;  %2501 = vmatmul.msk.f32.vlgmr.msra.gmra.mxu0 %vm188_vm7, %v867_v25 }
 0xe4e   :  { %v642_v28 = vpop.f32.mrf.mxu0 }
 0xe4f   :  { %v646_v30 = vrot.slane %v642_v28, 4 }
 0xe51   :  { %v648_v31 = vadd.f32 %v646_v30, %v3197_v56 }
 0xe53   :  { %2623 = vtanh.f32 %v648_v31  ;;  %v2495_v37 = vmul.f32 -1.442695, %v648_v31 }
 0xe59   :  { %v2624_v32 = vpop.eup %2623 }
 0xe5a   :  { %674 = vrot.lane.b32.xlu1 %v2624_v32, %s3003_s2 }
 0xe72   :  { %v889_v33 = vpop.f32.mrf.mxu0 }
 0xe73   :  { %v893_v34 = vrot.slane %v889_v33, 6 }
 0xe75   :  { %v895_v35 = vadd.f32 %v893_v34, %v3253_v38 }
 0xe77   :  { %2625 = vtanh.f32 %v895_v35  ;;  %v2502_v40 = vmul.f32 -1.442695, %v895_v35 }
 0xe78   :  { %2627 = vpow2.f32 %v2495_v37 }
 0xe79   :  { %2629 = vpow2.f32 %v2502_v40 }
 0xe7d   :  { %v2626_v36 = vpop.eup %2625 }
 0xe7e   :  { %921 = vrot.lane.b32.xlu2 %v2626_v36, %s3003_s2  ;;  %v2628_v39 = vpop.eup %2627 }
 0xe7f   :  { %v652_v41 = vadd.f32 1.0, %v2628_v39  ;;  %v2630_v8 = vpop.eup %2629 }
 0xe80   :  { %v899_v43 = vadd.f32 1.0, %v2630_v8 }
 0xe81   :  { %2631 = vrcp.f32 %v652_v41  ;;  %v664_v50 = vand.u32 2147483648, %v652_v41  ;;  %vm658_vm8 = vweird.f32 %v652_v41  ;;  %v662_v51 = vand.u32 2147483647, %v652_v41 }
 0xe82   :  { %2633 = vrcp.f32 %v899_v43  ;;  %v911_v62 = vand.u32 2147483648, %v899_v43  ;;  %vm905_vm15 = vweird.f32 %v899_v43  ;;  %v909_v63 = vand.u32 2147483647, %v899_v43 }
 0xe83   :  { %v665_v54 = vor.u32 1.1754944e-38, %v664_v50  ;;  %vm663_vm13 = vcmp.eq.f32.partialorder %v662_v51, 8.507059e+37 }
 0xe84   :  { %v912_v1 = vor.u32 1.1754944e-38, %v911_v62  ;;  %vm910_vm2 = vcmp.eq.f32.partialorder %v909_v63, 8.507059e+37 }
 0xe87   :  { %v2632_v42 = vpop.eup %2631 }
 0xe88   :  { %v654_v44 = vmul.f32 %v2632_v42, %v652_v41  ;;  %v2634_v47 = vpop.eup %2633  ;;  %vm659_vm5 = vweird.f32 %v2632_v42 }
 0xe89   :  { %v901_v49 = vmul.f32 %v2634_v47, %v899_v43  ;;  %vm660_vm9 = vmor %vm658_vm8, %vm659_vm5  ;;  %vm906_vm14 = vweird.f32 %v2634_v47 }
 0xe8a   :  { %v655_v45 = vsub.f32 1.0, %v654_v44  ;;  %vm907_vm0 = vmor %vm905_vm15, %vm906_vm14 }
 0xe8b   :  { %v902_v53 = vsub.f32 1.0, %v901_v49 }
 0xe8c   :  { %v656_v46 = vmul.f32 %v2632_v42, %v655_v45 }
 0xe8d   :  { %v903_v60 = vmul.f32 %v2634_v47, %v902_v53 }
 0xe8e   :  { %v657_v48 = vadd.f32 %v2632_v42, %v656_v46 }
 0xe8f   :  { %v904_v61 = vadd.f32 %v2634_v47, %v903_v60 }
 0xe90   :  { %v661_v52 = vsel %vm660_vm9, %v2632_v42, %v657_v48 }
 0xe91   :  { %v666_v55 = vsel %vm663_vm13, %v665_v54, %v661_v52  ;;  %v908_v0 = vsel %vm907_vm0, %v2634_v47, %v904_v61 }
 0xe92   :  { %v913_v3 = vsel %vm910_vm2, %v912_v1, %v908_v0  ;;  %v672_v6 = vmul.f32 %v670_v5, %v666_v55 }
 0xe93   :  { %v919_v14 = vmul.f32 %v917_v12, %v913_v3 }
 0xecc   :  { %v675_v57 = vpop.permute.xlu1 %674 }
 0xecd   :  { %v677_v58 = vmul.f32 %v675_v57, %v666_v55 }
 0xecf   :  { %679 = vrot.lane.b32.xlu0 %v677_v58, %s3004_s14 }
 0xed8   :  { %v922_v2 = vpop.permute.xlu2 %921 }
 0xed9   :  { %v924_v4 = vmul.f32 %v922_v2, %v913_v3 }
 0xedb   :  { %926 = vrot.lane.b32.xlu1 %v924_v4, %s3004_s14 }
 0xf41   :  { %v680_v9 = vpop.permute.xlu0 %679 }
 0xf42   :  { %v3287_v10 = vadd.f32 %v680_v9, %v672_v6 }
 0xf44   :  { %2635 = vtanh.f32 %v3287_v10 }
 0xf4a   :  { %v2636_v11 = vpop.eup %2635 }
 0xf4b   :  { %685 = vrot.lane.b32.xlu2 %v2636_v11, %s3003_s2 }
 0xf4d   :  { %v927_v15 = vpop.permute.xlu1 %926 }
 0xf4e   :  { %v929_v16 = vadd.f32 %v927_v15, %v919_v14 }
 0xf50   :  { %2637 = vtanh.f32 %v929_v16  ;;  %v991_v48 = vrot.slane %v929_v16, 6  ;;  %v744_v16 = vrot.slane %v3287_v10, 6 }
 0xf56   :  { %v2638_v19 = vpop.eup %2637 }
 0xf57   :  { %932 = vrot.lane.b32.xlu0 %v2638_v19, %s3003_s2 }
 0xfa5   :  { %v686_v20 = vpop.permute.xlu2 %685 }
 0xfa6   :  { %v3293_v13 = vmul.f32 %v686_v20, %v666_v55 }
 0xfa8   :  { %v694_v21 = vrot.slane %v3293_v13, 4 }
 0xfaa   :  { %695 = vrot.lane.b32.xlu1 %v694_v21, %s3004_s14 }
 0xfc9   :  { %v933_v59 = vpop.permute.xlu0 %932 }
 0xfca   :  { %v3297_v22 = vmul.f32 %v933_v59, %v913_v3 }
 0xfcc   :  { %v941_v18 = vrot.slane %v3297_v22, 2 }
 0xfce   :  { %942 = vrot.lane.b32.xlu2 %v941_v18, %s3004_s14 }
0x101c   :  { %v696_v24 = vpop.permute.xlu1 %695 }
0x101d   :  { %2496 = vmatmul.msk.f32.vlgmr.msra.gmra.mxu1 %vm188_vm7, %v696_v24 }
0x101e   :  { %1174 = vmatpush.msra.mxu1 %v3214_v23 }
0x1020   :  { %1175 = vmatpush.msra.mxu1 %v3217_v26 }
0x1022   :  { %1176 = vmatpush.msra.mxu1 %v3219_v27 }
0x1024   :  { %1177 = vmatpush.msra.mxu1 %v3224_v29 }
0x1028   :  { %v943_v25 = vpop.permute.xlu2 %942 }
0x1029   :  { %2503 = vmatmul.msk.f32.vlgmr.msrb.gmra.mxu1 %vm188_vm7, %v943_v25 }
0x109a   :  { %v716_v28 = vpop.f32.mrf.mxu1 }
0x109b   :  { %v720_v41 = vrot.slane %v716_v28, 2 }
0x109d   :  { %v722_v43 = vadd.f32 %v720_v41, %v3197_v56 }
0x109f   :  { %v2497_v56 = vmul.f32 -1.442695, %v722_v43 }
0x10a6   :  { %v963_v30 = vpop.f32.mrf.mxu1 }
0x10a7   :  { %v967_v31 = vrot.slane %v963_v30, 4 }
0x10a9   :  { %v969_v32 = vadd.f32 %v967_v31, %v3253_v38 }
0x10ab   :  { %2639 = vtanh.f32 %v969_v32  ;;  %v2504_v34 = vmul.f32 -1.442695, %v969_v32 }
0x10ad   :  { %2641 = vpow2.f32 %v2504_v34 }
0x10b1   :  { %v2640_v33 = vpop.eup %2639 }
0x10b2   :  { %995 = vrot.lane.b32.xlu0 %v2640_v33, %s3003_s2 }
0x10b3   :  { %v2642_v23 = vpop.eup %2641 }
0x10b4   :  { %v973_v26 = vadd.f32 1.0, %v2642_v23 }
0x10b6   :  { %2643 = vrcp.f32 %v973_v26  ;;  %v985_v39 = vand.u32 2147483648, %v973_v26  ;;  %vm979_vm4 = vweird.f32 %v973_v26  ;;  %v983_v40 = vand.u32 2147483647, %v973_v26 }
0x10b7   :  { %2645 = vtanh.f32 %v722_v43 }
0x10b8   :  { %v986_v42 = vor.u32 1.1754944e-38, %v985_v39  ;;  %vm984_vm5 = vcmp.eq.f32.partialorder %v983_v40, 8.507059e+37 }
0x10bc   :  { %v2644_v27 = vpop.eup %2643 }
0x10bd   :  { %v975_v35 = vmul.f32 %v2644_v27, %v973_v26  ;;  %vm980_vm3 = vweird.f32 %v2644_v27  ;;  %v2646_v47 = vpop.eup %2645 }
0x10be   :  { %vm981_vm1 = vmor %vm979_vm4, %vm980_vm3 }
0x10bf   :  { %v976_v29 = vsub.f32 1.0, %v975_v35 }
0x10c1   :  { %v977_v36 = vmul.f32 %v2644_v27, %v976_v29 }
0x10c3   :  { %v978_v37 = vadd.f32 %v2644_v27, %v977_v36 }
0x10c5   :  { %v982_v8 = vsel %vm981_vm1, %v2644_v27, %v978_v37 }
0x10c6   :  { %v987_v45 = vsel %vm984_vm5, %v986_v42, %v982_v8 }
0x10c7   :  { %v993_v49 = vmul.f32 %v991_v48, %v987_v45 }
0x1124   :  { %v996_v44 = vpop.permute.xlu0 %995 }
0x1125   :  { %v998_v46 = vmul.f32 %v996_v44, %v987_v45 }
0x1127   :  { %1000 = vrot.lane.b32.xlu1 %v998_v46, %s3004_s14 }
0x112f   :  { %748 = vrot.lane.b32.xlu1 %v2646_v47, %s3003_s2 }
0x1199   :  { %v1001_v50 = vpop.permute.xlu1 %1000 }
0x119a   :  { %v3312_v51 = vadd.f32 %v1001_v50, %v993_v49 }
0x119c   :  { %2647 = vtanh.f32 %v3312_v51  ;;  %v1065_v37 = vrot.slane %v3312_v51, 6 }
0x119d   :  { %2649 = vpow2.f32 %v2497_v56 }
0x11a1   :  { %v749_v4 = vpop.permute.xlu1 %748 }
0x11a2   :  { %v2648_v52 = vpop.eup %2647 }
0x11a3   :  { %1006 = vrot.lane.b32.xlu2 %v2648_v52, %s3003_s2  ;;  %v2650_v53 = vpop.eup %2649 }
0x11a4   :  { %v726_v54 = vadd.f32 1.0, %v2650_v53 }
0x11a6   :  { %2651 = vrcp.f32 %v726_v54  ;;  %v738_v1 = vand.u32 2147483648, %v726_v54  ;;  %vm732_vm9 = vweird.f32 %v726_v54  ;;  %v736_v2 = vand.u32 2147483647, %v726_v54 }
0x11a8   :  { %v739_v5 = vor.u32 1.1754944e-38, %v738_v1  ;;  %vm737_vm14 = vcmp.eq.f32.partialorder %v736_v2, 8.507059e+37 }
0x11ac   :  { %v2652_v55 = vpop.eup %2651 }
0x11ad   :  { %v728_v57 = vmul.f32 %v2652_v55, %v726_v54  ;;  %vm733_vm8 = vweird.f32 %v2652_v55 }
0x11ae   :  { %vm734_vm13 = vmor %vm732_vm9, %vm733_vm8 }
0x11af   :  { %v729_v58 = vsub.f32 1.0, %v728_v57 }
0x11b1   :  { %v730_v60 = vmul.f32 %v2652_v55, %v729_v58 }
0x11b3   :  { %v731_v63 = vadd.f32 %v2652_v55, %v730_v60 }
0x11b5   :  { %v735_v3 = vsel %vm734_vm13, %v2652_v55, %v731_v63 }
0x11b6   :  { %v740_v6 = vsel %vm737_vm14, %v739_v5, %v735_v3 }
0x11b7   :  { %v751_v9 = vmul.f32 %v749_v4, %v740_v6  ;;  %v746_v20 = vmul.f32 %v744_v16, %v740_v6 }
0x11fd   :  { %v1007_v61 = vpop.permute.xlu2 %1006 }
0x11fe   :  { %v3316_v62 = vmul.f32 %v1007_v61, %v987_v45 }
0x1200   :  { %v1015_v0 = vrot.slane %v3316_v62, 4 }
0x1202   :  { %1016 = vrot.lane.b32.xlu0 %v1015_v0, %s3004_s14 }
0x120a   :  { %753 = vrot.lane.b32.xlu0 %v751_v9, %s3004_s14 }
0x1274   :  { %v1017_v11 = vpop.permute.xlu0 %1016 }
0x1275   :  { %2505 = vmatmul.msk.f32.vlgmr.msra.gmra.mxu3 %vm188_vm7, %v1017_v11 }
0x127c   :  { %v754_v19 = vpop.permute.xlu0 %753 }
0x127d   :  { %v756_v21 = vadd.f32 %v754_v19, %v746_v20  ;;  %v1384_v20 = vld [vmem:[#allocation12 + $0x18] sm:$0xff] }
0x127e   :  { %1403 = vmatpush.msra.mxu0 %v1384_v20 }
0x12f8   :  { %v1037_v12 = vpop.f32.mrf.mxu3 }
0x12f9   :  { %v1041_v14 = vrot.slane %v1037_v12, 2 }
0x12fb   :  { %v1043_v15 = vadd.f32 %v1041_v14, %v3253_v38 }
0x12fd   :  { %2653 = vtanh.f32 %v1043_v15  ;;  %v2506_v24 = vmul.f32 -1.442695, %v1043_v15 }
0x12fe   :  { %2655 = vtanh.f32 %v756_v21  ;;  %v3357_v21 = vld [vmem:[#allocation13 + $0x18] sm:$0xff] }
0x12ff   :  { %2657 = vpow2.f32 %v2506_v24  ;;  %1430 = vmatpush.msrb.mxu1 %v3357_v21  ;;  %v1382_v24 = vld [vmem:[#allocation12 + $0x8] sm:$0xff]  ;;  %1495 = vmatpush.msrb.mxu2 %v3357_v21 }
0x1300   :  { %1569 = vmatpush.msra.mxu3 %v3357_v21 }
0x1303   :  { %v2654_v59 = vpop.eup %2653 }
0x1304   :  { %1069 = vrot.lane.b32.xlu2 %v2654_v59, %s3003_s2  ;;  %v2656_v18 = vpop.eup %2655  ;;  %v1383_v59 = vld [vmem:[#allocation12 + $0x10] sm:$0xff] }
0x1305   :  { %v2658_v25 = vpop.eup %2657  ;;  %1404 = vmatpush.msra.mxu0 %v1383_v59 }
0x1306   :  { %v1047_v38 = vadd.f32 1.0, %v2658_v25  ;;  %v1381_v25 = vld [vmem:[#allocation12] sm:$0xff] }
0x1307   :  { %1405 = vmatpush.msra.mxu0 %v1382_v24 }
0x1308   :  { %2659 = vrcp.f32 %v1047_v38  ;;  %v1059_v33 = vand.u32 2147483648, %v1047_v38  ;;  %vm1053_vm0 = vweird.f32 %v1047_v38  ;;  %v1057_v34 = vand.u32 2147483647, %v1047_v38 }
0x1309   :  { %1406 = vmatpush.msra.mxu0 %v1381_v25 }
0x130a   :  { %v1060_v26 = vor.u32 1.1754944e-38, %v1059_v33  ;;  %vm1058_vm3 = vcmp.eq.f32.partialorder %v1057_v34, 8.507059e+37 }
0x130c   :  { %759 = vrot.lane.b32.xlu2 %v2656_v18, %s3003_s2  ;;  %v3360_v18 = vld [vmem:[#allocation13 + $0x10] sm:$0xff] }
0x130d   :  { %1431 = vmatpush.msrb.mxu1 %v3360_v18  ;;  %1496 = vmatpush.msrb.mxu2 %v3360_v18 }
0x130e   :  { %v2660_v10 = vpop.eup %2659  ;;  %1570 = vmatpush.msra.mxu3 %v3360_v18 }
0x130f   :  { %v1049_v28 = vmul.f32 %v2660_v10, %v1047_v38  ;;  %vm1054_vm15 = vweird.f32 %v2660_v10  ;;  %v3367_v38 = vld [vmem:[#allocation13] sm:$0xff] }
0x1310   :  { %vm1055_vm2 = vmor %vm1053_vm0, %vm1054_vm15 }
0x1311   :  { %v1050_v30 = vsub.f32 1.0, %v1049_v28 }
0x1313   :  { %v1051_v31 = vmul.f32 %v2660_v10, %v1050_v30 }
0x1314   :  { %690 = vrot.lane.b32.xlu2 %v3293_v13, %s3004_s14 }
0x1315   :  { %v1052_v32 = vadd.f32 %v2660_v10, %v1051_v31 }
0x1317   :  { %v1056_v23 = vsel %vm1055_vm2, %v2660_v10, %v1052_v32 }
0x1318   :  { %v1061_v13 = vsel %vm1058_vm3, %v1060_v26, %v1056_v23 }
0x1319   :  { %v1067_v39 = vmul.f32 %v1065_v37, %v1061_v13 }
0x135e   :  { %v1070_v27 = vpop.permute.xlu2 %1069 }
0x135f   :  { %v1072_v35 = vmul.f32 %v1070_v27, %v1061_v13 }
0x1361   :  { %1074 = vrot.lane.b32.xlu1 %v1072_v35, %s3004_s14 }
0x1366   :  { %v760_v29 = vpop.permute.xlu2 %759 }
0x1367   :  { %v762_v43 = vmul.f32 %v760_v29, %v740_v6 }
0x1369   :  { %616 = vrot.lane.b32.xlu1 %v3268_v17, %s3004_s14 }
0x136e   :  { %v691_v36 = vpop.permute.xlu2 %690 }
0x136f   :  { %693 = vst.msk [vmem:[#allocation2 + $0x8] sm:$0x30] %vm401_vm11, %v691_v36 }
0x13d3   :  { %v1075_v40 = vpop.permute.xlu1 %1074 }
0x13d4   :  { %v1077_v41 = vadd.f32 %v1075_v40, %v1067_v39 }
0x13d6   :  { %2661 = vtanh.f32 %v1077_v41  ;;  %v1136_v6 = vrot.slane %v1077_v41, 6 }
0x13db   :  { %v617_v8 = vpop.permute.xlu1 %616 }
0x13dc   :  { %v2662_v42 = vpop.eup %2661  ;;  %619 = vst.msk [vmem:[#allocation2 + $0x8] sm:$0xc] %vm326_vm10, %v617_v8 }
0x13dd   :  { %1080 = vrot.lane.b32.xlu0 %v2662_v42, %s3003_s2 }
0x13e5   :  { %764 = vrot.lane.b32.xlu0 %v762_v43, %s3004_s14 }
0x144f   :  { %v1081_v44 = vpop.permute.xlu0 %1080 }
0x1450   :  { %v1083_v17 = vmul.f32 %v1081_v44, %v1061_v13 }
0x1452   :  { %v1089_v45 = vrot.slane %v1083_v17, 6 }
0x1454   :  { %1090 = vrot.lane.b32.xlu1 %v1089_v45, %s3004_s14 }
0x1457   :  { %v765_v46 = vpop.permute.xlu0 %764 }
0x1458   :  { %767 = vst.msk [vmem:[#allocation2 + $0x8] sm:$0xc0] %vm476_vm12, %v765_v46 }
0x145f   :  { %v769_v47 = vld [vmem:[#allocation2 + $0x8] sm:$0xff] }
0x1460   :  { %2499 = vmatmul.msk.f32.gmra.mxu2 %vm188_vm7, %v769_v47 }
0x14c6   :  { %v1091_v48 = vpop.permute.xlu1 %1090 }
0x14c7   :  { %2507 = vmatmul.msk.f32.vlgmr.msrb.gmra.mxu0 %vm188_vm7, %v1091_v48 }
0x14c8   :  { %1859 = vmatpush.msrb.mxu0 %v3357_v21 }
0x14ca   :  { %1860 = vmatpush.msrb.mxu0 %v3360_v18 }
0x14e3   :  { %v3340_v49 = vpop.f32.mrf.mxu2 }
0x1544   :  { %v1111_v50 = vpop.f32.mrf.mxu0 }
0x1545   :  { %v1114_v51 = vadd.f32 %v1111_v50, %v3340_v49 }
0x1547   :  { %2663 = vtanh.f32 %v1114_v51  ;;  %v2508_v56 = vmul.f32 -1.442695, %v1114_v51 }
0x1549   :  { %2665 = vpow2.f32 %v2508_v56 }
0x154d   :  { %v2664_v52 = vpop.eup %2663 }
0x154e   :  { %1140 = vrot.lane.b32.xlu2 %v2664_v52, %s3003_s2 }
0x154f   :  { %v2666_v53 = vpop.eup %2665 }
0x1550   :  { %v1118_v54 = vadd.f32 1.0, %v2666_v53 }
0x1552   :  { %2667 = vrcp.f32 %v1118_v54  ;;  %v1130_v63 = vand.u32 2147483648, %v1118_v54  ;;  %vm1124_vm1 = vweird.f32 %v1118_v54  ;;  %v1128_v0 = vand.u32 2147483647, %v1118_v54 }
0x1554   :  { %v1131_v2 = vor.u32 1.1754944e-38, %v1130_v63  ;;  %vm1129_vm8 = vcmp.eq.f32.partialorder %v1128_v0, 8.507059e+37 }
0x1558   :  { %v2668_v55 = vpop.eup %2667 }
0x1559   :  { %v1120_v57 = vmul.f32 %v2668_v55, %v1118_v54  ;;  %vm1125_vm4 = vweird.f32 %v2668_v55 }
0x155a   :  { %vm1126_vm5 = vmor %vm1124_vm1, %vm1125_vm4 }
0x155b   :  { %v1121_v58 = vsub.f32 1.0, %v1120_v57 }
0x155d   :  { %v1122_v60 = vmul.f32 %v2668_v55, %v1121_v58 }
0x155f   :  { %v1123_v61 = vadd.f32 %v2668_v55, %v1122_v60 }
0x1561   :  { %v1127_v1 = vsel %vm1126_vm5, %v2668_v55, %v1123_v61 }
0x1562   :  { %v1132_v4 = vsel %vm1129_vm8, %v1131_v2, %v1127_v1 }
0x1563   :  { %v1138_v9 = vmul.f32 %v1136_v6, %v1132_v4 }
0x15a8   :  { %v1141_v3 = vpop.permute.xlu2 %1140 }
0x15a9   :  { %v1143_v5 = vmul.f32 %v1141_v3, %v1132_v4 }
0x15ab   :  { %1145 = vrot.lane.b32.xlu0 %v1143_v5, %s3004_s14 }
0x15b3   :  { %937 = vrot.lane.b32.xlu0 %v3297_v22, %s3004_s14 }
0x161d   :  { %v1146_v11 = vpop.permute.xlu0 %1145 }
0x161e   :  { %v3347_v12 = vadd.f32 %v1146_v11, %v1138_v9 }
0x1620   :  { %2669 = vtanh.f32 %v3347_v12  ;;  %v1207_v1 = vrot.slane %v3347_v12, 6 }
0x1625   :  { %v938_v14 = vpop.permute.xlu0 %937 }
0x1626   :  { %v2670_v15 = vpop.eup %2669  ;;  %940 = vst.msk [vmem:[#allocation2] sm:$0xc] %vm326_vm10, %v938_v14 }
0x1627   :  { %1151 = vrot.lane.b32.xlu1 %v2670_v15, %s3003_s2 }
0x162f   :  { %1011 = vrot.lane.b32.xlu1 %v3316_v62, %s3004_s14  ;;  %v3362_v62 = vld [vmem:[#allocation13 + $0x8] sm:$0xff] }
0x1630   :  { %1432 = vmatpush.msrb.mxu1 %v3362_v62  ;;  %1497 = vmatpush.msrb.mxu2 %v3362_v62 }
0x1631   :  { %1571 = vmatpush.msra.mxu3 %v3362_v62  ;;  %1861 = vmatpush.msrb.mxu0 %v3362_v62 }
0x1632   :  { %1433 = vmatpush.msrb.mxu1 %v3367_v38  ;;  %1498 = vmatpush.msrb.mxu2 %v3367_v38 }
0x1633   :  { %1572 = vmatpush.msra.mxu3 %v3367_v38  ;;  %1862 = vmatpush.msrb.mxu0 %v3367_v38 }
0x1699   :  { %v1152_v16 = vpop.permute.xlu1 %1151 }
0x169a   :  { %v1154_v19 = vmul.f32 %v1152_v16, %v1132_v4 }
0x169c   :  { %1156 = vrot.lane.b32.xlu2 %v1154_v19, %s3004_s14 }
0x16a1   :  { %v1012_v22 = vpop.permute.xlu1 %1011 }
0x16a2   :  { %1014 = vst.msk [vmem:[#allocation2] sm:$0x30] %vm401_vm11, %v1012_v22 }
0x16a4   :  { %1085 = vrot.lane.b32.xlu2 %v1083_v17, %s3004_s14 }
0x16f6   :  { %v1157_v10 = vpop.permute.xlu2 %1156 }
0x16f7   :  { %1159 = vst.msk [vmem:[#allocation2 + $0x8] sm:$0x3] %vm254_vm6, %v1157_v10  ;;  %2509 = vmatmul.msk.f32.vlgmr.msra.gmra.mxu1 %vm188_vm7, %v1157_v10 }
0x16f8   :  { %1643 = vmatpush.msra.mxu1 %v3357_v21 }
0x16fa   :  { %1644 = vmatpush.msra.mxu1 %v3360_v18 }
0x16fc   :  { %1645 = vmatpush.msra.mxu1 %v3362_v62 }
0x16fe   :  { %v1086_v28 = vpop.permute.xlu2 %1085  ;;  %1646 = vmatpush.msra.mxu1 %v3367_v38 }
0x16ff   :  { %1088 = vst.msk [vmem:[#allocation2] sm:$0xc0] %vm476_vm12, %v1086_v28  ;;  %1434 = vmatmul.f32.vlgmr.msrb.gmra.mxu1 %v3002_v7 }
0x1700   :  { %1933 = vmatpush.msrb.mxu1 %v3357_v21 }
0x1702   :  { %1934 = vmatpush.msrb.mxu1 %v3360_v18 }
0x1704   :  { %1935 = vmatpush.msrb.mxu1 %v3362_v62 }
0x1706   :  { %v1379_v30 = vld [vmem:[#allocation2] sm:$0xff]  ;;  %1936 = vmatpush.msrb.mxu1 %v3367_v38 }
0x1707   :  { %2515 = vmatmul.msk.f32.vlgmr.msra.gmra.mxu0 %vm188_vm7, %v1379_v30 }
0x1774   :  { %v1179_v31 = vpop.f32.mrf.mxu1 }
0x1775   :  { %v1183_v32 = vrot.slane %v1179_v31, 6 }
0x1777   :  { %v1185_v33 = vadd.f32 %v1183_v32, %v3340_v49 }
0x1779   :  { %2671 = vtanh.f32 %v1185_v33  ;;  %v2510_v13 = vmul.f32 -1.442695, %v1185_v33 }
0x177c   :  { %v1435_v7 = vpop.f32.mrf.mxu1 }
0x177f   :  { %v2672_v34 = vpop.eup %2671 }
0x1780   :  { %1211 = vrot.lane.b32.xlu0 %v2672_v34, %s3003_s2 }
0x1784   :  { %v3396_v23 = vpop.f32.mrf.mxu0 }
0x1785   :  { %v1438_v26 = vadd.f32 %v1435_v7, %v3396_v23 }
0x1787   :  { %2673 = vtanh.f32 %v1438_v26  ;;  %v2517_v36 = vmul.f32 -1.442695, %v1438_v26 }
0x1788   :  { %2675 = vpow2.f32 %v2510_v13 }
0x178d   :  { %v2674_v27 = vpop.eup %2673 }
0x178e   :  { %1461 = vrot.lane.b32.xlu1 %v2674_v27, %s3003_s2  ;;  %v2676_v35 = vpop.eup %2675 }
0x178f   :  { %v1189_v29 = vadd.f32 1.0, %v2676_v35 }
0x1791   :  { %2677 = vrcp.f32 %v1189_v29  ;;  %v1201_v17 = vand.u32 2147483648, %v1189_v29  ;;  %vm1195_vm13 = vweird.f32 %v1189_v29  ;;  %v1199_v45 = vand.u32 2147483647, %v1189_v29 }
0x1792   :  { %2679 = vpow2.f32 %v2517_v36 }
0x1793   :  { %v1202_v48 = vor.u32 1.1754944e-38, %v1201_v17  ;;  %vm1200_vm15 = vcmp.eq.f32.partialorder %v1199_v45, 8.507059e+37 }
0x1797   :  { %v2678_v37 = vpop.eup %2677 }
0x1798   :  { %v2680_v39 = vpop.eup %2679  ;;  %v1191_v40 = vmul.f32 %v2678_v37, %v1189_v29  ;;  %vm1196_vm9 = vweird.f32 %v2678_v37 }
0x1799   :  { %v1442_v41 = vadd.f32 1.0, %v2680_v39  ;;  %vm1197_vm14 = vmor %vm1195_vm13, %vm1196_vm9 }
0x179a   :  { %v1192_v8 = vsub.f32 1.0, %v1191_v40 }
0x179b   :  { %2681 = vrcp.f32 %v1442_v41  ;;  %v1454_v55 = vand.u32 2147483648, %v1442_v41  ;;  %vm1448_vm2 = vweird.f32 %v1442_v41  ;;  %v1452_v57 = vand.u32 2147483647, %v1442_v41 }
0x179c   :  { %v1193_v42 = vmul.f32 %v2678_v37, %v1192_v8 }
0x179d   :  { %v1455_v60 = vor.u32 1.1754944e-38, %v1454_v55  ;;  %vm1453_vm4 = vcmp.eq.f32.partialorder %v1452_v57, 8.507059e+37 }
0x179e   :  { %v1194_v44 = vadd.f32 %v2678_v37, %v1193_v42 }
0x17a0   :  { %v1198_v47 = vsel %vm1197_vm14, %v2678_v37, %v1194_v44 }
0x17a1   :  { %v2682_v43 = vpop.eup %2681  ;;  %v1203_v52 = vsel %vm1200_vm15, %v1202_v48, %v1198_v47 }
0x17a2   :  { %v1444_v46 = vmul.f32 %v2682_v43, %v1442_v41  ;;  %vm1449_vm0 = vweird.f32 %v2682_v43  ;;  %v1209_v2 = vmul.f32 %v1207_v1, %v1203_v52 }
0x17a3   :  { %vm1450_vm3 = vmor %vm1448_vm2, %vm1449_vm0 }
0x17a4   :  { %v1445_v50 = vsub.f32 1.0, %v1444_v46 }
0x17a6   :  { %v1446_v53 = vmul.f32 %v2682_v43, %v1445_v50 }
0x17a8   :  { %v1447_v54 = vadd.f32 %v2682_v43, %v1446_v53 }
0x17aa   :  { %v1451_v58 = vsel %vm1450_vm3, %v2682_v43, %v1447_v54 }
0x17ab   :  { %v1456_v63 = vsel %vm1453_vm4, %v1455_v60, %v1451_v58 }
0x17ac   :  { %v1459_v6 = vmul.f32 0.0, %v1456_v63 }
0x17f2   :  { %v1212_v51 = vpop.permute.xlu0 %1211 }
0x17f3   :  { %v1214_v56 = vmul.f32 %v1212_v51, %v1203_v52 }
0x17f5   :  { %1216 = vrot.lane.b32.xlu2 %v1214_v56, %s3004_s14 }
0x1800   :  { %v1462_v61 = vpop.permute.xlu1 %1461 }
0x1801   :  { %v1464_v0 = vmul.f32 %v1462_v61, %v1456_v63 }
0x1803   :  { %1466 = vrot.lane.b32.xlu0 %v1464_v0, %s3004_s14 }
0x184f   :  { %v1217_v3 = vpop.permute.xlu2 %1216 }
0x1850   :  { %v3403_v4 = vadd.f32 %v1217_v3, %v1209_v2 }
0x1852   :  { %2683 = vtanh.f32 %v3403_v4  ;;  %v1281_v60 = vrot.slane %v3403_v4, 6 }
0x1858   :  { %v2684_v5 = vpop.eup %2683 }
0x1859   :  { %1222 = vrot.lane.b32.xlu1 %v2684_v5, %s3003_s2 }
0x1875   :  { %v1467_v9 = vpop.permute.xlu0 %1466 }
0x1876   :  { %v3407_v11 = vadd.f32 %v1467_v9, %v1459_v6 }
0x1878   :  { %2685 = vtanh.f32 %v3407_v11  ;;  %v1528_v2 = vrot.slane %v3407_v11, 6 }
0x187e   :  { %v2686_v14 = vpop.eup %2685 }
0x187f   :  { %1472 = vrot.lane.b32.xlu2 %v2686_v14, %s3003_s2 }
0x18cb   :  { %v1223_v15 = vpop.permute.xlu1 %1222 }
0x18cc   :  { %v3411_v12 = vmul.f32 %v1223_v15, %v1203_v52 }
0x18ce   :  { %v1231_v16 = vrot.slane %v3411_v12, 2 }
0x18d0   :  { %1232 = vrot.lane.b32.xlu0 %v1231_v16, %s3004_s14 }
0x18d9   :  { %v1473_v19 = vpop.permute.xlu2 %1472 }
0x18da   :  { %v1475_v22 = vmul.f32 %v1473_v19, %v1456_v63 }
0x18dc   :  { %1477 = vrot.lane.b32.xlu1 %v1475_v22, %s3004_s14 }
0x1942   :  { %v1233_v20 = vpop.permute.xlu0 %1232 }
0x1943   :  { %2511 = vmatmul.msk.f32.vlgmr.msra.gmra.mxu2 %vm188_vm7, %v1233_v20 }
0x1944   :  { %1717 = vmatpush.msra.mxu2 %v3357_v21 }
0x1946   :  { %1718 = vmatpush.msra.mxu2 %v3360_v18 }
0x1948   :  { %1719 = vmatpush.msra.mxu2 %v3362_v62 }
0x194a   :  { %1720 = vmatpush.msra.mxu2 %v3367_v38 }
0x194e   :  { %v1478_v59 = vpop.permute.xlu1 %1477 }
0x194f   :  { %1480 = vst.msk [vmem:[#allocation2] sm:$0x3] %vm254_vm6, %v1478_v59  ;;  %2518 = vmatmul.msk.f32.vlgmr.msrb.gmra.mxu2 %vm188_vm7, %v1478_v59 }
0x19c6   :  { %v1253_v24 = vpop.f32.mrf.mxu2 }
0x19c7   :  { %v1257_v25 = vrot.slane %v1253_v24, 4 }
0x19c9   :  { %v1259_v10 = vadd.f32 %v1257_v25, %v3340_v49 }
0x19cb   :  { %2687 = vtanh.f32 %v1259_v10  ;;  %v2512_v34 = vmul.f32 -1.442695, %v1259_v10 }
0x19d1   :  { %v2688_v28 = vpop.eup %2687 }
0x19d2   :  { %1285 = vrot.lane.b32.xlu2 %v2688_v28, %s3003_s2  ;;  %v1500_v30 = vpop.f32.mrf.mxu2 }
0x19d3   :  { %v1504_v31 = vrot.slane %v1500_v30, 6 }
0x19d5   :  { %v1506_v32 = vadd.f32 %v1504_v31, %v3396_v23 }
0x19d7   :  { %2689 = vtanh.f32 %v1506_v32  ;;  %v2519_v36 = vmul.f32 -1.442695, %v1506_v32 }
0x19d8   :  { %2691 = vpow2.f32 %v2512_v34 }
0x19dd   :  { %v2690_v33 = vpop.eup %2689 }
0x19de   :  { %1532 = vrot.lane.b32.xlu0 %v2690_v33, %s3003_s2  ;;  %v2692_v7 = vpop.eup %2691 }
0x19df   :  { %v1263_v26 = vadd.f32 1.0, %v2692_v7 }
0x19e1   :  { %2693 = vrcp.f32 %v1263_v26  ;;  %v1275_v39 = vand.u32 2147483648, %v1263_v26  ;;  %vm1269_vm5 = vweird.f32 %v1263_v26  ;;  %v1273_v40 = vand.u32 2147483647, %v1263_v26 }
0x19e2   :  { %2695 = vpow2.f32 %v2519_v36 }
0x19e3   :  { %v1276_v8 = vor.u32 1.1754944e-38, %v1275_v39  ;;  %vm1274_vm9 = vcmp.eq.f32.partialorder %v1273_v40, 8.507059e+37 }
0x19e7   :  { %v2694_v27 = vpop.eup %2693 }
0x19e8   :  { %v1265_v13 = vmul.f32 %v2694_v27, %v1263_v26  ;;  %vm1270_vm1 = vweird.f32 %v2694_v27  ;;  %v2696_v44 = vpop.eup %2695 }
0x19e9   :  { %vm1271_vm8 = vmor %vm1269_vm5, %vm1270_vm1  ;;  %v1510_v45 = vadd.f32 1.0, %v2696_v44 }
0x19ea   :  { %v1266_v35 = vsub.f32 1.0, %v1265_v13 }
0x19eb   :  { %2697 = vrcp.f32 %v1510_v45  ;;  %v1522_v52 = vand.u32 2147483648, %v1510_v45  ;;  %vm1516_vm14 = vweird.f32 %v1510_v45  ;;  %v1520_v56 = vand.u32 2147483647, %v1510_v45 }
0x19ec   :  { %v1267_v29 = vmul.f32 %v2694_v27, %v1266_v35 }
0x19ed   :  { %v1523_v54 = vor.u32 1.1754944e-38, %v1522_v52  ;;  %vm1521_vm0 = vcmp.eq.f32.partialorder %v1520_v56, 8.507059e+37 }
0x19ee   :  { %v1268_v37 = vadd.f32 %v2694_v27, %v1267_v29 }
0x19f0   :  { %v1272_v41 = vsel %vm1271_vm8, %v2694_v27, %v1268_v37 }
0x19f1   :  { %v1277_v42 = vsel %vm1274_vm9, %v1276_v8, %v1272_v41  ;;  %v2698_v46 = vpop.eup %2697 }
0x19f2   :  { %v1512_v47 = vmul.f32 %v2698_v46, %v1510_v45  ;;  %vm1517_vm13 = vweird.f32 %v2698_v46  ;;  %v1283_v61 = vmul.f32 %v1281_v60, %v1277_v42 }
0x19f3   :  { %vm1518_vm15 = vmor %vm1516_vm14, %vm1517_vm13 }
0x19f4   :  { %v1513_v48 = vsub.f32 1.0, %v1512_v47 }
0x19f6   :  { %v1514_v50 = vmul.f32 %v2698_v46, %v1513_v48 }
0x19f8   :  { %v1515_v51 = vadd.f32 %v2698_v46, %v1514_v50 }
0x19fa   :  { %v1519_v53 = vsel %vm1518_vm15, %v2698_v46, %v1515_v51 }
0x19fb   :  { %v1524_v57 = vsel %vm1521_vm0, %v1523_v54, %v1519_v53 }
0x19fc   :  { %v1530_v3 = vmul.f32 %v1528_v2, %v1524_v57 }
0x1a2c   :  { %v1286_v43 = vpop.permute.xlu2 %1285 }
0x1a2d   :  { %v1288_v17 = vmul.f32 %v1286_v43, %v1277_v42 }
0x1a2f   :  { %1290 = vrot.lane.b32.xlu1 %v1288_v17, %s3004_s14 }
0x1a50   :  { %v1533_v55 = vpop.permute.xlu0 %1532 }
0x1a51   :  { %v1535_v58 = vmul.f32 %v1533_v55, %v1524_v57 }
0x1a53   :  { %1537 = vrot.lane.b32.xlu2 %v1535_v58, %s3004_s14 }
0x1aa1   :  { %v1291_v63 = vpop.permute.xlu1 %1290 }
0x1aa2   :  { %v3430_v0 = vadd.f32 %v1291_v63, %v1283_v61 }
0x1aa4   :  { %2699 = vtanh.f32 %v3430_v0 }
0x1aaa   :  { %v2700_v1 = vpop.eup %2699 }
0x1aab   :  { %1296 = vrot.lane.b32.xlu0 %v2700_v1, %s3003_s2 }
0x1aad   :  { %v1538_v5 = vpop.permute.xlu2 %1537 }
0x1aae   :  { %v1540_v6 = vadd.f32 %v1538_v5, %v1530_v3  ;;  %v1355_v5 = vrot.slane %v3430_v0, 6 }
0x1ab0   :  { %2701 = vtanh.f32 %v1540_v6  ;;  %v1602_v40 = vrot.slane %v1540_v6, 6 }
0x1ab6   :  { %v2702_v9 = vpop.eup %2701 }
0x1ab7   :  { %1543 = vrot.lane.b32.xlu1 %v2702_v9, %s3003_s2 }
0x1b1d   :  { %v1297_v14 = vpop.permute.xlu0 %1296 }
0x1b1e   :  { %v3436_v4 = vmul.f32 %v1297_v14, %v1277_v42 }
0x1b20   :  { %v1305_v15 = vrot.slane %v3436_v4, 4 }
0x1b22   :  { %1306 = vrot.lane.b32.xlu2 %v1305_v15, %s3004_s14 }
0x1b29   :  { %v1544_v16 = vpop.permute.xlu1 %1543 }
0x1b2a   :  { %v3440_v19 = vmul.f32 %v1544_v16, %v1524_v57 }
0x1b2c   :  { %v1552_v11 = vrot.slane %v3440_v19, 2 }
0x1b2e   :  { %1553 = vrot.lane.b32.xlu0 %v1552_v11, %s3004_s14 }
0x1b7c   :  { %v1307_v22 = vpop.permute.xlu2 %1306 }
0x1b7d   :  { %2513 = vmatmul.msk.f32.vlgmr.msrb.gmra.mxu3 %vm188_vm7, %v1307_v22 }
0x1b7e   :  { %1785 = vmatpush.msrb.mxu3 %v3357_v21 }
0x1b80   :  { %1786 = vmatpush.msrb.mxu3 %v3360_v18 }
0x1b82   :  { %1787 = vmatpush.msrb.mxu3 %v3362_v62 }
0x1b84   :  { %1788 = vmatpush.msrb.mxu3 %v3367_v38 }
0x1ba0   :  { %v1554_v20 = vpop.permute.xlu0 %1553 }
0x1ba1   :  { %2520 = vmatmul.msk.f32.vlgmr.msra.gmra.mxu3 %vm188_vm7, %v1554_v20 }
0x1c00   :  { %v1327_v59 = vpop.f32.mrf.mxu3 }
0x1c01   :  { %v1331_v26 = vrot.slane %v1327_v59, 2 }
0x1c03   :  { %v1333_v35 = vadd.f32 %v1331_v26, %v3340_v49 }
0x1c05   :  { %v2514_v49 = vmul.f32 -1.442695, %v1333_v35 }
0x1c24   :  { %v1574_v24 = vpop.f32.mrf.mxu3 }
0x1c25   :  { %v1578_v25 = vrot.slane %v1574_v24, 4 }
0x1c27   :  { %v1580_v10 = vadd.f32 %v1578_v25, %v3396_v23 }
0x1c29   :  { %2703 = vtanh.f32 %v1580_v10  ;;  %v2521_v30 = vmul.f32 -1.442695, %v1580_v10 }
0x1c2b   :  { %2705 = vpow2.f32 %v2521_v30 }
0x1c2f   :  { %v2704_v28 = vpop.eup %2703 }
0x1c30   :  { %1606 = vrot.lane.b32.xlu1 %v2704_v28, %s3003_s2 }
0x1c31   :  { %v2706_v21 = vpop.eup %2705 }
0x1c32   :  { %v1584_v18 = vadd.f32 1.0, %v2706_v21 }
0x1c34   :  { %2707 = vrcp.f32 %v1584_v18  ;;  %v1596_v34 = vand.u32 2147483648, %v1584_v18  ;;  %vm1590_vm3 = vweird.f32 %v1584_v18  ;;  %v1594_v7 = vand.u32 2147483647, %v1584_v18 }
0x1c35   :  { %2709 = vtanh.f32 %v1333_v35 }
0x1c36   :  { %v1597_v13 = vor.u32 1.1754944e-38, %v1596_v34  ;;  %vm1595_vm1 = vcmp.eq.f32.partialorder %v1594_v7, 8.507059e+37 }
0x1c3a   :  { %v2708_v62 = vpop.eup %2707 }
0x1c3b   :  { %v1586_v31 = vmul.f32 %v2708_v62, %v1584_v18  ;;  %vm1591_vm2 = vweird.f32 %v2708_v62  ;;  %v2710_v39 = vpop.eup %2709 }
0x1c3c   :  { %vm1592_vm4 = vmor %vm1590_vm3, %vm1591_vm2 }
0x1c3d   :  { %v1587_v38 = vsub.f32 1.0, %v1586_v31 }
0x1c3f   :  { %v1588_v32 = vmul.f32 %v2708_v62, %v1587_v38 }
0x1c41   :  { %v1589_v33 = vadd.f32 %v2708_v62, %v1588_v32 }
0x1c43   :  { %v1593_v27 = vsel %vm1592_vm4, %v2708_v62, %v1589_v33 }
0x1c44   :  { %v1598_v36 = vsel %vm1595_vm1, %v1597_v13, %v1593_v27 }
0x1c45   :  { %v1604_v41 = vmul.f32 %v1602_v40, %v1598_v36 }
0x1ca2   :  { %v1607_v29 = vpop.permute.xlu1 %1606 }
0x1ca3   :  { %v1609_v37 = vmul.f32 %v1607_v29, %v1598_v36 }
0x1ca5   :  { %1611 = vrot.lane.b32.xlu2 %v1609_v37, %s3004_s14 }
0x1cad   :  { %1359 = vrot.lane.b32.xlu2 %v2710_v39, %s3003_s2 }
0x1cff   :  { %v1612_v8 = vpop.permute.xlu2 %1611 }
0x1d00   :  { %v3455_v42 = vadd.f32 %v1612_v8, %v1604_v41 }
0x1d02   :  { %2711 = vtanh.f32 %v3455_v42  ;;  %v1676_v32 = vrot.slane %v3455_v42, 6 }
0x1d03   :  { %2713 = vpow2.f32 %v2514_v49 }
0x1d07   :  { %v1360_v57 = vpop.permute.xlu2 %1359 }
0x1d08   :  { %v2712_v43 = vpop.eup %2711 }
0x1d09   :  { %1617 = vrot.lane.b32.xlu0 %v2712_v43, %s3003_s2  ;;  %v2714_v44 = vpop.eup %2713 }
0x1d0a   :  { %v1337_v17 = vadd.f32 1.0, %v2714_v44 }
0x1d0c   :  { %2715 = vrcp.f32 %v1337_v17  ;;  %v1349_v53 = vand.u32 2147483648, %v1337_v17  ;;  %vm1343_vm8 = vweird.f32 %v1337_v17  ;;  %v1347_v54 = vand.u32 2147483647, %v1337_v17 }
0x1d0e   :  { %v1350_v58 = vor.u32 1.1754944e-38, %v1349_v53  ;;  %vm1348_vm13 = vcmp.eq.f32.partialorder %v1347_v54, 8.507059e+37 }
0x1d12   :  { %v2716_v45 = vpop.eup %2715 }
0x1d13   :  { %v1339_v46 = vmul.f32 %v2716_v45, %v1337_v17  ;;  %vm1344_vm5 = vweird.f32 %v2716_v45 }
0x1d14   :  { %vm1345_vm9 = vmor %vm1343_vm8, %vm1344_vm5 }
0x1d15   :  { %v1340_v47 = vsub.f32 1.0, %v1339_v46 }
0x1d17   :  { %v1341_v48 = vmul.f32 %v2716_v45, %v1340_v47 }
0x1d19   :  { %v1342_v52 = vadd.f32 %v2716_v45, %v1341_v48 }
0x1d1b   :  { %v1346_v55 = vsel %vm1345_vm9, %v2716_v45, %v1342_v52 }
0x1d1c   :  { %v1351_v60 = vsel %vm1348_vm13, %v1350_v58, %v1346_v55 }
0x1d1d   :  { %v1362_v61 = vmul.f32 %v1360_v57, %v1351_v60  ;;  %v1357_v9 = vmul.f32 %v1355_v5, %v1351_v60 }
0x1d7b   :  { %v1618_v50 = vpop.permute.xlu0 %1617 }
0x1d7c   :  { %v3459_v51 = vmul.f32 %v1618_v50, %v1598_v36 }
0x1d7e   :  { %v1626_v56 = vrot.slane %v3459_v51, 4 }
0x1d80   :  { %1627 = vrot.lane.b32.xlu1 %v1626_v56, %s3004_s14 }
0x1d88   :  { %1364 = vrot.lane.b32.xlu1 %v1362_v61, %s3004_s14 }
0x1df2   :  { %v1628_v63 = vpop.permute.xlu1 %1627 }
0x1df3   :  { %2522 = vmatmul.msk.f32.vlgmr.msra.gmra.mxu1 %vm188_vm7, %v1628_v63 }
0x1dfa   :  { %v1365_v6 = vpop.permute.xlu1 %1364 }
0x1dfb   :  { %v1367_v14 = vadd.f32 %v1365_v6, %v1357_v9 }
0x1e70   :  { %v1648_v1 = vpop.f32.mrf.mxu1 }
0x1e71   :  { %v1652_v2 = vrot.slane %v1648_v1, 2 }
0x1e73   :  { %v1654_v3 = vadd.f32 %v1652_v2, %v3396_v23 }
0x1e75   :  { %2717 = vtanh.f32 %v1654_v3  ;;  %v2523_v11 = vmul.f32 -1.442695, %v1654_v3 }
0x1e76   :  { %2719 = vtanh.f32 %v1367_v14 }
0x1e77   :  { %2721 = vpow2.f32 %v2523_v11 }
0x1e7b   :  { %v2718_v15 = vpop.eup %2717 }
0x1e7c   :  { %1680 = vrot.lane.b32.xlu0 %v2718_v15, %s3003_s2  ;;  %v2720_v16 = vpop.eup %2719 }
0x1e7d   :  { %v2722_v22 = vpop.eup %2721 }
0x1e7e   :  { %v1658_v23 = vadd.f32 1.0, %v2722_v22 }
0x1e80   :  { %2723 = vrcp.f32 %v1658_v23  ;;  %v1670_v10 = vand.u32 2147483648, %v1658_v23  ;;  %vm1664_vm15 = vweird.f32 %v1658_v23  ;;  %v1668_v28 = vand.u32 2147483647, %v1658_v23 }
0x1e82   :  { %v1671_v21 = vor.u32 1.1754944e-38, %v1670_v10  ;;  %vm1669_vm2 = vcmp.eq.f32.partialorder %v1668_v28, 8.507059e+37 }
0x1e84   :  { %1370 = vrot.lane.b32.xlu0 %v2720_v16, %s3003_s2 }
0x1e86   :  { %v2724_v0 = vpop.eup %2723 }
0x1e87   :  { %v1660_v20 = vmul.f32 %v2724_v0, %v1658_v23  ;;  %vm1665_vm14 = vweird.f32 %v2724_v0  ;;  %v1995_v23 = vld [vmem:[%s3622_s7 + $0x18] sm:$0xff] }
0x1e88   :  { %vm1666_vm0 = vmor %vm1664_vm15, %vm1665_vm14  ;;  %2014 = vmatpush.msrb.mxu2 %v1995_v23 }
0x1e89   :  { %v1661_v59 = vsub.f32 1.0, %v1660_v20 }
0x1e8b   :  { %v1662_v24 = vmul.f32 %v2724_v0, %v1661_v59  ;;  %v1993_v59 = vld [vmem:[%s3622_s7 + $0x8] sm:$0xff] }
0x1e8c   :  { %1301 = vrot.lane.b32.xlu0 %v3436_v4, %s3004_s14 }
0x1e8d   :  { %v1663_v25 = vadd.f32 %v2724_v0, %v1662_v24 }
0x1e8f   :  { %v1667_v30 = vsel %vm1666_vm0, %v2724_v0, %v1663_v25  ;;  %v1994_v0 = vld [vmem:[%s3622_s7 + $0x10] sm:$0xff]  ;;  %v1992_v25 = vld [vmem:[%s3622_s7] sm:$0xff] }
0x1e90   :  { %v1672_v4 = vsel %vm1669_vm2, %v1671_v21, %v1667_v30  ;;  %2015 = vmatpush.msrb.mxu2 %v1994_v0 }
0x1e91   :  { %v1678_v33 = vmul.f32 %v1676_v32, %v1672_v4 }
0x1e92   :  { %2016 = vmatpush.msrb.mxu2 %v1993_v59 }
0x1e94   :  { %2017 = vmatpush.msrb.mxu2 %v1992_v25 }
0x1eee   :  { %v1681_v18 = vpop.permute.xlu0 %1680 }
0x1eef   :  { %v1683_v62 = vmul.f32 %v1681_v18, %v1672_v4 }
0x1ef1   :  { %1685 = vrot.lane.b32.xlu2 %v1683_v62, %s3004_s14 }
0x1ef6   :  { %v1371_v31 = vpop.permute.xlu0 %1370 }
0x1ef7   :  { %v1373_v13 = vmul.f32 %v1371_v31, %v1351_v60 }
0x1ef9   :  { %1227 = vrot.lane.b32.xlu2 %v3411_v12, %s3004_s14 }
0x1efe   :  { %v1302_v38 = vpop.permute.xlu0 %1301 }
0x1eff   :  { %1304 = vst.msk [vmem:[#allocation2 + $0x8] sm:$0x30] %vm401_vm11, %v1302_v38 }
0x1f4b   :  { %v1686_v34 = vpop.permute.xlu2 %1685 }
0x1f4c   :  { %v1688_v7 = vadd.f32 %v1686_v34, %v1678_v33 }
0x1f4e   :  { %2725 = vtanh.f32 %v1688_v7  ;;  %v1747_v58 = vrot.slane %v1688_v7, 6 }
0x1f53   :  { %v1228_v26 = vpop.permute.xlu2 %1227 }
0x1f54   :  { %v2726_v27 = vpop.eup %2725  ;;  %1230 = vst.msk [vmem:[#allocation2 + $0x8] sm:$0xc] %vm326_vm10, %v1228_v26 }
0x1f55   :  { %1691 = vrot.lane.b32.xlu1 %v2726_v27, %s3003_s2 }
0x1f5d   :  { %1375 = vrot.lane.b32.xlu1 %v1373_v13, %s3004_s14 }
0x1fc7   :  { %v1692_v35 = vpop.permute.xlu1 %1691 }
0x1fc8   :  { %v1694_v12 = vmul.f32 %v1692_v35, %v1672_v4 }
0x1fca   :  { %v1700_v29 = vrot.slane %v1694_v12, 6 }
0x1fcc   :  { %1701 = vrot.lane.b32.xlu2 %v1700_v29, %s3004_s14 }
0x1fcf   :  { %v1376_v36 = vpop.permute.xlu1 %1375 }
0x1fd0   :  { %1378 = vst.msk [vmem:[#allocation2 + $0x8] sm:$0xc0] %vm476_vm12, %v1376_v36 }
0x1fd7   :  { %v1380_v37 = vld [vmem:[#allocation2 + $0x8] sm:$0xff] }
0x1fd8   :  { %2516 = vmatmul.msk.f32.gmra.mxu0 %vm188_vm7, %v1380_v37 }
0x2026   :  { %v1702_v39 = vpop.permute.xlu2 %1701 }
0x2027   :  { %2524 = vmatmul.msk.f32.vlgmr.msra.gmra.mxu2 %vm188_vm7, %v1702_v39 }
0x2055   :  { %v3483_v40 = vpop.f32.mrf.mxu0 }
0x20aa   :  { %v1722_v41 = vpop.f32.mrf.mxu2 }
0x20ab   :  { %v1725_v8 = vadd.f32 %v1722_v41, %v3483_v40 }
0x20ad   :  { %2727 = vtanh.f32 %v1725_v8  ;;  %v2525_v43 = vmul.f32 -1.442695, %v1725_v8 }
0x20af   :  { %2729 = vpow2.f32 %v2525_v43 }
0x20b3   :  { %v2728_v42 = vpop.eup %2727 }
0x20b4   :  { %1751 = vrot.lane.b32.xlu0 %v2728_v42, %s3003_s2 }
0x20b5   :  { %v2730_v49 = vpop.eup %2729 }
0x20b6   :  { %v1729_v44 = vadd.f32 1.0, %v2730_v49 }
0x20b8   :  { %2731 = vrcp.f32 %v1729_v44  ;;  %v1741_v50 = vand.u32 2147483648, %v1729_v44  ;;  %vm1735_vm4 = vweird.f32 %v1729_v44  ;;  %v1739_v52 = vand.u32 2147483647, %v1729_v44 }
0x20ba   :  { %v1742_v53 = vor.u32 1.1754944e-38, %v1741_v50  ;;  %vm1740_vm5 = vcmp.eq.f32.partialorder %v1739_v52, 8.507059e+37 }
0x20be   :  { %v2732_v17 = vpop.eup %2731 }
0x20bf   :  { %v1731_v45 = vmul.f32 %v2732_v17, %v1729_v44  ;;  %vm1736_vm3 = vweird.f32 %v2732_v17 }
0x20c0   :  { %vm1737_vm1 = vmor %vm1735_vm4, %vm1736_vm3 }
0x20c1   :  { %v1732_v46 = vsub.f32 1.0, %v1731_v45 }
0x20c3   :  { %v1733_v47 = vmul.f32 %v2732_v17, %v1732_v46 }
0x20c5   :  { %v1734_v48 = vadd.f32 %v2732_v17, %v1733_v47 }
0x20c7   :  { %v1738_v56 = vsel %vm1737_vm1, %v2732_v17, %v1734_v48 }
0x20c8   :  { %v1743_v55 = vsel %vm1740_vm5, %v1742_v53, %v1738_v56 }
0x20c9   :  { %v1749_v60 = vmul.f32 %v1747_v58, %v1743_v55 }
0x2126   :  { %v1752_v54 = vpop.permute.xlu0 %1751 }
0x2127   :  { %v1754_v57 = vmul.f32 %v1752_v54, %v1743_v55 }
0x2129   :  { %1756 = vrot.lane.b32.xlu1 %v1754_v57, %s3004_s14 }
0x219b   :  { %v1757_v61 = vpop.permute.xlu1 %1756 }
0x219c   :  { %v1759_v63 = vadd.f32 %v1757_v61, %v1749_v60 }
0x219e   :  { %2733 = vtanh.f32 %v1759_v63  ;;  %v1818_v7 = vrot.slane %v1759_v63, 6 }
0x21a4   :  { %v2734_v1 = vpop.eup %2733 }
0x21a5   :  { %1762 = vrot.lane.b32.xlu2 %v2734_v1, %s3003_s2 }
0x21ad   :  { %1548 = vrot.lane.b32.xlu2 %v3440_v19, %s3004_s14 }
0x21ff   :  { %v1763_v2 = vpop.permute.xlu2 %1762 }
0x2200   :  { %v1765_v3 = vmul.f32 %v1763_v2, %v1743_v55  ;;  %v3008_v2 = vmov 3  }
0x2201   :  { %2563 = vset.pattern.permute.xlu0 %v3008_v2  ;;  %2564 = vset.pattern.permute.xlu2 %v3008_v2 }
0x2202   :  { %1767 = vrot.lane.b32.xlu0 %v1765_v3, %s3004_s14  ;;  %2565 = vset.pattern.permute.xlu1 %v3008_v2 }
0x2207   :  { %v1549_v5 = vpop.permute.xlu2 %1548 }
0x2208   :  { %1551 = vst.msk [vmem:[#allocation2] sm:$0xc] %vm326_vm10, %v1549_v5 }
0x220a   :  { %1622 = vrot.lane.b32.xlu0 %v3459_v51, %s3004_s14 }
0x2274   :  { %v1768_v6 = vpop.permute.xlu0 %1767 }
0x2275   :  { %1770 = vst.msk [vmem:[#allocation2 + $0x8] sm:$0x3] %vm254_vm6, %v1768_v6  ;;  %2526 = vmatmul.msk.f32.vlgmr.msrb.gmra.mxu3 %vm188_vm7, %v1768_v6 }
0x227c   :  { %v1623_v9 = vpop.permute.xlu0 %1622 }
0x227d   :  { %1625 = vst.msk [vmem:[#allocation2] sm:$0x30] %vm401_vm11, %v1623_v9 }
0x22f8   :  { %v1790_v14 = vpop.f32.mrf.mxu3 }
0x22f9   :  { %v1794_v19 = vrot.slane %v1790_v14, 6 }
0x22fb   :  { %v1796_v15 = vadd.f32 %v1794_v19, %v3483_v40 }
0x22fd   :  { %2735 = vtanh.f32 %v1796_v15  ;;  %v2527_v11 = vmul.f32 -1.442695, %v1796_v15 }
0x22ff   :  { %2737 = vpow2.f32 %v2527_v11 }
0x2303   :  { %v2736_v16 = vpop.eup %2735 }
0x2304   :  { %1822 = vrot.lane.b32.xlu1 %v2736_v16, %s3003_s2 }
0x2305   :  { %v2738_v51 = vpop.eup %2737 }
0x2306   :  { %v1800_v22 = vadd.f32 1.0, %v2738_v51 }
0x2308   :  { %2739 = vrcp.f32 %v1800_v22  ;;  %v1812_v21 = vand.u32 2147483648, %v1800_v22  ;;  %vm1806_vm8 = vweird.f32 %v1800_v22  ;;  %v1810_v18 = vand.u32 2147483647, %v1800_v22 }
0x230a   :  { %v1813_v62 = vor.u32 1.1754944e-38, %v1812_v21  ;;  %vm1811_vm13 = vcmp.eq.f32.partialorder %v1810_v18, 8.507059e+37 }
0x230c   :  { %1696 = vrot.lane.b32.xlu1 %v1694_v12, %s3004_s14  ;;  %v3523_v12 = vld [vmem:[%s3623_s8] ss:$0 sm:$0xff]  ;;  %s3006_s8 = smov 1  }
0x230d   :  { %v2029_v29 = vmul.f32 0.0, %v3523_v12 }
0x230e   :  { %v2740_v20 = vpop.eup %2739 }
0x230f   :  { %v1802_v24 = vmul.f32 %v2740_v20, %v1800_v22  ;;  %vm1807_vm6 = vweird.f32 %v2740_v20 }
0x2310   :  { %vm1808_vm9 = vmor %vm1806_vm8, %vm1807_vm6 }
0x2311   :  { %v1803_v10 = vsub.f32 1.0, %v1802_v24 }
0x2313   :  { %v1804_v28 = vmul.f32 %v2740_v20, %v1803_v10 }
0x2315   :  { %v1805_v30 = vadd.f32 %v2740_v20, %v1804_v28 }
0x2317   :  { %v1809_v4 = vsel %vm1808_vm9, %v2740_v20, %v1805_v30 }
0x2318   :  { %v1814_v38 = vsel %vm1811_vm13, %v1813_v62, %v1809_v4 }
0x2319   :  { %v1820_v26 = vmul.f32 %v1818_v7, %v1814_v38 }
0x2376   :  { %v1823_v31 = vpop.permute.xlu1 %1822 }
0x2377   :  { %v1825_v32 = vmul.f32 %v1823_v31, %v1814_v38 }
0x2379   :  { %1827 = vrot.lane.b32.xlu2 %v1825_v32, %s3004_s14 }
0x237e   :  { %v1697_v33 = vpop.permute.xlu1 %1696 }
0x237f   :  { %1699 = vst.msk [vmem:[#allocation2] sm:$0xc0] %vm476_vm12, %v1697_v33 }
0x2386   :  { %v1990_v34 = vld [vmem:[#allocation2] sm:$0xff] }
0x2387   :  { %2532 = vmatmul.msk.f32.vlgmr.msrb.gmra.mxu2 %vm188_vm7, %v1990_v34 }
0x23d3   :  { %v1828_v27 = vpop.permute.xlu2 %1827 }
0x23d4   :  { %v3516_v13 = vadd.f32 %v1828_v27, %v1820_v26 }
0x23d6   :  { %2741 = vtanh.f32 %v3516_v13  ;;  %v1892_v34 = vrot.slane %v3516_v13, 6 }
0x23dc   :  { %v2742_v35 = vpop.eup %2741 }
0x23dd   :  { %1833 = vrot.lane.b32.xlu0 %v2742_v35, %s3003_s2 }
0x240a   :  { %v3526_v36 = vpop.f32.mrf.mxu2 }
0x240b   :  { %v2030_v37 = vadd.f32 %v2029_v29, %v3526_v36 }
0x240d   :  { %2743 = vtanh.f32 %v2030_v37  ;;  %v2534_v41 = vmul.f32 -1.442695, %v2030_v37 }
0x240f   :  { %2745 = vpow2.f32 %v2534_v41 }
0x2413   :  { %v2744_v39 = vpop.eup %2743 }
0x2414   :  { %2053 = vrot.lane.b32.xlu2 %v2744_v39, %s3005_s22 }
0x2415   :  { %v2746_v8 = vpop.eup %2745 }
0x2416   :  { %v2034_v42 = vadd.f32 1.0, %v2746_v8 }
0x2418   :  { %2747 = vrcp.f32 %v2034_v42  ;;  %v2046_v50 = vand.u32 2147483648, %v2034_v42  ;;  %vm2040_vm15 = vweird.f32 %v2034_v42  ;;  %v2044_v52 = vand.u32 2147483647, %v2034_v42 }
0x241a   :  { %v2047_v53 = vor.u32 1.1754944e-38, %v2046_v50  ;;  %vm2045_vm2 = vcmp.eq.f32.partialorder %v2044_v52, 8.507059e+37 }
0x241e   :  { %v2748_v17 = vpop.eup %2747 }
0x241f   :  { %v2036_v45 = vmul.f32 %v2748_v17, %v2034_v42  ;;  %vm2041_vm14 = vweird.f32 %v2748_v17 }
0x2420   :  { %vm2042_vm0 = vmor %vm2040_vm15, %vm2041_vm14 }
0x2421   :  { %v2037_v46 = vsub.f32 1.0, %v2036_v45 }
0x2423   :  { %v2038_v47 = vmul.f32 %v2748_v17, %v2037_v46 }
0x2425   :  { %v2039_v48 = vadd.f32 %v2748_v17, %v2038_v47 }
0x2427   :  { %v2043_v56 = vsel %vm2042_vm0, %v2748_v17, %v2039_v48 }
0x2428   :  { %v2048_v54 = vsel %vm2045_vm2, %v2047_v53, %v2043_v56 }
0x2429   :  { %v2051_v60 = vmul.f32 0.0, %v2048_v54 }
0x244f   :  { %v1834_v43 = vpop.permute.xlu0 %1833 }
0x2450   :  { %v3530_v49 = vmul.f32 %v1834_v43, %v1814_v38 }
0x2452   :  { %v1842_v44 = vrot.slane %v3530_v49, 2 }
0x2454   :  { %1843 = vrot.lane.b32.xlu1 %v1842_v44, %s3004_s14 }
0x246e   :  { %v2054_v55 = vpop.permute.xlu2 %2053 }
0x246f   :  { %v2056_v57 = vmul.f32 %v2054_v55, %v2048_v54 }
0x2471   :  { %2058 = vrot.lane.b32.xlu0 %v2056_v57, %s3006_s8 }
0x24c6   :  { %v1844_v58 = vpop.permute.xlu1 %1843 }
0x24c7   :  { %2528 = vmatmul.msk.f32.vlgmr.msrb.gmra.mxu0 %vm188_vm7, %v1844_v58 }
0x24e3   :  { %v2059_v61 = vpop.permute.xlu0 %2058 }
0x24e4   :  { %v3536_v63 = vadd.f32 %v2059_v61, %v2051_v60 }
0x24e6   :  { %2749 = vtanh.f32 %v3536_v63  ;;  %v2099_v48 = vrot.slane %v3536_v63, 6 }
0x24ec   :  { %v2750_v1 = vpop.eup %2749 }
0x24ed   :  { %2064 = vrot.lane.b32.xlu1 %v2750_v1, %s3007_s23 }
0x2544   :  { %v1864_v3 = vpop.f32.mrf.mxu0 }
0x2545   :  { %v1868_v5 = vrot.slane %v1864_v3, 4 }
0x2547   :  { %v1870_v6 = vadd.f32 %v1868_v5, %v3483_v40 }
0x2549   :  { %2751 = vtanh.f32 %v1870_v6  ;;  %v2529_v15 = vmul.f32 -1.442695, %v1870_v6 }
0x254b   :  { %2753 = vpow2.f32 %v2529_v15 }
0x254f   :  { %v2752_v9 = vpop.eup %2751 }
0x2550   :  { %1896 = vrot.lane.b32.xlu2 %v2752_v9, %s3003_s2 }
0x2551   :  { %v2754_v16 = vpop.eup %2753 }
0x2552   :  { %v1874_v11 = vadd.f32 1.0, %v2754_v16 }
0x2554   :  { %2755 = vrcp.f32 %v1874_v11  ;;  %v1886_v59 = vand.u32 2147483648, %v1874_v11  ;;  %vm1880_vm4 = vweird.f32 %v1874_v11  ;;  %v1884_v24 = vand.u32 2147483647, %v1874_v11 }
0x2556   :  { %v1887_v10 = vor.u32 1.1754944e-38, %v1886_v59  ;;  %vm1885_vm5 = vcmp.eq.f32.partialorder %v1884_v24, 8.507059e+37 }
0x255a   :  { %v2756_v51 = vpop.eup %2755 }
0x255b   :  { %v1876_v22 = vmul.f32 %v2756_v51, %v1874_v11  ;;  %vm1881_vm3 = vweird.f32 %v2756_v51 }
0x255c   :  { %vm1882_vm1 = vmor %vm1880_vm4, %vm1881_vm3 }
0x255d   :  { %v1877_v23 = vsub.f32 1.0, %v1876_v22 }
0x255f   :  { %v2065_v14 = vpop.permute.xlu1 %2064  ;;  %v1878_v0 = vmul.f32 %v2756_v51, %v1877_v23 }
0x2560   :  { %v2067_v19 = vmul.f32 %v2065_v14, %v2048_v54 }
0x2561   :  { %v1879_v20 = vadd.f32 %v2756_v51, %v1878_v0 }
0x2562   :  { %2070 = vperm.xlu0 %2563, %v2067_v19  }
0x2563   :  { %v1883_v25 = vsel %vm1882_vm1, %v2756_v51, %v1879_v20 }
0x2564   :  { %v1888_v28 = vsel %vm1885_vm5, %v1887_v10, %v1883_v25 }
0x2565   :  { %v1894_v26 = vmul.f32 %v1892_v34, %v1888_v28 }
0x25aa   :  { %v1897_v30 = vpop.permute.xlu2 %1896 }
0x25ab   :  { %v1899_v21 = vmul.f32 %v1897_v30, %v1888_v28 }
0x25ad   :  { %1901 = vrot.lane.b32.xlu1 %v1899_v21, %s3004_s14 }
0x25d4   :  { %v2071_v18 = vpop.permute.xlu0 %2070 }
0x25d5   :  { %v2073_v4 = vmul.f32 %v3523_v12, %v2071_v18 }
0x25d7   :  { %v2075_v62 = vrot.slane %v2073_v4, 6 }
0x25d9   :  { %v2077_v31 = vadd.f32 %v2075_v62, %v3526_v36 }
0x25db   :  { %2757 = vtanh.f32 %v2077_v31  ;;  %v2535_v32 = vmul.f32 -1.442695, %v2077_v31 }
0x25dd   :  { %2759 = vpow2.f32 %v2535_v32 }
0x25e1   :  { %v2758_v38 = vpop.eup %2757 }
0x25e2   :  { %2103 = vrot.lane.b32.xlu2 %v2758_v38, %s3005_s22 }
0x25e3   :  { %v2760_v33 = vpop.eup %2759 }
0x25e4   :  { %v2081_v7 = vadd.f32 1.0, %v2760_v33 }
0x25e6   :  { %2761 = vrcp.f32 %v2081_v7  ;;  %v2093_v43 = vand.u32 2147483648, %v2081_v7  ;;  %vm2087_vm8 = vweird.f32 %v2081_v7  ;;  %v2091_v13 = vand.u32 2147483647, %v2081_v7 }
0x25e8   :  { %v2094_v17 = vor.u32 1.1754944e-38, %v2093_v43  ;;  %vm2092_vm13 = vcmp.eq.f32.partialorder %v2091_v13, 8.507059e+37 }
0x25ec   :  { %v2762_v29 = vpop.eup %2761 }
0x25ed   :  { %v2083_v39 = vmul.f32 %v2762_v29, %v2081_v7  ;;  %vm2088_vm6 = vweird.f32 %v2762_v29 }
0x25ee   :  { %vm2089_vm9 = vmor %vm2087_vm8, %vm2088_vm6 }
0x25ef   :  { %v2084_v41 = vsub.f32 1.0, %v2083_v39 }
0x25f1   :  { %v2085_v8 = vmul.f32 %v2762_v29, %v2084_v41 }
0x25f3   :  { %v2086_v42 = vadd.f32 %v2762_v29, %v2085_v8 }
0x25f5   :  { %v2090_v44 = vsel %vm2089_vm9, %v2762_v29, %v2086_v42 }
0x25f6   :  { %v2095_v45 = vsel %vm2092_vm13, %v2094_v17, %v2090_v44 }
0x25f7   :  { %v2101_v50 = vmul.f32 %v2099_v48, %v2095_v45 }
0x261f   :  { %v1902_v27 = vpop.permute.xlu1 %1901 }
0x2620   :  { %v3547_v35 = vadd.f32 %v1902_v27, %v1894_v26 }
0x2622   :  { %2763 = vtanh.f32 %v3547_v35  ;;  %v1966_v43 = vrot.slane %v3547_v35, 6 }
0x2628   :  { %v2764_v37 = vpop.eup %2763 }
0x2629   :  { %1907 = vrot.lane.b32.xlu1 %v2764_v37, %s3003_s2 }
0x263c   :  { %v2104_v46 = vpop.permute.xlu2 %2103 }
0x263d   :  { %v2106_v47 = vmul.f32 %v2104_v46, %v2095_v45 }
0x263f   :  { %2108 = vrot.lane.b32.xlu2 %v2106_v47, %s3006_s8 }
0x2699   :  { %v2109_v52 = vpop.permute.xlu2 %2108 }
0x269a   :  { %v3553_v56 = vadd.f32 %v2109_v52, %v2101_v50 }
0x269b   :  { %v1908_v53 = vpop.permute.xlu1 %1907 }
0x269c   :  { %2765 = vtanh.f32 %v3553_v56  ;;  %v3556_v54 = vmul.f32 %v1908_v53, %v1888_v28  ;;  %v2149_v41 = vrot.slane %v3553_v56, 6 }
0x269e   :  { %v1916_v55 = vrot.slane %v3556_v54, 4 }
0x26a0   :  { %1917 = vrot.lane.b32.xlu0 %v1916_v55, %s3004_s14 }
0x26a2   :  { %v2766_v57 = vpop.eup %2765 }
0x26a3   :  { %2114 = vrot.lane.b32.xlu1 %v2766_v57, %s3007_s23 }
0x2712   :  { %v1918_v58 = vpop.permute.xlu0 %1917 }
0x2713   :  { %2530 = vmatmul.msk.f32.vlgmr.msrb.gmra.mxu1 %vm188_vm7, %v1918_v58 }
0x2715   :  { %v2115_v60 = vpop.permute.xlu1 %2114 }
0x2716   :  { %v2117_v61 = vmul.f32 %v2115_v60, %v2095_v45 }
0x2718   :  { %2120 = vperm.xlu2 %2564, %v2117_v61  }
0x2772   :  { %v2121_v63 = vpop.permute.xlu2 %2120 }
0x2773   :  { %v2123_v1 = vmul.f32 %v3523_v12, %v2121_v63 }
0x2775   :  { %v2125_v2 = vrot.slane %v2123_v1, 6 }
0x2777   :  { %v2127_v3 = vadd.f32 %v2125_v2, %v3526_v36 }
0x2779   :  { %2767 = vtanh.f32 %v2127_v3  ;;  %v2536_v15 = vmul.f32 -1.442695, %v2127_v3 }
0x277f   :  { %v2768_v5 = vpop.eup %2767 }
0x2780   :  { %2153 = vrot.lane.b32.xlu0 %v2768_v5, %s3005_s22 }
0x2790   :  { %v1938_v6 = vpop.f32.mrf.mxu1 }
0x2791   :  { %v1942_v9 = vrot.slane %v1938_v6, 2 }
0x2793   :  { %v1944_v14 = vadd.f32 %v1942_v9, %v3483_v40 }
0x2795   :  { %2769 = vtanh.f32 %v1944_v14  ;;  %v2531_v16 = vmul.f32 -1.442695, %v1944_v14 }
0x2796   :  { %2771 = vpow2.f32 %v2536_v15 }
0x2797   :  { %2773 = vpow2.f32 %v2531_v16 }
0x279b   :  { %v2770_v19 = vpop.eup %2769 }
0x279c   :  { %1970 = vrot.lane.b32.xlu2 %v2770_v19, %s3003_s2  ;;  %v2772_v11 = vpop.eup %2771 }
0x279d   :  { %v2131_v51 = vadd.f32 1.0, %v2772_v11  ;;  %v2774_v22 = vpop.eup %2773 }
0x279e   :  { %v1948_v23 = vadd.f32 1.0, %v2774_v22 }
0x279f   :  { %2775 = vrcp.f32 %v2131_v51  ;;  %v2143_v21 = vand.u32 2147483648, %v2131_v51  ;;  %vm2137_vm15 = vweird.f32 %v2131_v51  ;;  %v2141_v18 = vand.u32 2147483647, %v2131_v51 }
0x27a0   :  { %2777 = vrcp.f32 %v1948_v23  ;;  %v1960_v38 = vand.u32 2147483648, %v1948_v23  ;;  %vm1954_vm4 = vweird.f32 %v1948_v23  ;;  %v1958_v32 = vand.u32 2147483647, %v1948_v23 }
0x27a1   :  { %v2144_v31 = vor.u32 1.1754944e-38, %v2143_v21  ;;  %vm2142_vm3 = vcmp.eq.f32.partialorder %v2141_v18, 8.507059e+37 }
0x27a2   :  { %v1961_v27 = vor.u32 1.1754944e-38, %v1960_v38  ;;  %vm1959_vm5 = vcmp.eq.f32.partialorder %v1958_v32, 8.507059e+37 }
0x27a5   :  { %v2776_v0 = vpop.eup %2775 }
0x27a6   :  { %v2133_v20 = vmul.f32 %v2776_v0, %v2131_v51  ;;  %v2778_v59 = vpop.eup %2777  ;;  %vm2138_vm14 = vweird.f32 %v2776_v0 }
0x27a7   :  { %v1950_v25 = vmul.f32 %v2778_v59, %v1948_v23  ;;  %vm2139_vm0 = vmor %vm2137_vm15, %vm2138_vm14  ;;  %vm1955_vm2 = vweird.f32 %v2778_v59 }
0x27a8   :  { %v2134_v24 = vsub.f32 1.0, %v2133_v20  ;;  %vm1956_vm1 = vmor %vm1954_vm4, %vm1955_vm2 }
0x27a9   :  { %v1951_v10 = vsub.f32 1.0, %v1950_v25 }
0x27aa   :  { %v2135_v40 = vmul.f32 %v2776_v0, %v2134_v24 }
0x27ab   :  { %v1952_v30 = vmul.f32 %v2778_v59, %v1951_v10 }
0x27ac   :  { %v2136_v28 = vadd.f32 %v2776_v0, %v2135_v40 }
0x27ad   :  { %v1953_v62 = vadd.f32 %v2778_v59, %v1952_v30 }
0x27ae   :  { %v2140_v4 = vsel %vm2139_vm0, %v2776_v0, %v2136_v28 }
0x27af   :  { %v2145_v34 = vsel %vm2142_vm3, %v2144_v31, %v2140_v4  ;;  %v1957_v26 = vsel %vm1956_vm1, %v2778_v59, %v1953_v62 }
0x27b0   :  { %v1962_v29 = vsel %vm1959_vm5, %v1961_v27, %v1957_v26  ;;  %v2151_v8 = vmul.f32 %v2149_v41, %v2145_v34 }
0x27b1   :  { %v1968_v44 = vmul.f32 %v1966_v43, %v1962_v29 }
0x27f2   :  { %v2154_v33 = vpop.permute.xlu0 %2153 }
0x27f3   :  { %v2156_v7 = vmul.f32 %v2154_v33, %v2145_v34 }
0x27f5   :  { %2158 = vrot.lane.b32.xlu1 %v2156_v7, %s3006_s8 }
0x27f6   :  { %v1971_v37 = vpop.permute.xlu2 %1970 }
0x27f7   :  { %v1973_v39 = vmul.f32 %v1971_v37, %v1962_v29 }
0x27f9   :  { %1975 = vrot.lane.b32.xlu0 %v1973_v39, %s3004_s14 }
0x2867   :  { %v2159_v42 = vpop.permute.xlu1 %2158 }
0x2868   :  { %v2161_v13 = vadd.f32 %v2159_v42, %v2151_v8 }
0x286a   :  { %2779 = vtanh.f32 %v2161_v13  ;;  %v2199_v23 = vrot.slane %v2161_v13, 6 }
0x286b   :  { %v1976_v17 = vpop.permute.xlu0 %1975 }
0x286c   :  { %v1978_v45 = vadd.f32 %v1976_v17, %v1968_v44 }
0x286e   :  { %2781 = vtanh.f32 %v1978_v45 }
0x2870   :  { %v2780_v46 = vpop.eup %2779 }
0x2871   :  { %2164 = vrot.lane.b32.xlu1 %v2780_v46, %s3007_s23 }
0x2874   :  { %v2782_v47 = vpop.eup %2781 }
0x2875   :  { %1981 = vrot.lane.b32.xlu0 %v2782_v47, %s3003_s2 }
0x2879   :  { %1838 = vrot.lane.b32.xlu1 %v3530_v49, %s3004_s14 }
0x28e3   :  { %v2165_v48 = vpop.permute.xlu1 %2164 }
0x28e4   :  { %v2167_v50 = vmul.f32 %v2165_v48, %v2145_v34 }
0x28e6   :  { %2170 = vperm.xlu2 %2564, %v2167_v50  }
0x28e7   :  { %v1982_v52 = vpop.permute.xlu0 %1981 }
0x28e8   :  { %v1984_v35 = vmul.f32 %v1982_v52, %v1962_v29 }
0x28ea   :  { %1986 = vrot.lane.b32.xlu0 %v1984_v35, %s3004_s14 }
0x28eb   :  { %v1839_v56 = vpop.permute.xlu1 %1838 }
0x28ec   :  { %1841 = vst.msk [vmem:[#allocation2 + $0x8] sm:$0xc] %vm326_vm10, %v1839_v56 }
0x28ee   :  { %1912 = vrot.lane.b32.xlu2 %v3556_v54, %s3004_s14 }
0x2940   :  { %v2171_v53 = vpop.permute.xlu2 %2170 }
0x2941   :  { %v2173_v55 = vmul.f32 %v3523_v12, %v2171_v53 }
0x2943   :  { %v2175_v57 = vrot.slane %v2173_v55, 6 }
0x2945   :  { %v2177_v58 = vadd.f32 %v2175_v57, %v3526_v36 }
0x2947   :  { %2783 = vtanh.f32 %v2177_v58  ;;  %v2537_v54 = vmul.f32 -1.442695, %v2177_v58 }
0x2948   :  { %v1913_v49 = vpop.permute.xlu2 %1912 }
0x2949   :  { %1915 = vst.msk [vmem:[#allocation2 + $0x8] sm:$0x30] %vm401_vm11, %v1913_v49  ;;  %2785 = vpow2.f32 %v2537_v54 }
0x294d   :  { %v2784_v60 = vpop.eup %2783 }
0x294e   :  { %2203 = vrot.lane.b32.xlu1 %v2784_v60, %s3005_s22 }
0x294f   :  { %v2786_v1 = vpop.eup %2785 }
0x2950   :  { %v2181_v2 = vadd.f32 1.0, %v2786_v1 }
0x2952   :  { %2787 = vrcp.f32 %v2181_v2  ;;  %v2193_v14 = vand.u32 2147483648, %v2181_v2  ;;  %vm2187_vm11 = vweird.f32 %v2181_v2  ;;  %v2191_v19 = vand.u32 2147483647, %v2181_v2 }
0x2954   :  { %v2194_v16 = vor.u32 1.1754944e-38, %v2193_v14 }
0x2958   :  { %v2788_v3 = vpop.eup %2787 }
0x2959   :  { %v2183_v36 = vmul.f32 %v2788_v3, %v2181_v2  ;;  %vm2188_vm10 = vweird.f32 %v2788_v3 }
0x295a   :  { %vm2189_vm6 = vmor %vm2187_vm11, %vm2188_vm10 }
0x295b   :  { %v2184_v5 = vsub.f32 1.0, %v2183_v36 }
0x295c   :  { %v1987_v61 = vpop.permute.xlu0 %1986 }
0x295d   :  { %1989 = vst.msk [vmem:[#allocation2 + $0x8] sm:$0xc0] %vm476_vm12, %v1987_v61  ;;  %v2185_v6 = vmul.f32 %v2788_v3, %v2184_v5  ;;  %vm2192_vm12 = vcmp.eq.f32.partialorder %v2191_v19, 8.507059e+37 }
0x295f   :  { %v2186_v9 = vadd.f32 %v2788_v3, %v2185_v6 }
0x2961   :  { %v2190_v15 = vsel %vm2189_vm6, %v2788_v3, %v2186_v9 }
0x2962   :  { %v2195_v51 = vsel %vm2192_vm12, %v2194_v16, %v2190_v15 }
0x2963   :  { %v2201_v0 = vmul.f32 %v2199_v23, %v2195_v51  ;;  %v2269_v23 = vstv %s2268_s5 }
0x2964   :  { %v1991_v63 = vld [vmem:[#allocation2 + $0x8] sm:$0xff] }
0x2965   :  { %2533 = vmatmul.msk.f32.gmra.mxu2 %vm188_vm7, %v1991_v63 }
0x29c0   :  { %v2204_v11 = vpop.permute.xlu1 %2203 }
0x29c1   :  { %v2206_v22 = vmul.f32 %v2204_v11, %v2195_v51  ;;  %v2323_v11 = vstv %s2540_s24 }
0x29c3   :  { %2208 = vrot.lane.b32.xlu2 %v2206_v22, %s3006_s8 }
0x29e8   :  { %v3588_v21 = vpop.f32.mrf.mxu2 }
0x2a1d   :  { %v2209_v20 = vpop.permute.xlu2 %2208 }
0x2a1e   :  { %v2211_v59 = vadd.f32 %v2209_v20, %v2201_v0 }
0x2a20   :  { %2789 = vtanh.f32 %v2211_v59  ;;  %v2249_v43 = vrot.slane %v2211_v59, 6 }
0x2a26   :  { %v2790_v24 = vpop.eup %2789 }
0x2a27   :  { %2214 = vrot.lane.b32.xlu0 %v2790_v24, %s3007_s23 }
0x2a99   :  { %v2215_v25 = vpop.permute.xlu0 %2214 }
0x2a9a   :  { %v2217_v40 = vmul.f32 %v2215_v25, %v2195_v51 }
0x2a9c   :  { %2220 = vperm.xlu1 %2565, %v2217_v40  }
0x2b0e   :  { %v2221_v10 = vpop.permute.xlu1 %2220 }
0x2b0f   :  { %v2223_v28 = vmul.f32 %v3523_v12, %v2221_v10 }
0x2b11   :  { %v2225_v30 = vrot.slane %v2223_v28, 6 }
0x2b13   :  { %v2227_v18 = vadd.f32 %v2225_v30, %v3588_v21 }
0x2b15   :  { %2791 = vtanh.f32 %v2227_v18  ;;  %v2538_v62 = vmul.f32 -1.442695, %v2227_v18 }
0x2b17   :  { %2793 = vpow2.f32 %v2538_v62 }
0x2b1b   :  { %v2792_v4 = vpop.eup %2791 }
0x2b1c   :  { %2253 = vrot.lane.b32.xlu2 %v2792_v4, %s3005_s22 }
0x2b1d   :  { %v2794_v31 = vpop.eup %2793 }
0x2b1e   :  { %v2231_v38 = vadd.f32 1.0, %v2794_v31 }
0x2b20   :  { %2795 = vrcp.f32 %v2231_v38  ;;  %v2243_v27 = vand.u32 2147483648, %v2231_v38  ;;  %vm2237_vm8 = vweird.f32 %v2231_v38  ;;  %v2241_v29 = vand.u32 2147483647, %v2231_v38 }
0x2b22   :  { %v2244_v39 = vor.u32 1.1754944e-38, %v2243_v27  ;;  %vm2242_vm13 = vcmp.eq.f32.partialorder %v2241_v29, 8.507059e+37 }
0x2b26   :  { %v2796_v32 = vpop.eup %2795 }
0x2b27   :  { %v2233_v33 = vmul.f32 %v2796_v32, %v2231_v38  ;;  %vm2238_vm7 = vweird.f32 %v2796_v32 }
0x2b28   :  { %vm2239_vm9 = vmor %vm2237_vm8, %vm2238_vm7 }
0x2b29   :  { %v2234_v34 = vsub.f32 1.0, %v2233_v33 }
0x2b2b   :  { %v2235_v7 = vmul.f32 %v2796_v32, %v2234_v34 }
0x2b2d   :  { %v2236_v26 = vadd.f32 %v2796_v32, %v2235_v7 }
0x2b2f   :  { %v2240_v37 = vsel %vm2239_vm9, %v2796_v32, %v2236_v26 }
0x2b30   :  { %v2245_v8 = vsel %vm2242_vm13, %v2244_v39, %v2240_v37 }
0x2b31   :  { %v2251_v13 = vmul.f32 %v2249_v43, %v2245_v8 }
0x2b76   :  { %v2254_v41 = vpop.permute.xlu2 %2253 }
0x2b77   :  { %v2256_v42 = vmul.f32 %v2254_v41, %v2245_v8 }
0x2b79   :  { %2258 = vrot.lane.b32.xlu0 %v2256_v42, %s3006_s8 }
0x2beb   :  { %v2259_v44 = vpop.permute.xlu0 %2258 }
0x2bec   :  { %v2261_v17 = vadd.f32 %v2259_v44, %v2251_v13 }
0x2bee   :  { %2797 = vtanh.f32 %v2261_v17  ;;  %v2303_v9 = vrot.slane %v2261_v17, 6  ;;  %v2380_v17 = vstv %s2542_s27 }
0x2bf4   :  { %v2798_v45 = vpop.eup %2797 }
0x2bf5   :  { %2264 = vrot.lane.b32.xlu1 %v2798_v45, %s3007_s23 }
0x2c67   :  { %v2265_v46 = vpop.permute.xlu1 %2264 }
0x2c68   :  { %v2267_v47 = vmul.f32 %v2265_v46, %v2245_v8 }
0x2c6a   :  { %2274 = vperm.xlu2 %2564, %v2267_v47   ;;  %v2270_v20 = vmul.f32 %v2269_v23, %v2267_v47 }
0x2cc4   :  { %v2275_v48 = vpop.permute.xlu2 %2274 }
0x2cc5   :  { %v2277_v50 = vmul.f32 %v3523_v12, %v2275_v48 }
0x2cc7   :  { %v2279_v52 = vrot.slane %v2277_v50, 6 }
0x2cc9   :  { %v2281_v35 = vadd.f32 %v2279_v52, %v3588_v21 }
0x2ccb   :  { %2799 = vtanh.f32 %v2281_v35  ;;  %v2539_v53 = vmul.f32 -1.442695, %v2281_v35 }
0x2ccd   :  { %2801 = vpow2.f32 %v2539_v53 }
0x2cd1   :  { %v2800_v56 = vpop.eup %2799 }
0x2cd2   :  { %2307 = vrot.lane.b32.xlu0 %v2800_v56, %s3005_s22 }
0x2cd3   :  { %v2802_v55 = vpop.eup %2801 }
0x2cd4   :  { %v2285_v57 = vadd.f32 1.0, %v2802_v55 }
0x2cd6   :  { %2803 = vrcp.f32 %v2285_v57  ;;  %v2297_v54 = vand.u32 2147483648, %v2285_v57  ;;  %vm2291_vm15 = vweird.f32 %v2285_v57  ;;  %v2295_v1 = vand.u32 2147483647, %v2285_v57 }
0x2cd8   :  { %v2298_v3 = vor.u32 1.1754944e-38, %v2297_v54  ;;  %vm2296_vm2 = vcmp.eq.f32.partialorder %v2295_v1, 8.507059e+37 }
0x2cdc   :  { %v2804_v58 = vpop.eup %2803 }
0x2cdd   :  { %v2287_v49 = vmul.f32 %v2804_v58, %v2285_v57  ;;  %vm2292_vm14 = vweird.f32 %v2804_v58 }
0x2cde   :  { %vm2293_vm0 = vmor %vm2291_vm15, %vm2292_vm14  ;;  %vm2469_vm14 = vcmask 1024  }
0x2cdf   :  { %v2288_v60 = vsub.f32 1.0, %v2287_v49 }
0x2ce1   :  { %v2289_v61 = vmul.f32 %v2804_v58, %v2288_v60 }
0x2ce3   :  { %v2290_v63 = vadd.f32 %v2804_v58, %v2289_v61 }
0x2ce5   :  { %v2294_v2 = vsel %vm2293_vm0, %v2804_v58, %v2290_v63 }
0x2ce6   :  { %v2299_v5 = vsel %vm2296_vm2, %v2298_v3, %v2294_v2 }
0x2ce7   :  { %v2305_v14 = vmul.f32 %v2303_v9, %v2299_v5 }
0x2d44   :  { %v2308_v36 = vpop.permute.xlu0 %2307 }
0x2d45   :  { %v2310_v6 = vmul.f32 %v2308_v36, %v2299_v5 }
0x2d47   :  { %2312 = vrot.lane.b32.xlu1 %v2310_v6, %s3006_s8 }
0x2db9   :  { %v2313_v19 = vpop.permute.xlu1 %2312 }
0x2dba   :  { %v2315_v15 = vadd.f32 %v2313_v19, %v2305_v14 }
0x2dbc   :  { %2805 = vtanh.f32 %v2315_v15  ;;  %v2360_v8 = vrot.slane %v2315_v15, 6 }
0x2dc2   :  { %v2806_v16 = vpop.eup %2805 }
0x2dc3   :  { %2318 = vrot.lane.b32.xlu2 %v2806_v16, %s3007_s23 }
0x2e1d   :  { %v2319_v51 = vpop.permute.xlu2 %2318 }
0x2e1e   :  { %v2321_v22 = vmul.f32 %v2319_v51, %v2299_v5 }
0x2e20   :  { %v2324_v0 = vmul.f32 %v2323_v11, %v2321_v22  ;;  %2331 = vperm.xlu0 %2563, %v2321_v22   ;;  %v2437_v11 = vstv %s2544_s28 }
0x2e22   :  { %v2326_v59 = vrot.slane %v2324_v0, 2 }
0x2e24   :  { %v2328_v24 = vadd.f32 %v2326_v59, %v2270_v20  ;;  %v2444_v20 = vstv %s3625_s10  ;;  %s3009_s10 = smov 125  }
0x2e92   :  { %v2332_v25 = vpop.permute.xlu0 %2331 }
0x2e93   :  { %v2334_v40 = vmul.f32 %v3523_v12, %v2332_v25 }
0x2e95   :  { %v2336_v10 = vrot.slane %v2334_v40, 6 }
0x2e97   :  { %v2338_v28 = vadd.f32 %v2336_v10, %v3588_v21 }
0x2e99   :  { %2807 = vtanh.f32 %v2338_v28  ;;  %v2541_v18 = vmul.f32 -1.442695, %v2338_v28 }
0x2e9b   :  { %2809 = vpow2.f32 %v2541_v18 }
0x2e9f   :  { %v2808_v30 = vpop.eup %2807 }
0x2ea0   :  { %2364 = vrot.lane.b32.xlu1 %v2808_v30, %s3005_s22 }
0x2ea1   :  { %v2810_v4 = vpop.eup %2809 }
0x2ea2   :  { %v2342_v62 = vadd.f32 1.0, %v2810_v4 }
0x2ea4   :  { %2811 = vrcp.f32 %v2342_v62  ;;  %v2354_v7 = vand.u32 2147483648, %v2342_v62  ;;  %vm2348_vm4 = vweird.f32 %v2342_v62  ;;  %v2352_v26 = vand.u32 2147483647, %v2342_v62 }
0x2ea6   :  { %v2355_v29 = vor.u32 1.1754944e-38, %v2354_v7  ;;  %vm2353_vm5 = vcmp.eq.f32.partialorder %v2352_v26, 8.507059e+37 }
0x2eaa   :  { %v2812_v31 = vpop.eup %2811 }
0x2eab   :  { %v2344_v38 = vmul.f32 %v2812_v31, %v2342_v62  ;;  %vm2349_vm3 = vweird.f32 %v2812_v31 }
0x2eac   :  { %vm2350_vm1 = vmor %vm2348_vm4, %vm2349_vm3 }
0x2ead   :  { %v2345_v32 = vsub.f32 1.0, %v2344_v38 }
0x2eaf   :  { %v2346_v33 = vmul.f32 %v2812_v31, %v2345_v32 }
0x2eb1   :  { %v2347_v34 = vadd.f32 %v2812_v31, %v2346_v33 }
0x2eb3   :  { %v2351_v27 = vsel %vm2350_vm1, %v2812_v31, %v2347_v34 }
0x2eb4   :  { %v2356_v39 = vsel %vm2353_vm5, %v2355_v29, %v2351_v27 }
0x2eb5   :  { %v2362_v42 = vmul.f32 %v2360_v8, %v2356_v39 }
0x2f12   :  { %v2365_v37 = vpop.permute.xlu1 %2364 }
0x2f13   :  { %v2367_v41 = vmul.f32 %v2365_v37, %v2356_v39 }
0x2f15   :  { %2369 = vrot.lane.b32.xlu2 %v2367_v41, %s3006_s8 }
0x2f6f   :  { %v2370_v43 = vpop.permute.xlu2 %2369 }
0x2f70   :  { %v2372_v13 = vadd.f32 %v2370_v43, %v2362_v42 }
0x2f72   :  { %2813 = vtanh.f32 %v2372_v13  ;;  %v2417_v9 = vrot.slane %v2372_v13, 6 }
0x2f78   :  { %v2814_v44 = vpop.eup %2813 }
0x2f79   :  { %2375 = vrot.lane.b32.xlu0 %v2814_v44, %s3007_s23 }
0x2feb   :  { %v2376_v45 = vpop.permute.xlu0 %2375 }
0x2fec   :  { %v2378_v46 = vmul.f32 %v2376_v45, %v2356_v39 }
0x2fee   :  { %v2381_v47 = vmul.f32 %v2380_v17, %v2378_v46  ;;  %2388 = vperm.xlu1 %2565, %v2378_v46  }
0x2ff0   :  { %v2383_v48 = vrot.slane %v2381_v47, 4 }
0x2ff2   :  { %v2385_v50 = vadd.f32 %v2383_v48, %v2328_v24 }
0x3060   :  { %v2389_v52 = vpop.permute.xlu1 %2388 }
0x3061   :  { %v2391_v35 = vmul.f32 %v3523_v12, %v2389_v52 }
0x3063   :  { %v2393_v56 = vrot.slane %v2391_v35, 6 }
0x3065   :  { %v2395_v53 = vadd.f32 %v2393_v56, %v3588_v21 }
0x3067   :  { %2815 = vtanh.f32 %v2395_v53  ;;  %v2543_v57 = vmul.f32 -1.442695, %v2395_v53 }
0x3069   :  { %2817 = vpow2.f32 %v2543_v57 }
0x306d   :  { %v2816_v55 = vpop.eup %2815 }
0x306e   :  { %2421 = vrot.lane.b32.xlu2 %v2816_v55, %s3005_s22 }
0x306f   :  { %v2818_v58 = vpop.eup %2817 }
0x3070   :  { %v2399_v49 = vadd.f32 1.0, %v2818_v58 }
0x3072   :  { %2819 = vrcp.f32 %v2399_v49  ;;  %v2411_v2 = vand.u32 2147483648, %v2399_v49  ;;  %vm2405_vm11 = vweird.f32 %v2399_v49  ;;  %v2409_v12 = vand.u32 2147483647, %v2399_v49 }
0x3074   :  { %v2412_v3 = vor.u32 1.1754944e-38, %v2411_v2  ;;  %vm2410_vm12 = vcmp.eq.f32.partialorder %v2409_v12, 8.507059e+37 }
0x3078   :  { %v2820_v60 = vpop.eup %2819 }
0x3079   :  { %v2401_v61 = vmul.f32 %v2820_v60, %v2399_v49  ;;  %vm2406_vm10 = vweird.f32 %v2820_v60 }
0x307a   :  { %vm2407_vm6 = vmor %vm2405_vm11, %vm2406_vm10 }
0x307b   :  { %v2402_v63 = vsub.f32 1.0, %v2401_v61 }
0x307d   :  { %v2403_v54 = vmul.f32 %v2820_v60, %v2402_v63 }
0x307f   :  { %v2404_v1 = vadd.f32 %v2820_v60, %v2403_v54 }
0x3081   :  { %v2408_v21 = vsel %vm2407_vm6, %v2820_v60, %v2404_v1 }
0x3082   :  { %v2413_v5 = vsel %vm2410_vm12, %v2412_v3, %v2408_v21 }
0x3083   :  { %v2419_v14 = vmul.f32 %v2417_v9, %v2413_v5 }
0x30c8   :  { %v2422_v36 = vpop.permute.xlu2 %2421 }
0x30c9   :  { %v2424_v6 = vmul.f32 %v2422_v36, %v2413_v5 }
0x30cb   :  { %2426 = vrot.lane.b32.xlu0 %v2424_v6, %s3006_s8 }
0x313d   :  { %v2427_v19 = vpop.permute.xlu0 %2426 }
0x313e   :  { %v2429_v15 = vadd.f32 %v2427_v19, %v2419_v14 }
0x3140   :  { %2821 = vtanh.f32 %v2429_v15 }
0x3146   :  { %v2822_v16 = vpop.eup %2821 }
0x3147   :  { %2432 = vrot.lane.b32.xlu1 %v2822_v16, %s3007_s23 }
0x31b9   :  { %v2433_v51 = vpop.permute.xlu1 %2432 }
0x31ba   :  { %v2435_v22 = vmul.f32 %v2433_v51, %v2413_v5 }
0x31bc   :  { %v2438_v23 = vmul.f32 %v2437_v11, %v2435_v22 }
0x31be   :  { %v2440_v0 = vrot.slane %v2438_v23, 6 }
0x31c0   :  { %v2442_v59 = vadd.f32 %v2440_v0, %v2385_v50 }
0x31c2   :  { %v2445_v24 = vadd.f32 %v2444_v20, %v2442_v59 }
0x31c4   :  { %v2545_v25 = vmul.f32 -1.442695, %v2445_v24 }
0x31c6   :  { %2823 = vpow2.f32 %v2545_v25 }
0x31cc   :  { %v2824_v40 = vpop.eup %2823 }
0x31cd   :  { %v2449_v10 = vadd.f32 1.0, %v2824_v40 }
0x31cf   :  { %2825 = vrcp.f32 %v2449_v10  ;;  %v2461_v4 = vand.u32 2147483648, %v2449_v10  ;;  %v2459_v31 = vand.u32 2147483647, %v2449_v10  ;;  %vm2455_vm8 = vweird.f32 %v2449_v10 }
0x31d1   :  { %v2462_v32 = vor.u32 1.1754944e-38, %v2461_v4  ;;  %vm2460_vm13 = vcmp.eq.f32.partialorder %v2459_v31, 8.507059e+37 }
0x31d5   :  { %v2826_v28 = vpop.eup %2825 }
0x31d6   :  { %v2451_v30 = vmul.f32 %v2826_v28, %v2449_v10  ;;  %vm2456_vm7 = vweird.f32 %v2826_v28 }
0x31d7   :  { %vm2457_vm9 = vmor %vm2455_vm8, %vm2456_vm7 }
0x31d8   :  { %v2452_v18 = vsub.f32 1.0, %v2451_v30 }
0x31da   :  { %v2453_v62 = vmul.f32 %v2826_v28, %v2452_v18 }
0x31dc   :  { %v2454_v38 = vadd.f32 %v2826_v28, %v2453_v62 }
0x31de   :  { %v2458_v33 = vsel %vm2457_vm9, %v2826_v28, %v2454_v38 }
0x31df   :  { %v2463_v34 = vsel %vm2460_vm13, %v2462_v32, %v2458_v33 }
0x31e0   :  { %2466 = vrot.lane.b32.xlu2 %v2463_v34, %s3009_s10 }
0x323a   :  { %v2467_v7 = vpop.permute.xlu2 %2466 }
0x323b   :  { %2470 = vst.msk [vmem:[%s3626_s11] sm:$0x3] %vm2469_vm14, %v2467_v7 }
0x323c   :  { %2475 = vsyncpa [#allocation5], 1 }
0x323d   :  { %2476 = vsyncpa [#allocation8], 1 }
0x323e   :  { %2477 = vsyncpa [#allocation11], 1 }
0x323f   :  { %2478 = vsyncpa [#allocation14], 1 }
0x3240   :  { %2479 = vsyncpa [#allocation6], 1 }

</bundles_post_ra>
